<compile_context>
chip_gen: v7x
topology: tpu7x:2x2x1
jax: 0.10.0
libtpu: 0.0.40
codegen_flags: <defaults>
</compile_context>

<pallas_src>
import functools

import jax
import jax.numpy as jnp
from jax import lax
from jax.experimental import pallas as pl
from jax.experimental.pallas import tpu as pltpu


def ggnn_kernel(feat_ref, wenc_ref, benc_ref, adjc_ref, wbig_ref, bagg_ref,
                wih_ref, brz_ref, bihn_ref, bhhn_ref, out_ref, msg_ref,
                *, n_steps, n_etypes, hp, n_nodes, unroll):
    Hp, T, N = hp, n_etypes, n_nodes

    # Whole problem is VMEM resident: load step-invariant operands once.
    adjc = adjc_ref[...]      # (N, T*N)        bf16; col (t*N + j) = A[t, :, j]
    wbig = wbig_ref[...]      # (Hp, (T+3)*Hp)  bf16; [W_0 | .. | W_{T-1} | W_hh]
    bagg = bagg_ref[...]      # (N, Hp)         f32 ; hoisted per-etype bias term
    wih = wih_ref[...]        # (Hp, 3*Hp)      bf16; gate blocks lane-aligned
    brz = brz_ref[...]        # (1, 2*Hp)       f32 ; b_ih + b_hh for r,z gates
    bihn = bihn_ref[...]      # (1, Hp)         f32 ; b_ih, n gate
    bhhn = bhhn_ref[...]      # (1, Hp)         f32 ; b_hh, n gate

    # h^0 = relu(encoding(x))   ([x || 0] padding of the paper == this Linear).
    h0 = jnp.dot(feat_ref[...], wenc_ref[...],
                 preferred_element_type=jnp.float32) + benc_ref[...]
    h0 = jnp.maximum(h0, 0.0)     # (N, Hp) f32; padded lanes exactly 0

    def step(_, h):
        hb = h.astype(jnp.bfloat16)

        # ONE h-side matmul per step: per-etype message transforms AND the GRU
        # hidden-side gates share the same LHS, so their weights were fused
        # along lanes in the wrapper.
        big = jnp.dot(hb, wbig, preferred_element_type=jnp.float32)  # (N,(T+3)Hp)
        gh = big[:, T * Hp:]                                         # (N, 3*Hp)

        # Restack per-etype messages (N, T*Hp) -> (T*N, Hp), etype-major, in
        # bf16, via 128-lane-aligned slices stored at sublane-aligned row
        # offsets of a VMEM scratch: no lane->sublane shuffle, half the bytes.
        msgs = big[:, :T * Hp].astype(jnp.bfloat16)
        for t in range(T):                     # static T: T trivial vst copies
            msg_ref[t * N:(t + 1) * N, :] = msgs[:, t * Hp:(t + 1) * Hp]

        # Aggregate over all incoming edges of all edge types in ONE matmul
        # (K = T*N).  Per-edge bias contribution is the precomputed `bagg`.
        agg = jnp.dot(adjc, msg_ref[...],
                      preferred_element_type=jnp.float32) + bagg      # (N, Hp)

        # PyTorch GRUCell(agg, h); gate order [r | z | n], lane-aligned slices.
        # (agg -> bf16 is fine at moderate in-degree; keep f32 for the gi
        # matmul if degrees / message magnitudes get large.)
        gi = jnp.dot(agg.astype(jnp.bfloat16), wih,
                     preferred_element_type=jnp.float32)               # (N,3Hp)
        rz = jax.nn.sigmoid(gi[:, :2 * Hp] + gh[:, :2 * Hp] + brz)
        r = rz[:, :Hp]
        z = rz[:, Hp:]
        n = jnp.tanh(gi[:, 2 * Hp:] + bihn + r * (gh[:, 2 * Hp:] + bhhn))
        return (1.0 - z) * n + z * h

    h = lax.fori_loop(0, n_steps, step, h0, unroll=unroll)
    out_ref[...] = h


def _pad_to(x, shape):
    return jnp.pad(x, [(0, s - d) for d, s in zip(x.shape, shape)])


def gated_graph_conv(feat, adj, params, *, n_steps, lane=128, sub=16):
    """feat: (N, Din) f32.  adj: (n_etypes, N, N) f32 dense adjacency
    (adj[t, i, j] = #edges j->i of type t).  Returns (N, Dout) f32."""
    n_etypes, N, _ = adj.shape
    in_feats = feat.shape[1]
    H = params["wenc"].shape[1]
    Hp = ((H + lane - 1) // lane) * lane          # lane-pad hidden dim
    Np = ((N + sub - 1) // sub) * sub             # sublane-pad node dim (bf16)
    f32, bf16 = jnp.float32, jnp.bfloat16

    # ---- one-time parameter / adjacency layout plumbing (plain JAX) ----
    feat_p = _pad_to(feat, (Np, in_feats)).astype(bf16)
    adj_p = _pad_to(adj, (n_etypes, Np, Np))      # padded nodes have no edges

    wenc_p = _pad_to(params["wenc"], (in_feats, Hp)).astype(bf16)
    benc_p = _pad_to(params["benc"], (1, Hp)).astype(f32)

    # Fused per-etype message weights: wall[:, t*Hp:(t+1)*Hp] = W_t (padded).
    wlin_p = _pad_to(params["wlin"], (n_etypes, Hp, Hp))
    wall = jnp.transpose(wlin_p, (1, 0, 2)).reshape(Hp, n_etypes * Hp)

    # Hoisted per-etype bias contribution (constant across steps):
    #   bagg[i] = sum_t indeg_t(i) * b_t
    deg = adj_p.sum(axis=2)                                        # (T, Np)
    bagg = jnp.einsum("tn,th->nh", deg, params["blin"][:, 0, :])
    bagg = _pad_to(bagg, (Np, Hp)).astype(f32)

    # Adjacency block matrix, ETYPE-MAJOR columns: adjc[i, t*N + j] = A[t,i,j],
    # matching the etype-major message stack built inside the kernel.
    adjc = jnp.transpose(adj_p, (1, 0, 2)).reshape(Np, n_etypes * Np).astype(bf16)

    # GRU gate weights/biases: each HxH (or 1xH) gate block placed at a
    # 128-lane-aligned column offset inside a zero-padded (rows, 3*Hp) slab.
    def pad_gates(w, rows_out):
        out = jnp.zeros((rows_out, 3 * Hp), f32)
        for g in range(3):
            out = out.at[:w.shape[0], g * Hp:g * Hp + H].set(
                w[:, g * H:(g + 1) * H])
        return out

    wih_p = pad_gates(params["wih"], Hp).astype(bf16)
    whh_p = pad_gates(params["whh"], Hp)
    bih_p = pad_gates(params["bih"], 1)
    bhh_p = pad_gates(params["bhh"], 1)

    # Fuse the two h-side matmuls: W_big = [wall | whh]  (review item 1).
    wbig = jnp.concatenate([wall, whh_p], axis=1).astype(bf16)  # (Hp, (T+3)Hp)

    # Pre-summed r/z gate biases; n-gate biases stay separate (r * gh_n).
    brz = (bih_p + bhh_p)[:, :2 * Hp]
    bihn = bih_p[:, 2 * Hp:]
    bhhn = bhh_p[:, 2 * Hp:]

    kernel = functools.partial(ggnn_kernel, n_steps=n_steps,
                               n_etypes=n_etypes, hp=Hp, n_nodes=Np,
                               unroll=(n_steps <= 4))
    vmem = pl.BlockSpec(memory_space=pltpu.MemorySpace.VMEM)
    out = pl.pallas_call(
        kernel,
        out_shape=jax.ShapeDtypeStruct((Np, Hp), jnp.float32),  # lane-dense out
        in_specs=[vmem] * 10,
        out_specs=vmem,
        scratch_shapes=[pltpu.VMEM((n_etypes * Np, Hp), jnp.bfloat16)],
        # Monolithic toy-shape kernel uses < 2 MiB VMEM; per-generation limits
        # (raise toward ~100 MiB on v5e/v6e, stay well under 64 MiB on v7x)
        # only matter once the row-block tiling TODO lands.
        compiler_params=pltpu.CompilerParams(
            vmem_limit_bytes=32 * 1024 * 1024),
    )(feat_p, wenc_p, benc_p, adjc, wbig, bagg, wih_p, brz, bihn, bhhn)
    return out[:N, :H]


def init_params(key, in_feats, out_feats, n_etypes):
    """Deterministic synthetic parameters (shapes match the PyTorch module,
    stored pre-transposed for right-multiplication: x @ W)."""
    ks = jax.random.split(key, 8)
    gain = jnp.sqrt(2.0)  # init.calculate_gain('relu')

    # encoding: nn.Linear(in_feats, out_feats)
    wenc = jax.random.normal(ks[0], (in_feats, out_feats), jnp.float32) / jnp.sqrt(in_feats)
    benc = jax.random.normal(ks[1], (1, out_feats), jnp.float32) * 0.01

    # per-etype linears: xavier_normal_(gain=relu).  (PyTorch zero-inits the
    # biases; small non-zero values here so the hoisted-bias path is tested.)
    std = gain * jnp.sqrt(2.0 / (out_feats + out_feats))
    wlin = jax.random.normal(ks[2], (n_etypes, out_feats, out_feats), jnp.float32) * std
    blin = jax.random.normal(ks[7], (n_etypes, 1, out_feats), jnp.float32) * 0.05

    # GRUCell(out_feats, out_feats): uniform(-1/sqrt(H), 1/sqrt(H)), gates [r|z|n]
    bound = 1.0 / jnp.sqrt(out_feats)
    wih = jax.random.uniform(ks[3], (out_feats, 3 * out_feats), jnp.float32, -bound, bound)
    whh = jax.random.uniform(ks[4], (out_feats, 3 * out_feats), jnp.float32, -bound, bound)
    bih = jax.random.uniform(ks[5], (1, 3 * out_feats), jnp.float32, -bound, bound)
    bhh = jax.random.uniform(ks[6], (1, 3 * out_feats), jnp.float32, -bound, bound)

    return dict(wenc=wenc, benc=benc, wlin=wlin, blin=blin,
                wih=wih, whh=whh, bih=bih, bhh=bhh)


def reference_forward(feat, adj, params, *, n_steps):
    """Pure-JAX f32 reference mirroring the PyTorch forward semantics."""
    H = params["wenc"].shape[1]
    h = jnp.maximum(feat @ params["wenc"] + params["benc"], 0.0)
    for _ in range(n_steps):
        agg = jnp.zeros_like(h)
        for t in range(adj.shape[0]):
            agg = agg + adj[t] @ (h @ params["wlin"][t] + params["blin"][t])
        gi = agg @ params["wih"] + params["bih"]
        gh = h @ params["whh"] + params["bhh"]
        r = jax.nn.sigmoid(gi[:, :H] + gh[:, :H])
        z = jax.nn.sigmoid(gi[:, H:2 * H] + gh[:, H:2 * H])
        n = jnp.tanh(gi[:, 2 * H:] + r * gh[:, 2 * H:])
        h = (1.0 - z) * n + z * h
    return h


if __name__ == "__main__":
    key = jax.random.PRNGKey(0)

    # M-batching (review item 3): stack G independent small graphs
    # block-diagonally — identical forward semantics to running them
    # separately, but every per-step matmul now has M = G*Ng = 128 rows
    # (fills the v5e MXU rows; 50% of v6e/v7x) instead of 16.
    G = 8             # graphs in the batch
    Ng = 16           # nodes per graph
    Eg = 24           # edges per graph
    N = G * Ng        # 128 total nodes
    in_feats = 16
    out_feats = 32
    n_steps = 3
    n_etypes = 4

    k_feat, k_src, k_dst, k_ety, k_par = jax.random.split(key, 5)
    feat = jax.random.normal(k_feat, (N, in_feats), jnp.float32)
    offs = jnp.arange(G)[:, None] * Ng
    src = (jax.random.randint(k_src, (G, Eg), 0, Ng) + offs).ravel()
    dst = (jax.random.randint(k_dst, (G, Eg), 0, Ng) + offs).ravel()
    etypes = jax.random.randint(k_ety, (G, Eg), 0, n_etypes).ravel()

    # Dense per-etype adjacency (graph preprocessing glue, plain JAX scatter);
    # block-diagonal by construction.
    adj = jnp.zeros((n_etypes, N, N), jnp.float32).at[etypes, dst, src].add(1.0)

    params = init_params(k_par, in_feats, out_feats, n_etypes)

    out = gated_graph_conv(feat, adj, params, n_steps=n_steps)
    out = jax.block_until_ready(out)

    ref = reference_forward(feat, adj, params, n_steps=n_steps)
    assert out.shape == (N, out_feats)
    # bf16 matmul operands (f32 accumulation) over 3 recurrent steps.
    err = float(jnp.max(jnp.abs(out - ref)))
    rel = float(jnp.linalg.norm(out - ref) / jnp.linalg.norm(ref))
    assert err < 1e-1 and rel < 2e-2, f"max abs err {err}, rel fro err {rel}"

    print("KERNEL_OK")
</pallas_src>

<mosaic_0001>
module attributes {stable_mosaic.version = 11 : i64} {
  func.func @ggnn_kernel(%arg0: memref<128x16xbf16, #tpu.memory_space<vmem>>, %arg1: memref<16x128xbf16, #tpu.memory_space<vmem>>, %arg2: memref<1x128xf32, #tpu.memory_space<vmem>>, %arg3: memref<128x512xbf16, #tpu.memory_space<vmem>>, %arg4: memref<128x896xbf16, #tpu.memory_space<vmem>>, %arg5: memref<128x128xf32, #tpu.memory_space<vmem>>, %arg6: memref<128x384xbf16, #tpu.memory_space<vmem>>, %arg7: memref<1x256xf32, #tpu.memory_space<vmem>>, %arg8: memref<1x128xf32, #tpu.memory_space<vmem>>, %arg9: memref<1x128xf32, #tpu.memory_space<vmem>>, %arg10: memref<128x128xf32, #tpu.memory_space<vmem>>, %arg11: memref<512x128xbf16, #tpu.memory_space<vmem>>) attributes {dimension_semantics = [], scalar_prefetch = 0 : i64, scratch_operands = 1 : i64, tpu.core_type = #tpu.core_type<tc>} {
    %c0 = arith.constant 0 : index
    %c0_0 = arith.constant 0 : index
    %0 = vector.load %arg3[%c0, %c0_0] : memref<128x512xbf16, #tpu.memory_space<vmem>>, vector<128x512xbf16>
    %c0_1 = arith.constant 0 : index
    %c0_2 = arith.constant 0 : index
    %1 = vector.load %arg4[%c0_1, %c0_2] : memref<128x896xbf16, #tpu.memory_space<vmem>>, vector<128x896xbf16>
    %c0_3 = arith.constant 0 : index
    %c0_4 = arith.constant 0 : index
    %2 = vector.load %arg5[%c0_3, %c0_4] : memref<128x128xf32, #tpu.memory_space<vmem>>, vector<128x128xf32>
    %c0_5 = arith.constant 0 : index
    %c0_6 = arith.constant 0 : index
    %3 = vector.load %arg6[%c0_5, %c0_6] : memref<128x384xbf16, #tpu.memory_space<vmem>>, vector<128x384xbf16>
    %c0_7 = arith.constant 0 : index
    %c0_8 = arith.constant 0 : index
    %4 = vector.load %arg7[%c0_7, %c0_8] : memref<1x256xf32, #tpu.memory_space<vmem>>, vector<1x256xf32>
    %c0_9 = arith.constant 0 : index
    %c0_10 = arith.constant 0 : index
    %5 = vector.load %arg8[%c0_9, %c0_10] : memref<1x128xf32, #tpu.memory_space<vmem>>, vector<1x128xf32>
    %c0_11 = arith.constant 0 : index
    %c0_12 = arith.constant 0 : index
    %6 = vector.load %arg9[%c0_11, %c0_12] : memref<1x128xf32, #tpu.memory_space<vmem>>, vector<1x128xf32>
    %c0_13 = arith.constant 0 : index
    %c0_14 = arith.constant 0 : index
    %7 = vector.load %arg0[%c0_13, %c0_14] : memref<128x16xbf16, #tpu.memory_space<vmem>>, vector<128x16xbf16>
    %c0_15 = arith.constant 0 : index
    %c0_16 = arith.constant 0 : index
    %8 = vector.load %arg1[%c0_15, %c0_16] : memref<16x128xbf16, #tpu.memory_space<vmem>>, vector<16x128xbf16>
    %cst = arith.constant dense<0.000000e+00> : vector<128x128xf32>
    %9 = tpu.matmul %7, %8, %cst {dimension_numbers = #tpu.dot_dimension_numbers<[1], [0], [0], [1], [0, 0, 1, 1], [], []>} : vector<128x16xbf16>, vector<16x128xbf16>, vector<128x128xf32> -> vector<128x128xf32>
    %c0_17 = arith.constant 0 : index
    %c0_18 = arith.constant 0 : index
    %10 = vector.load %arg2[%c0_17, %c0_18] : memref<1x128xf32, #tpu.memory_space<vmem>>, vector<1x128xf32>
    %11 = vector.broadcast %10 : vector<1x128xf32> to vector<128x128xf32>
    %12 = arith.addf %9, %11 : vector<128x128xf32>
    %cst_19 = arith.constant 0.000000e+00 : f32
    %13 = vector.broadcast %cst_19 : f32 to vector<128x128xf32>
    %14 = arith.maximumf %12, %13 : vector<128x128xf32>
    %c0_i32 = arith.constant 0 : i32
    %15 = arith.truncf %14 : vector<128x128xf32> to vector<128x128xbf16>
    %cst_20 = arith.constant dense<0.000000e+00> : vector<128x896xf32>
    %16 = tpu.matmul %15, %1, %cst_20 {dimension_numbers = #tpu.dot_dimension_numbers<[1], [0], [0], [1], [0, 0, 1, 1], [], []>} : vector<128x128xbf16>, vector<128x896xbf16>, vector<128x896xf32> -> vector<128x896xf32>
    %17 = vector.extract_strided_slice %16 {offsets = [0, 512], sizes = [128, 384], strides = [1, 1]} : vector<128x896xf32> to vector<128x384xf32>
    %18 = vector.extract_strided_slice %16 {offsets = [0, 0], sizes = [128, 512], strides = [1, 1]} : vector<128x896xf32> to vector<128x512xf32>
    %19 = arith.truncf %18 : vector<128x512xf32> to vector<128x512xbf16>
    %20 = vector.extract_strided_slice %19 {offsets = [0, 0], sizes = [128, 128], strides = [1, 1]} : vector<128x512xbf16> to vector<128x128xbf16>
    %c0_21 = arith.constant 0 : index
    %c0_22 = arith.constant 0 : index
    %21 = vector.load %arg11[%c0_21, %c0_22] : memref<512x128xbf16, #tpu.memory_space<vmem>>, vector<128x128xbf16>
    tpu.vector_store %arg11[%c0_21, %c0_22], %20 {strides = array<i32>} : memref<512x128xbf16, #tpu.memory_space<vmem>>, vector<128x128xbf16>,
    %22 = vector.extract_strided_slice %19 {offsets = [0, 128], sizes = [128, 128], strides = [1, 1]} : vector<128x512xbf16> to vector<128x128xbf16>
    %c128 = arith.constant 128 : index
    %c0_23 = arith.constant 0 : index
    %23 = vector.load %arg11[%c128, %c0_23] : memref<512x128xbf16, #tpu.memory_space<vmem>>, vector<128x128xbf16>
    tpu.vector_store %arg11[%c128, %c0_23], %22 {strides = array<i32>} : memref<512x128xbf16, #tpu.memory_space<vmem>>, vector<128x128xbf16>,
    %24 = vector.extract_strided_slice %19 {offsets = [0, 256], sizes = [128, 128], strides = [1, 1]} : vector<128x512xbf16> to vector<128x128xbf16>
    %c256 = arith.constant 256 : index
    %c0_24 = arith.constant 0 : index
    %25 = vector.load %arg11[%c256, %c0_24] : memref<512x128xbf16, #tpu.memory_space<vmem>>, vector<128x128xbf16>
    tpu.vector_store %arg11[%c256, %c0_24], %24 {strides = array<i32>} : memref<512x128xbf16, #tpu.memory_space<vmem>>, vector<128x128xbf16>,
    %26 = vector.extract_strided_slice %19 {offsets = [0, 384], sizes = [128, 128], strides = [1, 1]} : vector<128x512xbf16> to vector<128x128xbf16>
    %c384 = arith.constant 384 : index
    %c0_25 = arith.constant 0 : index
    %27 = vector.load %arg11[%c384, %c0_25] : memref<512x128xbf16, #tpu.memory_space<vmem>>, vector<128x128xbf16>
    tpu.vector_store %arg11[%c384, %c0_25], %26 {strides = array<i32>} : memref<512x128xbf16, #tpu.memory_space<vmem>>, vector<128x128xbf16>,
    %c0_26 = arith.constant 0 : index
    %c0_27 = arith.constant 0 : index
    %28 = vector.load %arg11[%c0_26, %c0_27] : memref<512x128xbf16, #tpu.memory_space<vmem>>, vector<512x128xbf16>
    %cst_28 = arith.constant dense<0.000000e+00> : vector<128x128xf32>
    %29 = tpu.matmul %0, %28, %cst_28 {dimension_numbers = #tpu.dot_dimension_numbers<[1], [0], [0], [1], [0, 0, 1, 1], [], []>} : vector<128x512xbf16>, vector<512x128xbf16>, vector<128x128xf32> -> vector<128x128xf32>
    %30 = arith.addf %29, %2 : vector<128x128xf32>
    %31 = arith.truncf %30 : vector<128x128xf32> to vector<128x128xbf16>
    %cst_29 = arith.constant dense<0.000000e+00> : vector<128x384xf32>
    %32 = tpu.matmul %31, %3, %cst_29 {dimension_numbers = #tpu.dot_dimension_numbers<[1], [0], [0], [1], [0, 0, 1, 1], [], []>} : vector<128x128xbf16>, vector<128x384xbf16>, vector<128x384xf32> -> vector<128x384xf32>
    %33 = vector.extract_strided_slice %32 {offsets = [0, 0], sizes = [128, 256], strides = [1, 1]} : vector<128x384xf32> to vector<128x256xf32>
    %34 = vector.extract_strided_slice %17 {offsets = [0, 0], sizes = [128, 256], strides = [1, 1]} : vector<128x384xf32> to vector<128x256xf32>
    %35 = arith.addf %33, %34 : vector<128x256xf32>
    %36 = vector.broadcast %4 : vector<1x256xf32> to vector<128x256xf32>
    %37 = arith.addf %35, %36 : vector<128x256xf32>
    %38 = arith.negf %37 : vector<128x256xf32>
    %39 = math.exp %38 : vector<128x256xf32>
    %cst_30 = arith.constant 1.000000e+00 : f32
    %40 = vector.broadcast %cst_30 : f32 to vector<128x256xf32>
    %41 = arith.addf %40, %39 : vector<128x256xf32>
    %42 = arith.divf %40, %41 : vector<128x256xf32>
    %43 = vector.extract_strided_slice %42 {offsets = [0, 0], sizes = [128, 128], strides = [1, 1]} : vector<128x256xf32> to vector<128x128xf32>
    %44 = vector.extract_strided_slice %42 {offsets = [0, 128], sizes = [128, 128], strides = [1, 1]} : vector<128x256xf32> to vector<128x128xf32>
    %45 = vector.extract_strided_slice %32 {offsets = [0, 256], sizes = [128, 128], strides = [1, 1]} : vector<128x384xf32> to vector<128x128xf32>
    %46 = vector.broadcast %5 : vector<1x128xf32> to vector<128x128xf32>
    %47 = arith.addf %45, %46 : vector<128x128xf32>
    %48 = vector.extract_strided_slice %17 {offsets = [0, 256], sizes = [128, 128], strides = [1, 1]} : vector<128x384xf32> to vector<128x128xf32>
    %49 = vector.broadcast %6 : vector<1x128xf32> to vector<128x128xf32>
    %50 = arith.addf %48, %49 : vector<128x128xf32>
    %51 = arith.mulf %43, %50 : vector<128x128xf32>
    %52 = arith.addf %47, %51 : vector<128x128xf32>
    %53 = math.tanh %52 : vector<128x128xf32>
    %cst_31 = arith.constant 1.000000e+00 : f32
    %54 = vector.broadcast %cst_31 : f32 to vector<128x128xf32>
    %55 = arith.subf %54, %44 : vector<128x128xf32>
    %56 = arith.mulf %55, %53 : vector<128x128xf32>
    %57 = arith.mulf %44, %14 : vector<128x128xf32>
    %58 = arith.addf %56, %57 : vector<128x128xf32>
    %c1_i32 = arith.constant 1 : i32
    %59 = arith.truncf %58 : vector<128x128xf32> to vector<128x128xbf16>
    %cst_32 = arith.constant dense<0.000000e+00> : vector<128x896xf32>
    %60 = tpu.matmul %59, %1, %cst_32 {dimension_numbers = #tpu.dot_dimension_numbers<[1], [0], [0], [1], [0, 0, 1, 1], [], []>} : vector<128x128xbf16>, vector<128x896xbf16>, vector<128x896xf32> -> vector<128x896xf32>
    %61 = vector.extract_strided_slice %60 {offsets = [0, 512], sizes = [128, 384], strides = [1, 1]} : vector<128x896xf32> to vector<128x384xf32>
    %62 = vector.extract_strided_slice %60 {offsets = [0, 0], sizes = [128, 512], strides = [1, 1]} : vector<128x896xf32> to vector<128x512xf32>
    %63 = arith.truncf %62 : vector<128x512xf32> to vector<128x512xbf16>
    %64 = vector.extract_strided_slice %63 {offsets = [0, 0], sizes = [128, 128], strides = [1, 1]} : vector<128x512xbf16> to vector<128x128xbf16>
    %c0_33 = arith.constant 0 : index
    %c0_34 = arith.constant 0 : index
    %65 = vector.load %arg11[%c0_33, %c0_34] : memref<512x128xbf16, #tpu.memory_space<vmem>>, vector<128x128xbf16>
    tpu.vector_store %arg11[%c0_33, %c0_34], %64 {strides = array<i32>} : memref<512x128xbf16, #tpu.memory_space<vmem>>, vector<128x128xbf16>,
    %66 = vector.extract_strided_slice %63 {offsets = [0, 128], sizes = [128, 128], strides = [1, 1]} : vector<128x512xbf16> to vector<128x128xbf16>
    %c128_35 = arith.constant 128 : index
    %c0_36 = arith.constant 0 : index
    %67 = vector.load %arg11[%c128_35, %c0_36] : memref<512x128xbf16, #tpu.memory_space<vmem>>, vector<128x128xbf16>
    tpu.vector_store %arg11[%c128_35, %c0_36], %66 {strides = array<i32>} : memref<512x128xbf16, #tpu.memory_space<vmem>>, vector<128x128xbf16>,
    %68 = vector.extract_strided_slice %63 {offsets = [0, 256], sizes = [128, 128], strides = [1, 1]} : vector<128x512xbf16> to vector<128x128xbf16>
    %c256_37 = arith.constant 256 : index
    %c0_38 = arith.constant 0 : index
    %69 = vector.load %arg11[%c256_37, %c0_38] : memref<512x128xbf16, #tpu.memory_space<vmem>>, vector<128x128xbf16>
    tpu.vector_store %arg11[%c256_37, %c0_38], %68 {strides = array<i32>} : memref<512x128xbf16, #tpu.memory_space<vmem>>, vector<128x128xbf16>,
    %70 = vector.extract_strided_slice %63 {offsets = [0, 384], sizes = [128, 128], strides = [1, 1]} : vector<128x512xbf16> to vector<128x128xbf16>
    %c384_39 = arith.constant 384 : index
    %c0_40 = arith.constant 0 : index
    %71 = vector.load %arg11[%c384_39, %c0_40] : memref<512x128xbf16, #tpu.memory_space<vmem>>, vector<128x128xbf16>
    tpu.vector_store %arg11[%c384_39, %c0_40], %70 {strides = array<i32>} : memref<512x128xbf16, #tpu.memory_space<vmem>>, vector<128x128xbf16>,
    %c0_41 = arith.constant 0 : index
    %c0_42 = arith.constant 0 : index
    %72 = vector.load %arg11[%c0_41, %c0_42] : memref<512x128xbf16, #tpu.memory_space<vmem>>, vector<512x128xbf16>
    %cst_43 = arith.constant dense<0.000000e+00> : vector<128x128xf32>
    %73 = tpu.matmul %0, %72, %cst_43 {dimension_numbers = #tpu.dot_dimension_numbers<[1], [0], [0], [1], [0, 0, 1, 1], [], []>} : vector<128x512xbf16>, vector<512x128xbf16>, vector<128x128xf32> -> vector<128x128xf32>
    %74 = arith.addf %73, %2 : vector<128x128xf32>
    %75 = arith.truncf %74 : vector<128x128xf32> to vector<128x128xbf16>
    %cst_44 = arith.constant dense<0.000000e+00> : vector<128x384xf32>
    %76 = tpu.matmul %75, %3, %cst_44 {dimension_numbers = #tpu.dot_dimension_numbers<[1], [0], [0], [1], [0, 0, 1, 1], [], []>} : vector<128x128xbf16>, vector<128x384xbf16>, vector<128x384xf32> -> vector<128x384xf32>
    %77 = vector.extract_strided_slice %76 {offsets = [0, 0], sizes = [128, 256], strides = [1, 1]} : vector<128x384xf32> to vector<128x256xf32>
    %78 = vector.extract_strided_slice %61 {offsets = [0, 0], sizes = [128, 256], strides = [1, 1]} : vector<128x384xf32> to vector<128x256xf32>
    %79 = arith.addf %77, %78 : vector<128x256xf32>
    %80 = vector.broadcast %4 : vector<1x256xf32> to vector<128x256xf32>
    %81 = arith.addf %79, %80 : vector<128x256xf32>
    %82 = arith.negf %81 : vector<128x256xf32>
    %83 = math.exp %82 : vector<128x256xf32>
    %cst_45 = arith.constant 1.000000e+00 : f32
    %84 = vector.broadcast %cst_45 : f32 to vector<128x256xf32>
    %85 = arith.addf %84, %83 : vector<128x256xf32>
    %86 = arith.divf %84, %85 : vector<128x256xf32>
    %87 = vector.extract_strided_slice %86 {offsets = [0, 0], sizes = [128, 128], strides = [1, 1]} : vector<128x256xf32> to vector<128x128xf32>
    %88 = vector.extract_strided_slice %86 {offsets = [0, 128], sizes = [128, 128], strides = [1, 1]} : vector<128x256xf32> to vector<128x128xf32>
    %89 = vector.extract_strided_slice %76 {offsets = [0, 256], sizes = [128, 128], strides = [1, 1]} : vector<128x384xf32> to vector<128x128xf32>
    %90 = vector.broadcast %5 : vector<1x128xf32> to vector<128x128xf32>
    %91 = arith.addf %89, %90 : vector<128x128xf32>
    %92 = vector.extract_strided_slice %61 {offsets = [0, 256], sizes = [128, 128], strides = [1, 1]} : vector<128x384xf32> to vector<128x128xf32>
    %93 = vector.broadcast %6 : vector<1x128xf32> to vector<128x128xf32>
    %94 = arith.addf %92, %93 : vector<128x128xf32>
    %95 = arith.mulf %87, %94 : vector<128x128xf32>
    %96 = arith.addf %91, %95 : vector<128x128xf32>
    %97 = math.tanh %96 : vector<128x128xf32>
    %cst_46 = arith.constant 1.000000e+00 : f32
    %98 = vector.broadcast %cst_46 : f32 to vector<128x128xf32>
    %99 = arith.subf %98, %88 : vector<128x128xf32>
    %100 = arith.mulf %99, %97 : vector<128x128xf32>
    %101 = arith.mulf %88, %58 : vector<128x128xf32>
    %102 = arith.addf %100, %101 : vector<128x128xf32>
    %c2_i32 = arith.constant 2 : i32
    %103 = arith.truncf %102 : vector<128x128xf32> to vector<128x128xbf16>
    %cst_47 = arith.constant dense<0.000000e+00> : vector<128x896xf32>
    %104 = tpu.matmul %103, %1, %cst_47 {dimension_numbers = #tpu.dot_dimension_numbers<[1], [0], [0], [1], [0, 0, 1, 1], [], []>} : vector<128x128xbf16>, vector<128x896xbf16>, vector<128x896xf32> -> vector<128x896xf32>
    %105 = vector.extract_strided_slice %104 {offsets = [0, 512], sizes = [128, 384], strides = [1, 1]} : vector<128x896xf32> to vector<128x384xf32>
    %106 = vector.extract_strided_slice %104 {offsets = [0, 0], sizes = [128, 512], strides = [1, 1]} : vector<128x896xf32> to vector<128x512xf32>
    %107 = arith.truncf %106 : vector<128x512xf32> to vector<128x512xbf16>
    %108 = vector.extract_strided_slice %107 {offsets = [0, 0], sizes = [128, 128], strides = [1, 1]} : vector<128x512xbf16> to vector<128x128xbf16>
    %c0_48 = arith.constant 0 : index
    %c0_49 = arith.constant 0 : index
    %109 = vector.load %arg11[%c0_48, %c0_49] : memref<512x128xbf16, #tpu.memory_space<vmem>>, vector<128x128xbf16>
    tpu.vector_store %arg11[%c0_48, %c0_49], %108 {strides = array<i32>} : memref<512x128xbf16, #tpu.memory_space<vmem>>, vector<128x128xbf16>,
    %110 = vector.extract_strided_slice %107 {offsets = [0, 128], sizes = [128, 128], strides = [1, 1]} : vector<128x512xbf16> to vector<128x128xbf16>
    %c128_50 = arith.constant 128 : index
    %c0_51 = arith.constant 0 : index
    %111 = vector.load %arg11[%c128_50, %c0_51] : memref<512x128xbf16, #tpu.memory_space<vmem>>, vector<128x128xbf16>
    tpu.vector_store %arg11[%c128_50, %c0_51], %110 {strides = array<i32>} : memref<512x128xbf16, #tpu.memory_space<vmem>>, vector<128x128xbf16>,
    %112 = vector.extract_strided_slice %107 {offsets = [0, 256], sizes = [128, 128], strides = [1, 1]} : vector<128x512xbf16> to vector<128x128xbf16>
    %c256_52 = arith.constant 256 : index
    %c0_53 = arith.constant 0 : index
    %113 = vector.load %arg11[%c256_52, %c0_53] : memref<512x128xbf16, #tpu.memory_space<vmem>>, vector<128x128xbf16>
    tpu.vector_store %arg11[%c256_52, %c0_53], %112 {strides = array<i32>} : memref<512x128xbf16, #tpu.memory_space<vmem>>, vector<128x128xbf16>,
    %114 = vector.extract_strided_slice %107 {offsets = [0, 384], sizes = [128, 128], strides = [1, 1]} : vector<128x512xbf16> to vector<128x128xbf16>
    %c384_54 = arith.constant 384 : index
    %c0_55 = arith.constant 0 : index
    %115 = vector.load %arg11[%c384_54, %c0_55] : memref<512x128xbf16, #tpu.memory_space<vmem>>, vector<128x128xbf16>
    tpu.vector_store %arg11[%c384_54, %c0_55], %114 {strides = array<i32>} : memref<512x128xbf16, #tpu.memory_space<vmem>>, vector<128x128xbf16>,
    %c0_56 = arith.constant 0 : index
    %c0_57 = arith.constant 0 : index
    %116 = vector.load %arg11[%c0_56, %c0_57] : memref<512x128xbf16, #tpu.memory_space<vmem>>, vector<512x128xbf16>
    %cst_58 = arith.constant dense<0.000000e+00> : vector<128x128xf32>
    %117 = tpu.matmul %0, %116, %cst_58 {dimension_numbers = #tpu.dot_dimension_numbers<[1], [0], [0], [1], [0, 0, 1, 1], [], []>} : vector<128x512xbf16>, vector<512x128xbf16>, vector<128x128xf32> -> vector<128x128xf32>
    %118 = arith.addf %117, %2 : vector<128x128xf32>
    %119 = arith.truncf %118 : vector<128x128xf32> to vector<128x128xbf16>
    %cst_59 = arith.constant dense<0.000000e+00> : vector<128x384xf32>
    %120 = tpu.matmul %119, %3, %cst_59 {dimension_numbers = #tpu.dot_dimension_numbers<[1], [0], [0], [1], [0, 0, 1, 1], [], []>} : vector<128x128xbf16>, vector<128x384xbf16>, vector<128x384xf32> -> vector<128x384xf32>
    %121 = vector.extract_strided_slice %120 {offsets = [0, 0], sizes = [128, 256], strides = [1, 1]} : vector<128x384xf32> to vector<128x256xf32>
    %122 = vector.extract_strided_slice %105 {offsets = [0, 0], sizes = [128, 256], strides = [1, 1]} : vector<128x384xf32> to vector<128x256xf32>
    %123 = arith.addf %121, %122 : vector<128x256xf32>
    %124 = vector.broadcast %4 : vector<1x256xf32> to vector<128x256xf32>
    %125 = arith.addf %123, %124 : vector<128x256xf32>
    %126 = arith.negf %125 : vector<128x256xf32>
    %127 = math.exp %126 : vector<128x256xf32>
    %cst_60 = arith.constant 1.000000e+00 : f32
    %128 = vector.broadcast %cst_60 : f32 to vector<128x256xf32>
    %129 = arith.addf %128, %127 : vector<128x256xf32>
    %130 = arith.divf %128, %129 : vector<128x256xf32>
    %131 = vector.extract_strided_slice %130 {offsets = [0, 0], sizes = [128, 128], strides = [1, 1]} : vector<128x256xf32> to vector<128x128xf32>
    %132 = vector.extract_strided_slice %130 {offsets = [0, 128], sizes = [128, 128], strides = [1, 1]} : vector<128x256xf32> to vector<128x128xf32>
    %133 = vector.extract_strided_slice %120 {offsets = [0, 256], sizes = [128, 128], strides = [1, 1]} : vector<128x384xf32> to vector<128x128xf32>
    %134 = vector.broadcast %5 : vector<1x128xf32> to vector<128x128xf32>
    %135 = arith.addf %133, %134 : vector<128x128xf32>
    %136 = vector.extract_strided_slice %105 {offsets = [0, 256], sizes = [128, 128], strides = [1, 1]} : vector<128x384xf32> to vector<128x128xf32>
    %137 = vector.broadcast %6 : vector<1x128xf32> to vector<128x128xf32>
    %138 = arith.addf %136, %137 : vector<128x128xf32>
    %139 = arith.mulf %131, %138 : vector<128x128xf32>
    %140 = arith.addf %135, %139 : vector<128x128xf32>
    %141 = math.tanh %140 : vector<128x128xf32>
    %cst_61 = arith.constant 1.000000e+00 : f32
    %142 = vector.broadcast %cst_61 : f32 to vector<128x128xf32>
    %143 = arith.subf %142, %132 : vector<128x128xf32>
    %144 = arith.mulf %143, %141 : vector<128x128xf32>
    %145 = arith.mulf %132, %102 : vector<128x128xf32>
    %146 = arith.addf %144, %145 : vector<128x128xf32>
    %c0_62 = arith.constant 0 : index
    %c0_63 = arith.constant 0 : index
    %147 = vector.load %arg10[%c0_62, %c0_63] : memref<128x128xf32, #tpu.memory_space<vmem>>, vector<128x128xf32>
    tpu.vector_store %arg10[%c0_62, %c0_63], %146 {strides = array<i32>} : memref<128x128xf32, #tpu.memory_space<vmem>>, vector<128x128xf32>,
    return
  }
}

</mosaic_0001>

<bundles_post_ra>
// kernel: tpu_custom_call.1
= control target key start
LH: loop header
LB: loop body
LE: loop exit
PB: predicated region body
PF: predicated region fallthrough
CT: control target
= control target key end

     0   :  { %15 = vsyncpa [#allocation4], 0  ;;  %s8500_s0 = inlined_call_operand.vmem [shape: bf16[128,16], index: 0, kind: input, shape index: {}]   ;;  %s8501_s1 = inlined_call_operand.vmem [shape: bf16[16,128], index: 1, kind: input, shape index: {}]   ;;  %s8502_s2 = inlined_call_operand.vmem [shape: f32[1,128], index: 2, kind: input, shape index: {}]   ;;  %s8503_s3 = inlined_call_operand.hbm [shape: bf16[128,512], index: 3, kind: input, shape index: {}]   ;;  %s8504_s4 = inlined_call_operand.hbm [shape: bf16[128,896], index: 4, kind: input, shape index: {}]   ;;  %s8505_s5 = inlined_call_operand.hbm [shape: f32[128,128], index: 5, kind: input, shape index: {}]   ;;  %s8506_s6 = inlined_call_operand.hbm [shape: bf16[128,384], index: 6, kind: input, shape index: {}]   ;;  %s8507_s7 = inlined_call_operand.vmem [shape: f32[1,256], index: 7, kind: input, shape index: {}]   ;;  %s8508_s8 = inlined_call_operand.vmem [shape: f32[1,128], index: 8, kind: input, shape index: {}]   ;;  %s8509_s9 = inlined_call_operand.vmem [shape: f32[1,128], index: 9, kind: input, shape index: {}]   ;;  %s8510_s10 = inlined_call_operand.hbm [shape: f32[128,128], index: 10, kind: output, shape index: {}]  }
   0x1   :  { %16 = vsyncpa [#allocation7], 0 }
   0x2   :  { %17 = vsyncpa [#allocation10], 0 }
   0x3   :  { %18 = vsyncpa [#allocation5], 0  ;;  %s7217_s13 = smov [#allocation6]   ;;  %s7099_s17 = scalar_lea.hbm %s8504_s4, 7168 }
   0x4   :  { %s42_s14 = sshll.u32 %s7217_s13, 4  ;;  %p7100_p0 = scmp.ne.s32.totalorder %s8504_s4, %s7099_s17  ;;  %s43_s14 = int_to_ptr.vmem [resolvable:$true] %s42_s14 }
   0x5   :  { %p7103_p1 = scmp.lt.u32.totalorder %s7099_s17, %s8504_s4 }
   0x7   :  { %p7105_p2 = pnand %p7103_p1, %p7100_p0 }
   0x9   :  { %7108 = shalt.err (!%p7105_p2)
}
   0xa   :  { %s7109_s22 = scalar_lea.vmem %s43_s14, 7168  ;;  %p7114_p4 = scmp.lt.s32.totalorder %s43_s14, %s43_s14 }
   0xb   :  { %p7110_p3 = scmp.ne.s32.totalorder %s43_s14, %s7109_s22  ;;  %p7115_p5 = scmp.lt.s32.totalorder %s7109_s22, %s7109_s22 }
   0xd   :  { %p7116_p6 = por %p7115_p5, %p7114_p4 }
   0xf   :  { %p7117_p7 = pnand %p7116_p6, %p7110_p3 }
  0x11   :  { %7120 = shalt.err (!%p7117_p7)
}
  0x12   :  { %s7218_s23 = smov 448   ;;  %s7219_s24 = smov 28  }
  0x13   :  { %48 = dma.hbm_to_vmem [thread:$0]  %s8504_s4, 7168, %s43_s14, [#allocation7], %s7218_s23, %s7218_s23, %s7219_s24  }
  0x14   :  { %s7220_s27 = smov [#allocation3]   ;;  %s7121_s11 = scalar_lea.hbm %s8503_s3, 4096 }
  0x15   :  { %s30_s28 = sshll.u32 %s7220_s27, 4  ;;  %p7122_p8 = scmp.ne.s32.totalorder %s8503_s3, %s7121_s11  ;;  %s31_s28 = int_to_ptr.vmem [resolvable:$true] %s30_s28 }
  0x16   :  { %p7125_p9 = scmp.lt.u32.totalorder %s7121_s11, %s8503_s3 }
  0x18   :  { %p7127_p10 = pnand %p7125_p9, %p7122_p8 }
  0x1a   :  { %7130 = shalt.err (!%p7127_p10)
}
  0x1b   :  { %s7131_s17 = scalar_lea.vmem %s31_s28, 4096  ;;  %p7136_p12 = scmp.lt.s32.totalorder %s31_s28, %s31_s28 }
  0x1c   :  { %p7132_p11 = scmp.ne.s32.totalorder %s31_s28, %s7131_s17  ;;  %p7137_p13 = scmp.lt.s32.totalorder %s7131_s17, %s7131_s17 }
  0x1e   :  { %p7138_p0 = por %p7137_p13, %p7136_p12 }
  0x20   :  { %p7139_p1 = pnand %p7138_p0, %p7132_p11 }
  0x22   :  { %7142 = shalt.err (!%p7139_p1)
}
  0x23   :  { %s7221_s4 = smov 256   ;;  %s7222_s14 = smov 16  }
  0x24   :  { %36 = dma.hbm_to_vmem [thread:$0]  %s8503_s3, 4096, %s31_s28, [#allocation4], %s7221_s4, %s7221_s4, %s7222_s14  }
  0x25   :  { %s7223_s20 = smov [#allocation8]   ;;  %s7143_s24 = scalar_lea.hbm %s8505_s5, 2048 }
  0x26   :  { %s54_s21 = sshll.u32 %s7223_s20, 4  ;;  %p7144_p2 = scmp.ne.s32.totalorder %s8505_s5, %s7143_s24  ;;  %s55_s21 = int_to_ptr.vmem [resolvable:$true] %s54_s21 }
  0x27   :  { %p7147_p3 = scmp.lt.u32.totalorder %s7143_s24, %s8505_s5 }
  0x29   :  { %p7149_p4 = pnand %p7147_p3, %p7144_p2 }
  0x2b   :  { %7152 = shalt.err (!%p7149_p4)
}
  0x2c   :  { %s7153_s30 = scalar_lea.vmem %s55_s21, 2048  ;;  %p7158_p6 = scmp.lt.s32.totalorder %s55_s21, %s55_s21 }
  0x2d   :  { %p7154_p5 = scmp.ne.s32.totalorder %s55_s21, %s7153_s30  ;;  %p7159_p7 = scmp.lt.s32.totalorder %s7153_s30, %s7153_s30 }
  0x2f   :  { %p7160_p8 = por %p7159_p7, %p7158_p6 }
  0x31   :  { %p7161_p9 = pnand %p7160_p8, %p7154_p5 }
  0x33   :  { %7164 = shalt.err (!%p7161_p9)
}
  0x34   :  { %s7224_s3 = smov 128   ;;  %s7225_s28 = smov 8  }
  0x35   :  { %60 = dma.hbm_to_vmem [thread:$0]  %s8505_s5, 2048, %s55_s21, [#allocation7], %s7224_s3, %s7224_s3, %s7225_s28  }
  0x36   :  { %s7226_s13 = smov [#allocation9]   ;;  %s7165_s4 = scalar_lea.hbm %s8506_s6, 3072 }
  0x37   :  { %s66_s15 = sshll.u32 %s7226_s13, 4  ;;  %p7166_p10 = scmp.ne.s32.totalorder %s8506_s6, %s7165_s4  ;;  %s67_s15 = int_to_ptr.vmem [resolvable:$true] %s66_s15 }
  0x38   :  { %p7169_p11 = scmp.lt.u32.totalorder %s7165_s4, %s8506_s6 }
  0x3a   :  { %p7171_p12 = pnand %p7169_p11, %p7166_p10 }
  0x3c   :  { %7174 = shalt.err (!%p7171_p12)
}
  0x3d   :  { %s7175_s22 = scalar_lea.vmem %s67_s15, 3072  ;;  %p7180_p0 = scmp.lt.s32.totalorder %s67_s15, %s67_s15 }
  0x3e   :  { %p7176_p13 = scmp.ne.s32.totalorder %s67_s15, %s7175_s22  ;;  %p7181_p1 = scmp.lt.s32.totalorder %s7175_s22, %s7175_s22 }
  0x40   :  { %p7182_p2 = por %p7181_p1, %p7180_p0 }
  0x42   :  { %p7183_p3 = pnand %p7182_p2, %p7176_p13 }
  0x44   :  { %7186 = shalt.err (!%p7183_p3)
}
  0x45   :  { %s7227_s5 = smov 192   ;;  %s7228_s21 = smov 12  }
  0x46   :  { %72 = dma.hbm_to_vmem [thread:$0]  %s8506_s6, 3072, %s67_s15, [#allocation10], %s7227_s5, %s7227_s5, %s7228_s21  }
  0x47   :  { %7209 = dma.done.wait [#allocation4], 4096  }
  0x48   :  { %7210 = vsyncadd [#allocation4], 4294963200 }
  0x49   :  { %7211 = dma.done.wait [#allocation7], 9216  }
  0x4a   :  { %7212 = vsyncadd [#allocation7], 4294958080 }
  0x4b   :  { %7213 = dma.done.wait [#allocation10], 3072  }
  0x4c   :  { %7214 = vsyncadd [#allocation10], 4294964224  ;;  %v6191_v0 = vld [vmem:[%s8501_s1] sm:$0xff]   ;;  %vm310_vm0 = vcmask 130048   ;;  %v6193_v2 = vld [vmem:[%s8500_s0 + $0x8] sm:$0xff]   ;;  %v8527_v26 = vmov 0  }
  0x4d   :  { %v6192_v1 = vld [vmem:[%s8500_s0] sm:$0xff]   ;;  %5855 = vmatprep.subr.bf16.mxu0 %v6191_v0  ;;  %v6194_v3 = vld [vmem:[%s8500_s0 + $0x10] sm:$0xff]   ;;  %v6195_v4 = vld [vmem:[%s8500_s0 + $0x18] sm:$0xff]   ;;  %816 = vmatprep.mubr.bf16.mxu1 %v8527_v26 }
  0x4e   :  { %5856 = vmatpush3.bf16.msra.mxu0 %v6191_v0  ;;  %5857 = vmatprep.mubr.msk.bf16.mxu0 %vm310_vm0, %v6192_v1  ;;  %v6200_v5 = vld [vmem:[#allocation6 + $0x4] ss:$28 sps:$4 sm:$0xff]   ;;  %v6196_v7 = vld [vmem:[%s8500_s0 + $0x20] sm:$0xff]   ;;  %v6206_v10 = vld [vmem:[#allocation6 + $0x74] ss:$28 sps:$4 sm:$0xff]  }
  0x4f   :  { %v6202_v6 = vld [vmem:[#allocation6] ss:$28 sps:$4 sm:$0xff]   ;;  %744 = vmatprep.subr.bf16.mxu0 %v6200_v5  ;;  %6065 = vmatprep.subr.bf16.mxu1 %v6200_v5  ;;  %v6205_v9 = vld [vmem:[#allocation6 + $0x38] ss:$28 sps:$4 sm:$0xff]   ;;  %v6208_v12 = vld [vmem:[#allocation6 + $0x70] ss:$28 sps:$4 sm:$0xff]  }
  0x50   :  { %v6203_v8 = vld [vmem:[#allocation6 + $0x3c] ss:$28 sps:$4 sm:$0xff]   ;;  %6073 = vmatpush1.bf16.msra.mxu1 %v6202_v6  ;;  %v6197_v11 = vld [vmem:[%s8500_s0 + $0x28] sm:$0xff]   ;;  %v6209_v13 = vld [vmem:[#allocation6 + $0xac] ss:$28 sps:$4 sm:$0xff]  }
  0x51   :  { %5858 = vmatmul.mubr.msk.bf16.vlgmr.msra.gmra.mrb[0].mxu0 %vm310_vm0, %v6193_v2  ;;  %6066 = vmatprep.subr.bf16.mxu1 %v6203_v8  ;;  %v6198_v14 = vld [vmem:[%s8500_s0 + $0x30] sm:$0xff]   ;;  %v6212_v16 = vld [vmem:[#allocation6 + $0xe4] ss:$28 sps:$4 sm:$0xff]   ;;  %v6215_v18 = vld [vmem:[#allocation6 + $0x11c] ss:$28 sps:$4 sm:$0xff]  }
  0x52   :  { %5861 = vmatprep.mubr.msk.bf16.mxu0 %vm310_vm0, %v6194_v3  ;;  %745 = vmatpush1.bf16.msra.mxu0 %v6202_v6  ;;  %v6211_v15 = vld [vmem:[#allocation6 + $0xa8] ss:$28 sps:$4 sm:$0xff]   ;;  %v6214_v17 = vld [vmem:[#allocation6 + $0xe0] ss:$28 sps:$4 sm:$0xff]   ;;  %v6199_v19 = vld [vmem:[%s8500_s0 + $0x38] sm:$0xff]  }
  0x53   :  { %746 = vmatprep.subr.bf16.mxu0 %v6203_v8  ;;  %v6217_v20 = vld [vmem:[#allocation6 + $0x118] ss:$28 sps:$4 sm:$0xff]   ;;  %v6220_v22 = vld [vmem:[#allocation6 + $0x150] ss:$28 sps:$4 sm:$0xff]   ;;  %v6223_v24 = vld [vmem:[#allocation6 + $0x188] ss:$28 sps:$4 sm:$0xff]  }
  0x54   :  { %6074 = vmatpush1.bf16.msra.mxu1 %v6205_v9  ;;  %v6218_v21 = vld [vmem:[#allocation6 + $0x154] ss:$28 sps:$4 sm:$0xff]   ;;  %v6221_v23 = vld [vmem:[#allocation6 + $0x18c] ss:$28 sps:$4 sm:$0xff]   ;;  %v7380_v28 = vld [vmem:[%s8502_s2] ss:$0 sm:$0xff] }
  0x55   :  { %6067 = vmatprep.subr.bf16.mxu1 %v6206_v10  ;;  %v7372_v25 = vld [vmem:[#allocation6 + $0xc] ss:$28 sps:$4 sm:$0xff]   ;;  %v6241_v27 = vld [vmem:[#allocation6 + $0x14] ss:$28 sps:$4 sm:$0xff]   ;;  %v6229_v41 = vld [vmem:[#allocation6 + $0x44] ss:$28 sps:$4 sm:$0xff]  }
  0x56   :  { %747 = vmatpush1.bf16.msra.mxu0 %v6205_v9  ;;  %v6224_v37 = vld [vmem:[#allocation6 + $0x8] ss:$28 sps:$4 sm:$0xff]   ;;  %v6227_v45 = vld [vmem:[#allocation6 + $0x40] ss:$28 sps:$4 sm:$0xff]   ;;  %v6230_v50 = vld [vmem:[#allocation6 + $0x78] ss:$28 sps:$4 sm:$0xff]  }
  0x57   :  { %748 = vmatprep.subr.bf16.mxu0 %v6206_v10  ;;  %v6232_v48 = vld [vmem:[#allocation6 + $0x7c] ss:$28 sps:$4 sm:$0xff]   ;;  %v6235_v55 = vld [vmem:[#allocation6 + $0xb4] ss:$28 sps:$4 sm:$0xff]   ;;  %v6238_v1 = vld [vmem:[#allocation6 + $0xec] ss:$28 sps:$4 sm:$0xff]  }
  0x58   :  { %6075 = vmatpush1.bf16.msra.mxu1 %v6208_v12  ;;  %v6233_v60 = vld [vmem:[#allocation6 + $0xb0] ss:$28 sps:$4 sm:$0xff]   ;;  %v6236_v5 = vld [vmem:[#allocation6 + $0xe8] ss:$28 sps:$4 sm:$0xff]  }
  0x59   :  { %5862 = vmatmul.mubr.msk.bf16.gmra.mrb[4].mxu0 %vm310_vm0, %v6195_v4  ;;  %6068 = vmatprep.subr.bf16.mxu1 %v6209_v13  ;;  %v6239_v6 = vld [vmem:[#allocation6 + $0x10] ss:$28 sps:$4 sm:$0xff]  }
  0x5a   :  { %5865 = vmatprep.mubr.msk.bf16.mxu0 %vm310_vm0, %v6196_v7  ;;  %749 = vmatpush1.bf16.msra.mxu0 %v6208_v12  ;;  %v6247_v12 = vld [vmem:[#allocation6 + $0x4c] ss:$28 sps:$4 sm:$0xff]  }
  0x5b   :  { %750 = vmatprep.subr.bf16.mxu0 %v6209_v13 }
  0x5c   :  { %6076 = vmatpush1.bf16.msra.mxu1 %v6211_v15 }
  0x5d   :  { %6069 = vmatprep.subr.bf16.mxu1 %v6212_v16 }
  0x5e   :  { %751 = vmatpush1.bf16.msra.mxu0 %v6211_v15 }
  0x5f   :  { %752 = vmatprep.subr.bf16.mxu0 %v6212_v16 }
  0x60   :  { %6077 = vmatpush1.bf16.msra.mxu1 %v6214_v17 }
  0x61   :  { %5866 = vmatmul.mubr.msk.bf16.gmra.mrb[8].mxu0 %vm310_vm0, %v6197_v11  ;;  %6070 = vmatprep.subr.bf16.mxu1 %v6215_v18  ;;  %v6244_v11 = vld [vmem:[#allocation6 + $0x124] ss:$28 sps:$4 sm:$0xff]  }
  0x62   :  { %5869 = vmatprep.mubr.msk.bf16.mxu0 %vm310_vm0, %v6198_v14  ;;  %753 = vmatpush1.bf16.msra.mxu0 %v6214_v17 }
  0x63   :  { %754 = vmatprep.subr.bf16.mxu0 %v6215_v18  ;;  %v6242_v18 = vld [vmem:[#allocation6 + $0x120] ss:$28 sps:$4 sm:$0xff]  }
  0x64   :  { %6078 = vmatpush1.bf16.msra.mxu1 %v6217_v20 }
  0x65   :  { %6071 = vmatprep.subr.bf16.mxu1 %v6218_v21 }
  0x66   :  { %755 = vmatpush1.bf16.msra.mxu0 %v6217_v20 }
  0x67   :  { %756 = vmatprep.subr.bf16.mxu0 %v6218_v21 }
  0x68   :  { %6079 = vmatpush1.bf16.msra.mxu1 %v6220_v22 }
  0x69   :  { %5870 = vmatmul.mubr.msk.bf16.gmra.mrb[12].mxu0 %vm310_vm0, %v6199_v19  ;;  %6072 = vmatprep.subr.bf16.mxu1 %v6221_v23  ;;  %v6245_v19 = vld [vmem:[#allocation6 + $0x48] ss:$28 sps:$4 sm:$0xff]  }
  0x6a   :  { %757 = vmatpush1.bf16.msra.mxu0 %v6220_v22  ;;  %776 = vmatprep.mubr.bf16.mxu0 %v8527_v26 }
  0x6b   :  { %758 = vmatprep.subr.bf16.mxu0 %v6221_v23  ;;  %v6250_v23 = vld [vmem:[#allocation6 + $0x15c] ss:$28 sps:$4 sm:$0xff]  }
  0x6c   :  { %6080 = vmatpush1.bf16.msra.mxu1 %v6223_v24 }
  0x6d   :  { %970 = vmatprep.subr.bf16.mxu1 %v6241_v27 }
  0x6e   :  { %759 = vmatpush1.bf16.msra.mxu0 %v6223_v24  ;;  %v6253_v24 = vld [vmem:[#allocation6 + $0x84] ss:$28 sps:$4 sm:$0xff]  }
  0x6f   :  { %857 = vmatprep.subr.bf16.mxu0 %v7372_v25 }
 0x124   :  { %v5859_v29 = vpop.f32.mrb[0].mxu0 }
 0x125   :  { %v369_v30 = vpop.f32.mrb[1].mxu0  ;;  %v7400_v43 = vadd.f32 %v5859_v29, %v7380_v28 }
 0x126   :  { %v7383_v31 = vadd.f32 %v7380_v28, %v369_v30  ;;  %v5860_v32 = vpop.f32.mrb[2].mxu0 }
 0x127   :  { %v372_v33 = vpop.f32.mrb[3].mxu0  ;;  %v7391_v38 = vadd.f32 %v5860_v32, %v7380_v28  ;;  %v8524_v49 = vmax.f32 %v7400_v43, 0.0  ;;  %v6248_v32 = vld [vmem:[#allocation6 + $0x158] ss:$28 sps:$4 sm:$0xff]  }
 0x128   :  { %v7386_v34 = vadd.f32 %v7380_v28, %v372_v33  ;;  %v8526_v35 = vmax.f32 %v7383_v31, 0.0  ;;  %v6251_v33 = vld [vmem:[#allocation6 + $0x80] ss:$28 sps:$4 sm:$0xff]  }
 0x129   :  { %v8523_v47 = vmax.f32 %v7391_v38, 0.0 }
 0x12a   :  { %v8525_v36 = vmax.f32 %v7386_v34, 0.0 }
 0x12b   :  { %v7410_v51 = vpack.c.bf16 %v8523_v47, %v8524_v49 }
 0x12c   :  { %v7397_v39 = vpack.c.bf16 %v8525_v36, %v8526_v35  ;;  %v5863_v40 = vpop.f32.mrb[4].mxu0 }
 0x12d   :  { %v385_v42 = vpop.f32.mrb[5].mxu0  ;;  %v7437_v7 = vadd.f32 %v5863_v40, %v7380_v28  ;;  %v6256_v40 = vld [vmem:[#allocation6 + $0x194] ss:$28 sps:$4 sm:$0xff]  }
 0x12e   :  { %777 = vmatmul.mubr.bf16.vlgmr.msra.gmra.mrb[16].mxu0 %v7397_v39  ;;  %v5864_v44 = vpop.f32.mrb[6].mxu0  ;;  %v7413_v52 = vadd.f32 %v7380_v28, %v385_v42 }
 0x12f   :  { %858 = vmatpush1.bf16.msra.mxu0 %v6224_v37  ;;  %v388_v46 = vpop.f32.mrb[7].mxu0  ;;  %786 = vmatprep.mubr.bf16.mxu0 %v8527_v26  ;;  %v7440_v8 = vadd.f32 %v5864_v44, %v7380_v28  ;;  %v8520_v21 = vmax.f32 %v7437_v7, 0.0 }
 0x130   :  { %859 = vmatprep.subr.bf16.mxu0 %v6229_v41  ;;  %v7416_v53 = vadd.f32 %v7380_v28, %v388_v46  ;;  %v8522_v61 = vmax.f32 %v7413_v52, 0.0  ;;  %v6259_v41 = vld [vmem:[#allocation6 + $0xbc] ss:$28 sps:$4 sm:$0xff]  }
 0x131   :  { %v8519_v22 = vmax.f32 %v7440_v8, 0.0  ;;  %v6257_v46 = vld [vmem:[#allocation6 + $0xb8] ss:$28 sps:$4 sm:$0xff]  }
 0x132   :  { %v8521_v62 = vmax.f32 %v7416_v53, 0.0 }
 0x133   :  { %860 = vmatpush1.bf16.msra.mxu0 %v6227_v45  ;;  %v7478_v37 = vpack.c.bf16 %v8519_v22, %v8520_v21  ;;  %v6254_v45 = vld [vmem:[#allocation6 + $0x190] ss:$28 sps:$4 sm:$0xff]  }
 0x134   :  { %v5867_v54 = vpop.f32.mrb[8].mxu0  ;;  %861 = vmatprep.subr.bf16.mxu0 %v6232_v48  ;;  %v7446_v9 = vpack.c.bf16 %v8521_v62, %v8522_v61  ;;  %v6262_v48 = vld [vmem:[#allocation6 + $0xf4] ss:$28 sps:$4 sm:$0xff]   ;;  %v189_v21 = vld [vmem:[#allocation8 + $0x8] sm:$0xff] }
 0x135   :  { %v401_v56 = vpop.f32.mrb[9].mxu0  ;;  %v7430_v2 = vadd.f32 %v5867_v54, %v7380_v28 }
 0x136   :  { %v7419_v57 = vadd.f32 %v7380_v28, %v401_v56  ;;  %v5868_v58 = vpop.f32.mrb[10].mxu0  ;;  %787 = vmatmul.mubr.bf16.gmra.mrb[20].mxu0 %v7410_v51 }
 0x137   :  { %v404_v59 = vpop.f32.mrb[11].mxu0  ;;  %862 = vmatpush1.bf16.msra.mxu0 %v6230_v50  ;;  %796 = vmatprep.mubr.bf16.mxu0 %v8527_v26  ;;  %v7433_v3 = vadd.f32 %v5868_v58, %v7380_v28  ;;  %v8516_v15 = vmax.f32 %v7430_v2, 0.0  ;;  %v6272_v50 = vld [vmem:[#allocation6 + $0x18] ss:$28 sps:$4 sm:$0xff]   ;;  %v6260_v58 = vld [vmem:[#allocation6 + $0xf0] ss:$28 sps:$4 sm:$0xff]  }
 0x138   :  { %v8518_v63 = vmax.f32 %v7419_v57, 0.0  ;;  %v7427_v0 = vadd.f32 %v7380_v28, %v404_v59  ;;  %863 = vmatprep.subr.bf16.mxu0 %v6235_v55  ;;  %v6265_v59 = vld [vmem:[#allocation6 + $0x12c] ss:$28 sps:$4 sm:$0xff]  }
 0x139   :  { %8543 = vst [vmem:[#allocation16_spill] sm:$0xff] %v7433_v3  ;;  %v8515_v16 = vmax.f32 %v7433_v3, 0.0 }
 0x13a   :  { %v8517_v4 = vmax.f32 %v7427_v0, 0.0 }
 0x13b   :  { %864 = vmatpush1.bf16.msra.mxu0 %v6233_v60  ;;  %v7466_v27 = vpack.c.bf16 %v8515_v16, %v8516_v15 }
 0x13c   :  { %v7452_v10 = vpack.c.bf16 %v8517_v4, %v8518_v63  ;;  %865 = vmatprep.subr.bf16.mxu0 %v6238_v1  ;;  %v5871_v13 = vpop.f32.mrb[12].mxu0 }
 0x13d   :  { %v417_v14 = vpop.f32.mrb[13].mxu0  ;;  %v7487_v54 = vadd.f32 %v5871_v13, %v7380_v28  ;;  %v6271_v13 = vld [vmem:[#allocation6 + $0x19c] ss:$28 sps:$4 sm:$0xff]  }
 0x13e   :  { %797 = vmatmul.mubr.bf16.gmra.mrb[24].mxu0 %v7446_v9  ;;  %817 = vmatmul.mubr.bf16.vlgmr.msra.gmra.mrb[0].mxu1 %v7452_v10  ;;  %v5872_v17 = vpop.f32.mrb[14].mxu0  ;;  %v7469_v29 = vadd.f32 %v7380_v28, %v417_v14  ;;  %v6274_v14 = vld [vmem:[#allocation6 + $0x88] ss:$28 sps:$4 sm:$0xff]  }
 0x13f   :  { %866 = vmatpush1.bf16.msra.mxu0 %v6236_v5  ;;  %971 = vmatpush1.bf16.msra.mxu1 %v6239_v6  ;;  %v420_v20 = vpop.f32.mrb[15].mxu0  ;;  %8546 = vst [vmem:[#allocation19_spill] sm:$0xff] %v7487_v54  ;;  %v7490_v55 = vadd.f32 %v5872_v17, %v7380_v28  ;;  %v8512_v60 = vmax.f32 %v7487_v54, 0.0  ;;  %v6263_v5 = vld [vmem:[#allocation6 + $0x128] ss:$28 sps:$4 sm:$0xff]   ;;  %v191_v54 = vld [vmem:[#allocation8 + $0x18] sm:$0xff] }
 0x140   :  { %867 = vmatprep.subr.bf16.mxu0 %v6244_v11  ;;  %972 = vmatprep.subr.bf16.mxu1 %v6247_v12  ;;  %8544 = vst [vmem:[#allocation17_spill] sm:$0xff] %v7469_v29  ;;  %v7472_v30 = vadd.f32 %v7380_v28, %v420_v20  ;;  %v8514_v42 = vmax.f32 %v7469_v29, 0.0  ;;  %v6273_v28 = vld [vmem:[#allocation6 + $0x50] ss:$28 sps:$4 sm:$0xff]   ;;  %v6268_v6 = vld [vmem:[#allocation6 + $0x164] ss:$28 sps:$4 sm:$0xff]  }
 0x141   :  { %806 = vmatprep.mubr.bf16.mxu0 %v8527_v26  ;;  %826 = vmatprep.mubr.bf16.mxu1 %v8527_v26  ;;  %8547 = vst [vmem:[#allocation20_spill] sm:$0xff] %v7490_v55  ;;  %v8511_v1 = vmax.f32 %v7490_v55, 0.0  ;;  %v6266_v12 = vld [vmem:[#allocation6 + $0x160] ss:$28 sps:$4 sm:$0xff]   ;;  %v6269_v17 = vld [vmem:[#allocation6 + $0x198] ss:$28 sps:$4 sm:$0xff]  }
 0x142   :  { %8545 = vst [vmem:[#allocation18_spill] sm:$0xff] %v7472_v30  ;;  %v8513_v44 = vmax.f32 %v7472_v30, 0.0  ;;  %v6277_v20 = vld [vmem:[#allocation6 + $0x130] ss:$28 sps:$4 sm:$0xff]  }
 0x143   :  { %868 = vmatpush1.bf16.msra.mxu0 %v6242_v18  ;;  %973 = vmatpush1.bf16.msra.mxu1 %v6245_v19  ;;  %v7508_v11 = vpack.c.bf16 %v8511_v1, %v8512_v60  ;;  %v6275_v18 = vld [vmem:[#allocation6 + $0xc0] ss:$28 sps:$4 sm:$0xff]   ;;  %v6276_v19 = vld [vmem:[#allocation6 + $0xf8] ss:$28 sps:$4 sm:$0xff]  }
 0x144   :  { %869 = vmatprep.subr.bf16.mxu0 %v6250_v23  ;;  %974 = vmatprep.subr.bf16.mxu1 %v6253_v24  ;;  %v7496_v56 = vpack.c.bf16 %v8513_v44, %v8514_v42  ;;  %v6278_v23 = vld [vmem:[#allocation6 + $0x168] ss:$28 sps:$4 sm:$0xff]   ;;  %v6279_v24 = vld [vmem:[#allocation6 + $0x1a0] ss:$28 sps:$4 sm:$0xff]  }
 0x146   :  { %807 = vmatmul.mubr.bf16.gmra.mrb[28].mxu0 %v7478_v37  ;;  %827 = vmatmul.mubr.bf16.gmra.mrb[4].mxu1 %v7466_v27 }
 0x147   :  { %870 = vmatpush1.bf16.msra.mxu0 %v6248_v32  ;;  %975 = vmatpush1.bf16.msra.mxu1 %v6251_v33  ;;  %v6285_v32 = vld [vmem:[#allocation3 + $0xc] ss:$16 sps:$4 sm:$0xff]  }
 0x148   :  { %871 = vmatprep.subr.bf16.mxu0 %v6256_v40  ;;  %976 = vmatprep.subr.bf16.mxu1 %v6259_v41 }
 0x149   :  { %836 = vmatprep.mubr.bf16.mxu1 %v8527_v26  ;;  %889 = vmatprep.mubr.bf16.mxu0 %v8527_v26 }
 0x14b   :  { %872 = vmatpush1.bf16.msra.mxu0 %v6254_v45  ;;  %977 = vmatpush1.bf16.msra.mxu1 %v6257_v46 }
 0x14c   :  { %978 = vmatprep.subr.bf16.mxu1 %v6262_v48  ;;  %5873 = vmatprep.subr.bf16.mxu0 %v6272_v50 }
 0x14e   :  { %837 = vmatmul.mubr.bf16.gmra.mrb[8].mxu1 %v7496_v56  ;;  %890 = vmatmul.mubr.bf16.vlgmr.msra.gmra.mrb[32].mxu0 %v7397_v39 }
 0x14f   :  { %979 = vmatpush1.bf16.msra.mxu1 %v6260_v58  ;;  %846 = vmatprep.mubr.bf16.mxu1 %v8527_v26 }
 0x150   :  { %980 = vmatprep.subr.bf16.mxu1 %v6265_v59  ;;  %899 = vmatprep.mubr.bf16.mxu0 %v8527_v26 }
 0x151   :  { %5874 = vmatpush3.bf16.msra.mxu0 %v6272_v50 }
 0x152   :  { %5875 = vmatprep.subr.bf16.mxu0 %v6273_v28 }
 0x153   :  { %981 = vmatpush1.bf16.msra.mxu1 %v6263_v5 }
 0x154   :  { %982 = vmatprep.subr.bf16.mxu1 %v6268_v6 }
 0x155   :  { %5876 = vmatpush3.bf16.msra.mxu0 %v6273_v28 }
 0x156   :  { %847 = vmatmul.mubr.bf16.gmra.mrb[12].mxu1 %v7508_v11  ;;  %900 = vmatmul.mubr.bf16.gmra.mrb[36].mxu0 %v7410_v51 }
 0x157   :  { %983 = vmatpush1.bf16.msra.mxu1 %v6266_v12  ;;  %909 = vmatprep.mubr.bf16.mxu0 %v8527_v26 }
 0x158   :  { %984 = vmatprep.subr.bf16.mxu1 %v6271_v13  ;;  %1002 = vmatprep.mubr.bf16.mxu1 %v8527_v26 }
 0x159   :  { %5877 = vmatprep.subr.bf16.mxu0 %v6274_v14 }
 0x15a   :  { %5878 = vmatpush3.bf16.msra.mxu0 %v6274_v14 }
 0x15b   :  { %985 = vmatpush1.bf16.msra.mxu1 %v6269_v17  ;;  %5879 = vmatprep.subr.bf16.mxu0 %v6275_v18 }
 0x15e   :  { %910 = vmatmul.mubr.bf16.gmra.mrb[40].mxu0 %v7446_v9  ;;  %1003 = vmatmul.mubr.bf16.vlgmr.msra.gmra.mrb[16].mxu1 %v7397_v39 }
 0x15f   :  { %919 = vmatprep.mubr.bf16.mxu0 %v8527_v26  ;;  %1012 = vmatprep.mubr.bf16.mxu1 %v8527_v26 }
 0x160   :  { %5880 = vmatpush3.bf16.msra.mxu0 %v6275_v18 }
 0x161   :  { %5881 = vmatprep.subr.bf16.mxu0 %v6276_v19 }
 0x164   :  { %5882 = vmatpush3.bf16.msra.mxu0 %v6276_v19 }
 0x165   :  { %5883 = vmatprep.subr.bf16.mxu0 %v6277_v20 }
 0x166   :  { %920 = vmatmul.mubr.bf16.gmra.mrb[44].mxu0 %v7478_v37  ;;  %1013 = vmatmul.mubr.bf16.gmra.mrb[20].mxu1 %v7410_v51 }
 0x167   :  { %929 = vmatprep.mubr.bf16.mxu0 %v8527_v26  ;;  %1022 = vmatprep.mubr.bf16.mxu1 %v8527_v26 }
 0x168   :  { %5884 = vmatpush3.bf16.msra.mxu0 %v6277_v20 }
 0x169   :  { %5885 = vmatprep.subr.bf16.mxu0 %v6278_v23 }
 0x16c   :  { %5886 = vmatpush3.bf16.msra.mxu0 %v6278_v23 }
 0x16d   :  { %5887 = vmatprep.subr.bf16.mxu0 %v6279_v24 }
 0x16e   :  { %930 = vmatmul.mubr.bf16.gmra.mrb[48].mxu0 %v7452_v10  ;;  %1023 = vmatmul.mubr.bf16.gmra.mrb[24].mxu1 %v7446_v9 }
 0x16f   :  { %939 = vmatprep.mubr.bf16.mxu0 %v8527_v26  ;;  %1032 = vmatprep.mubr.bf16.mxu1 %v8527_v26 }
 0x170   :  { %5888 = vmatpush3.bf16.msra.mxu0 %v6279_v24 }
 0x176   :  { %940 = vmatmul.mubr.bf16.gmra.mrb[52].mxu0 %v7466_v27  ;;  %1033 = vmatmul.mubr.bf16.gmra.mrb[28].mxu1 %v7478_v37 }
 0x177   :  { %949 = vmatprep.mubr.bf16.mxu0 %v8527_v26  ;;  %1042 = vmatprep.mubr.bf16.mxu1 %v8527_v26 }
 0x17e   :  { %950 = vmatmul.mubr.bf16.gmra.mrb[56].mxu0 %v7496_v56  ;;  %1043 = vmatmul.mubr.bf16.gmra.mrb[32].mxu1 %v7452_v10 }
 0x17f   :  { %959 = vmatprep.mubr.bf16.mxu0 %v8527_v26  ;;  %1052 = vmatprep.mubr.bf16.mxu1 %v8527_v26 }
 0x186   :  { %960 = vmatmul.mubr.bf16.gmra.mrb[60].mxu0 %v7508_v11  ;;  %1053 = vmatmul.mubr.bf16.gmra.mrb[36].mxu1 %v7466_v27 }
 0x187   :  { %5889 = vmatprep.mubr.bf16.mxu0 %v7397_v39  ;;  %1062 = vmatprep.mubr.bf16.mxu1 %v8527_v26  ;;  %v6282_v39 = vld [vmem:[#allocation3 + $0x4] ss:$16 sps:$4 sm:$0xff]  }
 0x18e   :  { %1063 = vmatmul.mubr.bf16.gmra.mrb[40].mxu1 %v7496_v56  ;;  %5890 = vmatmul.mubr.bf16.vlgmr.msra.gmra.mrb[64].mxu0 %v7410_v51 }
 0x18f   :  { %5893 = vmatprep.mubr.bf16.mxu0 %v7446_v9  ;;  %1072 = vmatprep.mubr.bf16.mxu1 %v8527_v26 }
 0x196   :  { %1073 = vmatmul.mubr.bf16.gmra.mrb[44].mxu1 %v7508_v11  ;;  %5894 = vmatmul.mubr.bf16.gmra.mrb[68].mxu0 %v7478_v37 }
 0x197   :  { %5897 = vmatprep.mubr.bf16.mxu0 %v7452_v10  ;;  %1565 = vmatprep.mubr.bf16.mxu1 %v6285_v32 }
 0x19e   :  { %5898 = vmatmul.mubr.bf16.gmra.mrb[72].mxu0 %v7466_v27 }
 0x19f   :  { %5901 = vmatprep.mubr.bf16.mxu0 %v7496_v56 }
 0x1a6   :  { %5902 = vmatmul.mubr.bf16.gmra.mrb[76].mxu0 %v7508_v11 }
 0x1a7   :  { %1468 = vmatprep.mubr.bf16.mxu0 %v6282_v39 }
 0x201   :  { %v778_v51 = vpop.f32.mrb[16].mxu0 }
 0x202   :  { %v780_v9 = vpop.f32.mrb[17].mxu0 }
 0x203   :  { %v782_v33 = vpop.f32.mrb[18].mxu0 }
 0x204   :  { %v1180_v40 = vpack.c.bf16 %v782_v33, %v778_v51  ;;  %v784_v41 = vpop.f32.mrb[19].mxu0 }
 0x205   :  { %v1181_v45 = vpack.c.bf16 %v784_v41, %v780_v9 }
 0x207   :  { %5391 = vmatprep.subr.bf16.mxu0 %v1181_v45 }
 0x208   :  { %5392 = vmatpush3.bf16.msra.mxu0 %v1180_v40 }
 0x209   :  { %v788_v37 = vpop.f32.mrb[20].mxu0 }
 0x20a   :  { %v790_v10 = vpop.f32.mrb[21].mxu0 }
 0x20b   :  { %v792_v46 = vpop.f32.mrb[22].mxu0 }
 0x20c   :  { %v1184_v27 = vpack.c.bf16 %v792_v46, %v788_v37  ;;  %v794_v48 = vpop.f32.mrb[23].mxu0 }
 0x20d   :  { %v1185_v50 = vpack.c.bf16 %v794_v48, %v790_v10 }
 0x20f   :  { %5393 = vmatprep.subr.bf16.mxu0 %v1185_v50 }
 0x210   :  { %5394 = vmatpush3.bf16.msra.mxu0 %v1184_v27 }
 0x211   :  { %v798_v56 = vpop.f32.mrb[24].mxu0  ;;  %v818_v58 = vpop.f32.mrb[0].mxu1 }
 0x212   :  { %v800_v59 = vpop.f32.mrb[25].mxu0  ;;  %v820_v28 = vpop.f32.mrb[1].mxu1 }
 0x213   :  { %v802_v5 = vpop.f32.mrb[26].mxu0  ;;  %v822_v6 = vpop.f32.mrb[2].mxu1 }
 0x214   :  { %v1188_v11 = vpack.c.bf16 %v802_v5, %v798_v56  ;;  %v804_v12 = vpop.f32.mrb[27].mxu0  ;;  %v1196_v13 = vpack.c.bf16 %v822_v6, %v818_v58  ;;  %v824_v14 = vpop.f32.mrb[3].mxu1 }
 0x215   :  { %v1189_v17 = vpack.c.bf16 %v804_v12, %v800_v59  ;;  %v1197_v18 = vpack.c.bf16 %v824_v14, %v820_v28 }
 0x217   :  { %5395 = vmatprep.subr.bf16.mxu0 %v1189_v17 }
 0x218   :  { %5396 = vmatpush3.bf16.msra.mxu0 %v1188_v11 }
 0x219   :  { %v808_v19 = vpop.f32.mrb[28].mxu0  ;;  %v828_v20 = vpop.f32.mrb[4].mxu1 }
 0x21a   :  { %v810_v23 = vpop.f32.mrb[29].mxu0  ;;  %v830_v24 = vpop.f32.mrb[5].mxu1 }
 0x21b   :  { %v812_v39 = vpop.f32.mrb[30].mxu0  ;;  %v832_v32 = vpop.f32.mrb[6].mxu1 }
 0x21c   :  { %v1192_v51 = vpack.c.bf16 %v812_v39, %v808_v19  ;;  %v814_v9 = vpop.f32.mrb[31].mxu0  ;;  %v1200_v33 = vpack.c.bf16 %v832_v32, %v828_v20  ;;  %v834_v40 = vpop.f32.mrb[7].mxu1 }
 0x21d   :  { %v1193_v41 = vpack.c.bf16 %v814_v9, %v810_v23  ;;  %v1201_v45 = vpack.c.bf16 %v834_v40, %v830_v24  ;;  %v6280_v9 = vld [vmem:[#allocation3] ss:$16 sps:$4 sm:$0xff]  }
 0x21f   :  { %5397 = vmatprep.subr.bf16.mxu0 %v1193_v41  ;;  %v6344_v41 = vld [vmem:[#allocation9 + $0x20] ss:$12 sps:$4 sm:$0xff]  }
 0x220   :  { %5398 = vmatpush3.bf16.msra.mxu0 %v1192_v51  ;;  %v6340_v51 = vld [vmem:[#allocation9 + $0x8] ss:$12 sps:$4 sm:$0xff]  }
 0x221   :  { %v891_v37 = vpop.f32.mrb[32].mxu0  ;;  %5399 = vmatprep.subr.bf16.mxu0 %v1197_v18  ;;  %v838_v10 = vpop.f32.mrb[8].mxu1 }
 0x222   :  { %v893_v46 = vpop.f32.mrb[33].mxu0  ;;  %v840_v27 = vpop.f32.mrb[9].mxu1 }
 0x223   :  { %v895_v48 = vpop.f32.mrb[34].mxu0  ;;  %v842_v50 = vpop.f32.mrb[10].mxu1 }
 0x224   :  { %v1182_v56 = vpack.c.bf16 %v895_v48, %v891_v37  ;;  %v897_v58 = vpop.f32.mrb[35].mxu0  ;;  %5400 = vmatpush3.bf16.msra.mxu0 %v1196_v13  ;;  %v1204_v59 = vpack.c.bf16 %v842_v50, %v838_v10  ;;  %v844_v28 = vpop.f32.mrb[11].mxu1  ;;  %v6348_v48 = vld [vmem:[#allocation9 + $0x38] ss:$12 sps:$4 sm:$0xff]   ;;  %v6288_v50 = vld [vmem:[#allocation3 + $0x20] ss:$16 sps:$4 sm:$0xff]  }
 0x225   :  { %v1183_v5 = vpack.c.bf16 %v897_v58, %v893_v46  ;;  %5401 = vmatprep.subr.bf16.mxu0 %v1201_v45  ;;  %v1205_v6 = vpack.c.bf16 %v844_v28, %v840_v27 }
 0x227   :  { %5455 = vmatprep.subr.bf16.mxu1 %v1183_v5 }
 0x228   :  { %5456 = vmatpush3.bf16.msra.mxu1 %v1182_v56  ;;  %5402 = vmatpush3.bf16.msra.mxu0 %v1200_v33  ;;  %v6286_v33 = vld [vmem:[#allocation3 + $0x24] ss:$16 sps:$4 sm:$0xff]  }
 0x229   :  { %v901_v11 = vpop.f32.mrb[36].mxu0  ;;  %v848_v12 = vpop.f32.mrb[12].mxu1  ;;  %5403 = vmatprep.subr.bf16.mxu0 %v1205_v6  ;;  %v6292_v56 = vld [vmem:[#allocation3 + $0x44] ss:$16 sps:$4 sm:$0xff]  }
 0x22a   :  { %v903_v14 = vpop.f32.mrb[37].mxu0  ;;  %v850_v17 = vpop.f32.mrb[13].mxu1 }
 0x22b   :  { %v905_v18 = vpop.f32.mrb[38].mxu0  ;;  %v852_v19 = vpop.f32.mrb[14].mxu1 }
 0x22c   :  { %v1186_v20 = vpack.c.bf16 %v905_v18, %v901_v11  ;;  %v907_v23 = vpop.f32.mrb[39].mxu0  ;;  %v1208_v24 = vpack.c.bf16 %v852_v19, %v848_v12  ;;  %v854_v39 = vpop.f32.mrb[15].mxu1  ;;  %5404 = vmatpush3.bf16.msra.mxu0 %v1204_v59  ;;  %v6294_v12 = vld [vmem:[#allocation3 + $0x40] ss:$16 sps:$4 sm:$0xff]  }
 0x22d   :  { %v1187_v13 = vpack.c.bf16 %v907_v23, %v903_v14  ;;  %v1209_v32 = vpack.c.bf16 %v854_v39, %v850_v17  ;;  %v6298_v14 = vld [vmem:[#allocation3 + $0x64] ss:$16 sps:$4 sm:$0xff]   ;;  %v6300_v39 = vld [vmem:[#allocation3 + $0x60] ss:$16 sps:$4 sm:$0xff]  }
 0x22f   :  { %5457 = vmatprep.subr.bf16.mxu1 %v1187_v13  ;;  %5405 = vmatprep.subr.bf16.mxu0 %v1209_v32  ;;  %v6304_v13 = vld [vmem:[#allocation3 + $0x84] ss:$16 sps:$4 sm:$0xff]  }
 0x230   :  { %5458 = vmatpush3.bf16.msra.mxu1 %v1186_v20  ;;  %5406 = vmatpush3.bf16.msra.mxu0 %v1208_v24 }
 0x231   :  { %v911_v40 = vpop.f32.mrb[40].mxu0  ;;  %5905 = vmatprep.subr.bf16.mxu0 %v6340_v51 }
 0x232   :  { %v913_v45 = vpop.f32.mrb[41].mxu0 }
 0x233   :  { %v915_v37 = vpop.f32.mrb[42].mxu0  ;;  %1469 = vmatmul.mubr.bf16.vlgmr.msra.gmra.mrb[80].mxu0 %v6280_v9 }
 0x234   :  { %v1190_v10 = vpack.c.bf16 %v915_v37, %v911_v40  ;;  %v917_v46 = vpop.f32.mrb[43].mxu0  ;;  %1476 = vmatprep.mubr.bf16.mxu0 %v6286_v33  ;;  %5906 = vmatpush3.bf16.msra.mxu0 %v6340_v51  ;;  %v6310_v37 = vld [vmem:[#allocation3 + $0xa4] ss:$16 sps:$4 sm:$0xff]  }
 0x235   :  { %v1191_v27 = vpack.c.bf16 %v917_v46, %v913_v45  ;;  %5907 = vmatprep.subr.bf16.mxu0 %v6344_v41  ;;  %v6306_v45 = vld [vmem:[#allocation3 + $0x80] ss:$16 sps:$4 sm:$0xff]  }
 0x237   :  { %5459 = vmatprep.subr.bf16.mxu1 %v1191_v27 }
 0x238   :  { %5460 = vmatpush3.bf16.msra.mxu1 %v1190_v10  ;;  %5908 = vmatpush3.bf16.msra.mxu0 %v6344_v41 }
 0x239   :  { %v921_v58 = vpop.f32.mrb[44].mxu0  ;;  %5909 = vmatprep.subr.bf16.mxu0 %v6348_v48 }
 0x23a   :  { %v923_v59 = vpop.f32.mrb[45].mxu0 }
 0x23b   :  { %v925_v28 = vpop.f32.mrb[46].mxu0  ;;  %1477 = vmatmul.mubr.bf16.gmra.mrb[84].mxu0 %v6288_v50 }
 0x23c   :  { %v1194_v5 = vpack.c.bf16 %v925_v28, %v921_v58  ;;  %v927_v6 = vpop.f32.mrb[47].mxu0  ;;  %1484 = vmatprep.mubr.bf16.mxu0 %v6292_v56  ;;  %5910 = vmatpush3.bf16.msra.mxu0 %v6348_v48  ;;  %v6312_v58 = vld [vmem:[#allocation3 + $0xa0] ss:$16 sps:$4 sm:$0xff]  }
 0x23d   :  { %v1195_v11 = vpack.c.bf16 %v927_v6, %v923_v59  ;;  %v6316_v59 = vld [vmem:[#allocation3 + $0xc4] ss:$16 sps:$4 sm:$0xff]  }
 0x23f   :  { %5461 = vmatprep.subr.bf16.mxu1 %v1195_v11 }
 0x240   :  { %5462 = vmatpush3.bf16.msra.mxu1 %v1194_v5 }
 0x241   :  { %v931_v17 = vpop.f32.mrb[48].mxu0 }
 0x242   :  { %v933_v18 = vpop.f32.mrb[49].mxu0 }
 0x243   :  { %v935_v19 = vpop.f32.mrb[50].mxu0  ;;  %1485 = vmatmul.mubr.bf16.gmra.mrb[88].mxu0 %v6294_v12 }
 0x244   :  { %v1198_v20 = vpack.c.bf16 %v935_v19, %v931_v17  ;;  %v937_v23 = vpop.f32.mrb[51].mxu0  ;;  %1492 = vmatprep.mubr.bf16.mxu0 %v6298_v14  ;;  %v6330_v17 = vld [vmem:[#allocation9 + $0x4] ss:$12 sps:$4 sm:$0xff]  }
 0x245   :  { %v1199_v24 = vpack.c.bf16 %v937_v23, %v933_v18  ;;  %v6283_v18 = vld [vmem:[#allocation3 + $0x8] ss:$16 sps:$4 sm:$0xff]   ;;  %v6318_v19 = vld [vmem:[#allocation3 + $0xc0] ss:$16 sps:$4 sm:$0xff]   ;;  %v6322_v23 = vld [vmem:[#allocation3 + $0xe4] ss:$16 sps:$4 sm:$0xff]  }
 0x247   :  { %5463 = vmatprep.subr.bf16.mxu1 %v1199_v24 }
 0x248   :  { %5464 = vmatpush3.bf16.msra.mxu1 %v1198_v20  ;;  %v6289_v20 = vld [vmem:[#allocation3 + $0x2c] ss:$16 sps:$4 sm:$0xff]  }
 0x249   :  { %v941_v32 = vpop.f32.mrb[52].mxu0 }
 0x24a   :  { %v943_v51 = vpop.f32.mrb[53].mxu0 }
 0x24b   :  { %v945_v9 = vpop.f32.mrb[54].mxu0  ;;  %1493 = vmatmul.mubr.bf16.gmra.mrb[92].mxu0 %v6300_v39  ;;  %v6328_v39 = vld [vmem:[#allocation9] ss:$12 sps:$4 sm:$0xff]  }
 0x24c   :  { %v1202_v33 = vpack.c.bf16 %v945_v9, %v941_v32  ;;  %v947_v40 = vpop.f32.mrb[55].mxu0  ;;  %1500 = vmatprep.mubr.bf16.mxu0 %v6304_v13  ;;  %v6333_v32 = vld [vmem:[#allocation9 + $0x1c] ss:$12 sps:$4 sm:$0xff]  }
 0x24d   :  { %v1203_v41 = vpack.c.bf16 %v947_v40, %v943_v51  ;;  %v6336_v40 = vld [vmem:[#allocation9 + $0x34] ss:$12 sps:$4 sm:$0xff]  }
 0x24f   :  { %5465 = vmatprep.subr.bf16.mxu1 %v1203_v41  ;;  %v6291_v41 = vld [vmem:[#allocation3 + $0x28] ss:$16 sps:$4 sm:$0xff]  }
 0x250   :  { %5466 = vmatpush3.bf16.msra.mxu1 %v1202_v33  ;;  %v6331_v33 = vld [vmem:[#allocation9 + $0x18] ss:$12 sps:$4 sm:$0xff]  }
 0x251   :  { %v951_v10 = vpop.f32.mrb[56].mxu0 }
 0x252   :  { %v953_v46 = vpop.f32.mrb[57].mxu0 }
 0x253   :  { %v955_v27 = vpop.f32.mrb[58].mxu0  ;;  %1501 = vmatmul.mubr.bf16.gmra.mrb[96].mxu0 %v6306_v45  ;;  %v6324_v45 = vld [vmem:[#allocation3 + $0xe0] ss:$16 sps:$4 sm:$0xff]  }
 0x254   :  { %v1206_v48 = vpack.c.bf16 %v955_v27, %v951_v10  ;;  %v957_v50 = vpop.f32.mrb[59].mxu0  ;;  %1508 = vmatprep.mubr.bf16.mxu0 %v6310_v37  ;;  %v6295_v37 = vld [vmem:[#allocation3 + $0x4c] ss:$16 sps:$4 sm:$0xff]  }
 0x255   :  { %v1207_v56 = vpack.c.bf16 %v957_v50, %v953_v46  ;;  %v6334_v46 = vld [vmem:[#allocation9 + $0x30] ss:$12 sps:$4 sm:$0xff]  }
 0x257   :  { %5467 = vmatprep.subr.bf16.mxu1 %v1207_v56 }
 0x258   :  { %5468 = vmatpush3.bf16.msra.mxu1 %v1206_v48  ;;  %v6339_v48 = vld [vmem:[#allocation9 + $0x4c] ss:$12 sps:$4 sm:$0xff]  }
 0x259   :  { %v961_v28 = vpop.f32.mrb[60].mxu0 }
 0x25a   :  { %v963_v5 = vpop.f32.mrb[61].mxu0 }
 0x25b   :  { %v965_v6 = vpop.f32.mrb[62].mxu0  ;;  %1509 = vmatmul.mubr.bf16.gmra.mrb[100].mxu0 %v6312_v58  ;;  %v6337_v58 = vld [vmem:[#allocation9 + $0x48] ss:$12 sps:$4 sm:$0xff]  }
 0x25c   :  { %v1210_v11 = vpack.c.bf16 %v965_v6, %v961_v28  ;;  %v967_v12 = vpop.f32.mrb[63].mxu0  ;;  %1516 = vmatprep.mubr.bf16.mxu0 %v6316_v59  ;;  %v6343_v59 = vld [vmem:[#allocation9 + $0x64] ss:$12 sps:$4 sm:$0xff]   ;;  %v6297_v28 = vld [vmem:[#allocation3 + $0x48] ss:$16 sps:$4 sm:$0xff]  }
 0x25d   :  { %v1211_v14 = vpack.c.bf16 %v967_v12, %v963_v5  ;;  %v6301_v5 = vld [vmem:[#allocation3 + $0x6c] ss:$16 sps:$4 sm:$0xff]  }
 0x25f   :  { %5469 = vmatprep.subr.bf16.mxu1 %v1211_v14  ;;  %v6347_v14 = vld [vmem:[#allocation9 + $0x7c] ss:$12 sps:$4 sm:$0xff]  }
 0x260   :  { %5470 = vmatpush3.bf16.msra.mxu1 %v1210_v11  ;;  %v6341_v11 = vld [vmem:[#allocation9 + $0x60] ss:$12 sps:$4 sm:$0xff]  }
 0x261   :  { %v7548_v24 = vpop.f32.mrb[64].mxu0  ;;  %1766 = vmatprep.subr.bf16.mxu1 %v6330_v17 }
 0x262   :  { %v7550_v13 = vpop.f32.mrb[65].mxu0 }
 0x263   :  { %v7552_v51 = vpop.f32.mrb[66].mxu0  ;;  %1566 = vmatmul.mubr.bf16.vlgmr.msra.gmra.mrb[48].mxu1 %v6283_v18  ;;  %1517 = vmatmul.mubr.bf16.gmra.mrb[104].mxu0 %v6318_v19  ;;  %v6345_v19 = vld [vmem:[#allocation9 + $0x78] ss:$12 sps:$4 sm:$0xff]  }
 0x264   :  { %v7554_v9 = vpop.f32.mrb[67].mxu0  ;;  %1573 = vmatprep.mubr.bf16.mxu1 %v6289_v20  ;;  %1524 = vmatprep.mubr.bf16.mxu0 %v6322_v23  ;;  %v6303_v20 = vld [vmem:[#allocation3 + $0x68] ss:$16 sps:$4 sm:$0xff]   ;;  %v6307_v23 = vld [vmem:[#allocation3 + $0x8c] ss:$16 sps:$4 sm:$0xff]  }
 0x265   :  { %1767 = vmatpush1.bf16.msra.mxu1 %v6328_v39 }
 0x266   :  { %1768 = vmatprep.subr.bf16.mxu1 %v6333_v32 }
 0x269   :  { %v7556_v10 = vpop.f32.mrb[68].mxu0  ;;  %1769 = vmatpush1.bf16.msra.mxu1 %v6331_v33 }
 0x26a   :  { %v7558_v27 = vpop.f32.mrb[69].mxu0  ;;  %1770 = vmatprep.subr.bf16.mxu1 %v6336_v40 }
 0x26b   :  { %v7560_v50 = vpop.f32.mrb[70].mxu0  ;;  %1574 = vmatmul.mubr.bf16.gmra.mrb[52].mxu1 %v6291_v41  ;;  %1525 = vmatmul.mubr.bf16.gmra.mrb[108].mxu0 %v6324_v45  ;;  %v6309_v41 = vld [vmem:[#allocation3 + $0x88] ss:$16 sps:$4 sm:$0xff]   ;;  %v6313_v45 = vld [vmem:[#allocation3 + $0xac] ss:$16 sps:$4 sm:$0xff]  }
 0x26c   :  { %v7562_v56 = vpop.f32.mrb[71].mxu0  ;;  %1581 = vmatprep.mubr.bf16.mxu1 %v6295_v37  ;;  %v6315_v37 = vld [vmem:[#allocation3 + $0xa8] ss:$16 sps:$4 sm:$0xff]  }
 0x26d   :  { %1771 = vmatpush1.bf16.msra.mxu1 %v6334_v46  ;;  %v6319_v46 = vld [vmem:[#allocation3 + $0xcc] ss:$16 sps:$4 sm:$0xff]  }
 0x26e   :  { %1772 = vmatprep.subr.bf16.mxu1 %v6339_v48  ;;  %v6349_v48 = vld [vmem:[#allocation9 + $0x90] ss:$12 sps:$4 sm:$0xff]  }
 0x271   :  { %v7564_v6 = vpop.f32.mrb[72].mxu0  ;;  %1773 = vmatpush1.bf16.msra.mxu1 %v6337_v58  ;;  %v6351_v58 = vld [vmem:[#allocation9 + $0x94] ss:$12 sps:$4 sm:$0xff]  }
 0x272   :  { %v7566_v12 = vpop.f32.mrb[73].mxu0  ;;  %1774 = vmatprep.subr.bf16.mxu1 %v6343_v59  ;;  %v6352_v59 = vld [vmem:[#allocation9 + $0x50] ss:$12 sps:$4 sm:$0xff]  }
 0x273   :  { %v7568_v17 = vpop.f32.mrb[74].mxu0  ;;  %1582 = vmatmul.mubr.bf16.gmra.mrb[56].mxu1 %v6297_v28  ;;  %5911 = vmatprep.subr.bf16.mxu0 %v6352_v59  ;;  %v6321_v28 = vld [vmem:[#allocation3 + $0xc8] ss:$16 sps:$4 sm:$0xff]  }
 0x274   :  { %v7570_v18 = vpop.f32.mrb[75].mxu0  ;;  %1589 = vmatprep.mubr.bf16.mxu1 %v6301_v5  ;;  %5912 = vmatpush3.bf16.msra.mxu0 %v6352_v59  ;;  %v6325_v5 = vld [vmem:[#allocation3 + $0xec] ss:$16 sps:$4 sm:$0xff]  }
 0x275   :  { %1775 = vmatpush1.bf16.msra.mxu1 %v6341_v11  ;;  %v6327_v11 = vld [vmem:[#allocation3 + $0xe8] ss:$16 sps:$4 sm:$0xff]  }
 0x276   :  { %1776 = vmatprep.subr.bf16.mxu1 %v6347_v14  ;;  %v6353_v14 = vld [vmem:[#allocation9 + $0x68] ss:$12 sps:$4 sm:$0xff]  }
 0x277   :  { %5913 = vmatprep.subr.bf16.mxu0 %v6353_v14 }
 0x278   :  { %5914 = vmatpush3.bf16.msra.mxu0 %v6353_v14 }
 0x279   :  { %v7572_v39 = vpop.f32.mrb[76].mxu0  ;;  %1777 = vmatpush1.bf16.msra.mxu1 %v6345_v19  ;;  %v6356_v19 = vld [vmem:[#allocation9 + $0xac] ss:$12 sps:$4 sm:$0xff]  }
 0x27a   :  { %8548 = vst [vmem:[#allocation21_spill] sm:$0xff] %v7572_v39  ;;  %v7574_v32 = vpop.f32.mrb[77].mxu0  ;;  %1778 = vmatprep.subr.bf16.mxu1 %v6351_v58 }
 0x27b   :  { %v7576_v33 = vpop.f32.mrb[78].mxu0  ;;  %1590 = vmatmul.mubr.bf16.gmra.mrb[60].mxu1 %v6303_v20  ;;  %v6357_v20 = vld [vmem:[#allocation9 + $0x80] ss:$12 sps:$4 sm:$0xff]  }
 0x27c   :  { %8549 = vst [vmem:[#allocation22_spill] sm:$0xff] %v7576_v33  ;;  %v7578_v40 = vpop.f32.mrb[79].mxu0  ;;  %1597 = vmatprep.mubr.bf16.mxu1 %v6307_v23  ;;  %v6354_v23 = vld [vmem:[#allocation9 + $0xa8] ss:$12 sps:$4 sm:$0xff]   ;;  %5915 = vmatprep.subr.bf16.mxu0 %v6357_v20 }
 0x27d   :  { %1779 = vmatpush1.bf16.msra.mxu1 %v6349_v48  ;;  %5916 = vmatpush3.bf16.msra.mxu0 %v6357_v20 }
 0x27e   :  { %1780 = vmatprep.subr.bf16.mxu1 %v6356_v19 }
 0x281   :  { %1781 = vmatpush1.bf16.msra.mxu1 %v6354_v23 }
 0x282   :  { %2520 = vmatprep.subr.bf16.mxu1 %v7372_v25 }
 0x283   :  { %1598 = vmatmul.mubr.bf16.gmra.mrb[64].mxu1 %v6309_v41  ;;  %v6358_v41 = vld [vmem:[#allocation9 + $0x98] ss:$12 sps:$4 sm:$0xff]  }
 0x284   :  { %1605 = vmatprep.mubr.bf16.mxu1 %v6313_v45  ;;  %5917 = vmatprep.subr.bf16.mxu0 %v6358_v41  ;;  %v6359_v45 = vld [vmem:[#allocation9 + $0xb0] ss:$12 sps:$4 sm:$0xff]  }
 0x285   :  { %5918 = vmatpush3.bf16.msra.mxu0 %v6358_v41 }
 0x286   :  { %5919 = vmatprep.subr.bf16.mxu0 %v6359_v45 }
 0x289   :  { %5920 = vmatpush3.bf16.msra.mxu0 %v6359_v45 }
 0x28b   :  { %1606 = vmatmul.mubr.bf16.gmra.mrb[68].mxu1 %v6315_v37  ;;  %v6840_v37 = vld [vmem:[#allocation6 + $0x4] ss:$28 sps:$4 sm:$0xff]  }
 0x28c   :  { %1613 = vmatprep.mubr.bf16.mxu1 %v6319_v46  ;;  %2407 = vmatprep.subr.bf16.mxu0 %v6840_v37 }
 0x293   :  { %1614 = vmatmul.mubr.bf16.gmra.mrb[72].mxu1 %v6321_v28 }
 0x294   :  { %1621 = vmatprep.mubr.bf16.mxu1 %v6325_v5 }
 0x29b   :  { %1622 = vmatmul.mubr.bf16.gmra.mrb[76].mxu1 %v6327_v11 }
 0x29c   :  { %1798 = vmatprep.mubr.bf16.mxu1 %v8527_v26 }
 0x306   :  { %v5407_v46 = vpop.f32.mrb[80].mxu0 }
 0x307   :  { %v5408_v48 = vpop.f32.mrb[81].mxu0 }
 0x308   :  { %v5409_v58 = vadd.f32 %v5408_v48, %v5407_v46  ;;  %v5410_v59 = vpop.f32.mrb[82].mxu0 }
 0x309   :  { %v5411_v28 = vpop.f32.mrb[83].mxu0 }
 0x30a   :  { %v5412_v5 = vadd.f32 %v5411_v28, %v5410_v59 }
 0x30e   :  { %v5413_v11 = vpop.f32.mrb[84].mxu0 }
 0x30f   :  { %v5414_v14 = vpop.f32.mrb[85].mxu0 }
 0x310   :  { %v5415_v19 = vadd.f32 %v5414_v14, %v5413_v11  ;;  %v5416_v20 = vpop.f32.mrb[86].mxu0 }
 0x311   :  { %v5417_v23 = vpop.f32.mrb[87].mxu0 }
 0x312   :  { %v5418_v1 = vadd.f32 %v5417_v23, %v5416_v20 }
 0x316   :  { %v5419_v25 = vpop.f32.mrb[88].mxu0 }
 0x317   :  { %v5420_v60 = vpop.f32.mrb[89].mxu0 }
 0x318   :  { %v7582_v41 = vadd.f32 %v5420_v60, %v5419_v25  ;;  %v5422_v44 = vpop.f32.mrb[90].mxu0 }
 0x319   :  { %v5423_v45 = vpop.f32.mrb[91].mxu0 }
 0x31a   :  { %v7584_v42 = vadd.f32 %v5423_v45, %v5422_v44 }
 0x31e   :  { %v5425_v37 = vpop.f32.mrb[92].mxu0 }
 0x31f   :  { %v5426_v16 = vpop.f32.mrb[93].mxu0 }
 0x320   :  { %v7586_v46 = vadd.f32 %v5426_v16, %v5425_v37  ;;  %v5428_v48 = vpop.f32.mrb[94].mxu0  ;;  %v188_v37 = vld [vmem:[#allocation8] sm:$0xff] }
 0x321   :  { %v5429_v59 = vpop.f32.mrb[95].mxu0  ;;  %v1471_v22 = vadd.f32 %v5409_v58, %v188_v37 }
 0x322   :  { %v7588_v28 = vadd.f32 %v5429_v59, %v5428_v48 }
 0x326   :  { %v5431_v11 = vpop.f32.mrb[96].mxu0 }
 0x327   :  { %v5432_v14 = vpop.f32.mrb[97].mxu0 }
 0x328   :  { %v7590_v15 = vadd.f32 %v5432_v14, %v5431_v11  ;;  %v5434_v20 = vpop.f32.mrb[98].mxu0 }
 0x329   :  { %v5435_v23 = vpop.f32.mrb[99].mxu0 }
 0x32a   :  { %v7592_v60 = vadd.f32 %v5435_v23, %v5434_v20 }
 0x32e   :  { %v5437_v25 = vpop.f32.mrb[100].mxu0 }
 0x32f   :  { %v5438_v4 = vpop.f32.mrb[101].mxu0 }
 0x330   :  { %v7594_v44 = vadd.f32 %v5438_v4, %v5437_v25  ;;  %v5440_v45 = vpop.f32.mrb[102].mxu0  ;;  %v1474_v4 = vadd.f32 %v5412_v5, %v189_v21  ;;  %v6841_v5 = vld [vmem:[#allocation6 + $0x8] ss:$28 sps:$4 sm:$0xff]  }
 0x331   :  { %v5441_v63 = vpop.f32.mrb[103].mxu0 }
 0x332   :  { %v7596_v16 = vadd.f32 %v5441_v63, %v5440_v45  ;;  %v190_v63 = vld [vmem:[#allocation8 + $0x10] sm:$0xff] }
 0x333   :  { %v1479_v37 = vadd.f32 %v5415_v19, %v190_v63 }
 0x336   :  { %v5471_v48 = vpop.f32.mrb[48].mxu1  ;;  %v5443_v59 = vpop.f32.mrb[104].mxu0 }
 0x337   :  { %v5472_v62 = vpop.f32.mrb[49].mxu1  ;;  %v5444_v11 = vpop.f32.mrb[105].mxu0 }
 0x338   :  { %v5473_v14 = vadd.f32 %v5472_v62, %v5471_v48  ;;  %v5474_v61 = vpop.f32.mrb[50].mxu1  ;;  %v7598_v47 = vadd.f32 %v5444_v11, %v5443_v59  ;;  %v5446_v20 = vpop.f32.mrb[106].mxu0 }
 0x339   :  { %v5475_v23 = vpop.f32.mrb[51].mxu1  ;;  %v5447_v49 = vpop.f32.mrb[107].mxu0 }
 0x33a   :  { %v1568_v25 = vadd.f32 %v5473_v14, %v1471_v22  ;;  %v5476_v36 = vadd.f32 %v5475_v23, %v5474_v61  ;;  %v7600_v35 = vadd.f32 %v5447_v49, %v5446_v20  ;;  %v8550_v61 = vmov 0   ;;  %v6842_v23 = vld [vmem:[#allocation6 + $0x44] ss:$28 sps:$4 sm:$0xff]  }
 0x33c   :  { %v1571_v45 = vadd.f32 %v5476_v36, %v1474_v4  ;;  %v1482_v36 = vadd.f32 %v5418_v1, %v191_v54  ;;  %v6843_v4 = vld [vmem:[#allocation6 + $0x40] ss:$28 sps:$4 sm:$0xff]  }
 0x33e   :  { %v1630_v58 = vpack.c.bf16 %v1571_v45, %v1568_v25  ;;  %v5477_v26 = vpop.f32.mrb[52].mxu1  ;;  %v5449_v55 = vpop.f32.mrb[108].mxu0  ;;  %v6844_v45 = vld [vmem:[#allocation6 + $0x7c] ss:$28 sps:$4 sm:$0xff]  }
 0x33f   :  { %v5478_v30 = vpop.f32.mrb[53].mxu1  ;;  %v5450_v62 = vpop.f32.mrb[109].mxu0 }
 0x340   :  { %v5479_v48 = vadd.f32 %v5478_v30, %v5477_v26  ;;  %v5480_v59 = vpop.f32.mrb[54].mxu1  ;;  %1799 = vmatmul.mubr.bf16.vlgmr.msra.gmra.mrb[16].mxu1 %v1630_v58  ;;  %5921 = vmatprep.mubr.bf16.mxu0 %v1630_v58  ;;  %v7602_v11 = vadd.f32 %v5450_v62, %v5449_v55  ;;  %v5452_v21 = vpop.f32.mrb[110].mxu0  ;;  %v192_v26 = vld [vmem:[#allocation8 + $0x20] sm:$0xff]  ;;  %v193_v58 = vld [vmem:[#allocation8 + $0x28] sm:$0xff] }
 0x341   :  { %v5481_v22 = vpop.f32.mrb[55].mxu1  ;;  %1808 = vmatprep.mubr.bf16.mxu1 %v8550_v61  ;;  %v5453_v49 = vpop.f32.mrb[111].mxu0  ;;  %2521 = vmatpush1.bf16.msra.mxu1 %v6841_v5  ;;  %v1487_v55 = vadd.f32 %v7582_v41, %v192_v26  ;;  %v6846_v41 = vld [vmem:[#allocation6 + $0xb4] ss:$28 sps:$4 sm:$0xff]  }
 0x342   :  { %v1576_v19 = vadd.f32 %v5479_v48, %v1479_v37  ;;  %v5482_v14 = vadd.f32 %v5481_v22, %v5480_v59  ;;  %v7605_v20 = vadd.f32 %v5453_v49, %v5452_v21  ;;  %2522 = vmatprep.subr.bf16.mxu1 %v6842_v23  ;;  %v6845_v37 = vld [vmem:[#allocation6 + $0x78] ss:$28 sps:$4 sm:$0xff]   ;;  %v1490_v48 = vadd.f32 %v7584_v42, %v193_v58  ;;  %v6847_v22 = vld [vmem:[#allocation6] ss:$28 sps:$4 sm:$0xff]  }
 0x343   :  { %v194_v49 = vld [vmem:[#allocation8 + $0x30] sm:$0xff]  ;;  %v195_v42 = vld [vmem:[#allocation8 + $0x38] sm:$0xff] }
 0x344   :  { %v1579_v30 = vadd.f32 %v5482_v14, %v1482_v36  ;;  %v6848_v36 = vld [vmem:[#allocation6 + $0x3c] ss:$28 sps:$4 sm:$0xff]   ;;  %v6849_v14 = vld [vmem:[#allocation6 + $0xb0] ss:$28 sps:$4 sm:$0xff]   ;;  %v1495_v23 = vadd.f32 %v7586_v46, %v194_v49  ;;  %v1498_v46 = vadd.f32 %v7588_v28, %v195_v42 }
 0x345   :  { %2523 = vmatpush1.bf16.msra.mxu1 %v6843_v4  ;;  %v6850_v4 = vld [vmem:[#allocation6 + $0x38] ss:$28 sps:$4 sm:$0xff]   ;;  %v197_v28 = vld [vmem:[#allocation8 + $0x48] sm:$0xff] }
 0x346   :  { %v5483_v25 = vpop.f32.mrb[56].mxu1  ;;  %v1631_v63 = vpack.c.bf16 %v1579_v30, %v1576_v19  ;;  %2524 = vmatprep.subr.bf16.mxu1 %v6844_v45 }
 0x347   :  { %v5484_v62 = vpop.f32.mrb[57].mxu1 }
 0x348   :  { %v5485_v5 = vadd.f32 %v5484_v62, %v5483_v25  ;;  %v5486_v54 = vpop.f32.mrb[58].mxu1  ;;  %1809 = vmatmul.mubr.bf16.gmra.mrb[20].mxu1 %v1631_v63  ;;  %5922 = vmatmul.mubr.bf16.vlgmr.msra.gmra.mrb[112].mxu0 %v1631_v63  ;;  %v6851_v25 = vld [vmem:[#allocation6 + $0xec] ss:$28 sps:$4 sm:$0xff]   ;;  %v6852_v63 = vld [vmem:[#allocation6 + $0x74] ss:$28 sps:$4 sm:$0xff]  }
 0x349   :  { %v5487_v1 = vpop.f32.mrb[59].mxu1  ;;  %1818 = vmatprep.mubr.bf16.mxu1 %v8550_v61  ;;  %2525 = vmatpush1.bf16.msra.mxu1 %v6845_v37  ;;  %v6854_v37 = vld [vmem:[#allocation6 + $0x70] ss:$28 sps:$4 sm:$0xff]  }
 0x34a   :  { %v1584_v59 = vadd.f32 %v5485_v5, %v1487_v55  ;;  %v5488_v21 = vadd.f32 %v5487_v1, %v5486_v54  ;;  %2526 = vmatprep.subr.bf16.mxu1 %v6846_v41  ;;  %2408 = vmatpush1.bf16.msra.mxu0 %v6847_v22  ;;  %v6853_v5 = vld [vmem:[#allocation6 + $0xe8] ss:$28 sps:$4 sm:$0xff]   ;;  %v6857_v22 = vld [vmem:[#allocation6 + $0x120] ss:$28 sps:$4 sm:$0xff]  }
 0x34b   :  { %2409 = vmatprep.subr.bf16.mxu0 %v6848_v36 }
 0x34c   :  { %v1587_v19 = vadd.f32 %v5488_v21, %v1490_v48  ;;  %v6855_v48 = vld [vmem:[#allocation6 + $0x124] ss:$28 sps:$4 sm:$0xff]   ;;  %v6856_v21 = vld [vmem:[#allocation6 + $0xac] ss:$28 sps:$4 sm:$0xff]  }
 0x34d   :  { %2527 = vmatpush1.bf16.msra.mxu1 %v6849_v14  ;;  %v6858_v14 = vld [vmem:[#allocation6 + $0xa8] ss:$28 sps:$4 sm:$0xff]  }
 0x34e   :  { %v5489_v26 = vpop.f32.mrb[60].mxu1  ;;  %v1632_v30 = vpack.c.bf16 %v1587_v19, %v1584_v59  ;;  %2410 = vmatpush1.bf16.msra.mxu0 %v6850_v4  ;;  %2528 = vmatprep.subr.bf16.mxu1 %v6851_v25  ;;  %v196_v59 = vld [vmem:[#allocation8 + $0x40] sm:$0xff] }
 0x34f   :  { %v5490_v55 = vpop.f32.mrb[61].mxu1  ;;  %2411 = vmatprep.subr.bf16.mxu0 %v6852_v63  ;;  %v1503_v49 = vadd.f32 %v7590_v15, %v196_v59  ;;  %v1506_v15 = vadd.f32 %v7592_v60, %v197_v28  ;;  %v199_v60 = vld [vmem:[#allocation8 + $0x58] sm:$0xff] }
 0x350   :  { %v5491_v45 = vadd.f32 %v5490_v55, %v5489_v26  ;;  %v5492_v58 = vpop.f32.mrb[62].mxu1  ;;  %1819 = vmatmul.mubr.bf16.gmra.mrb[24].mxu1 %v1632_v30  ;;  %5925 = vmatprep.mubr.bf16.mxu0 %v1632_v30  ;;  %v6859_v26 = vld [vmem:[#allocation6 + $0x15c] ss:$28 sps:$4 sm:$0xff]   ;;  %v6860_v30 = vld [vmem:[#allocation6 + $0xe4] ss:$28 sps:$4 sm:$0xff]  }
 0x351   :  { %v5493_v62 = vpop.f32.mrb[63].mxu1  ;;  %1828 = vmatprep.mubr.bf16.mxu1 %v8550_v61  ;;  %2529 = vmatpush1.bf16.msra.mxu1 %v6853_v5  ;;  %v6861_v55 = vld [vmem:[#allocation6 + $0x158] ss:$28 sps:$4 sm:$0xff]  }
 0x352   :  { %v1592_v54 = vadd.f32 %v5491_v45, %v1495_v23  ;;  %v5494_v1 = vadd.f32 %v5493_v62, %v5492_v58  ;;  %2412 = vmatpush1.bf16.msra.mxu0 %v6854_v37  ;;  %2530 = vmatprep.subr.bf16.mxu1 %v6855_v48  ;;  %v6862_v58 = vld [vmem:[#allocation6 + $0xe0] ss:$28 sps:$4 sm:$0xff]   ;;  %v6863_v62 = vld [vmem:[#allocation6 + $0x194] ss:$28 sps:$4 sm:$0xff]  }
 0x353   :  { %2413 = vmatprep.subr.bf16.mxu0 %v6856_v21  ;;  %v198_v5 = vld [vmem:[#allocation8 + $0x50] sm:$0xff] }
 0x354   :  { %v1595_v41 = vadd.f32 %v5494_v1, %v1498_v46  ;;  %v6864_v46 = vld [vmem:[#allocation6 + $0x11c] ss:$28 sps:$4 sm:$0xff]   ;;  %v6865_v1 = vld [vmem:[#allocation6 + $0x190] ss:$28 sps:$4 sm:$0xff]   ;;  %v1511_v37 = vadd.f32 %v7594_v44, %v198_v5  ;;  %v1514_v44 = vadd.f32 %v7596_v16, %v199_v60 }
 0x355   :  { %2531 = vmatpush1.bf16.msra.mxu1 %v6857_v22  ;;  %v6866_v21 = vld [vmem:[#allocation6 + $0x118] ss:$28 sps:$4 sm:$0xff]  }
 0x356   :  { %v5495_v36 = vpop.f32.mrb[64].mxu1  ;;  %v1633_v19 = vpack.c.bf16 %v1595_v41, %v1592_v54  ;;  %2414 = vmatpush1.bf16.msra.mxu0 %v6858_v14  ;;  %2532 = vmatprep.subr.bf16.mxu1 %v6859_v26  ;;  %v7617_v41 = vld [vmem:[#allocation6 + $0x18] ss:$28 sps:$4 sm:$0xff]  }
 0x357   :  { %v5496_v23 = vpop.f32.mrb[65].mxu1  ;;  %2415 = vmatprep.subr.bf16.mxu0 %v6860_v30  ;;  %v200_v30 = vld [vmem:[#allocation8 + $0x60] sm:$0xff] }
 0x358   :  { %v5497_v4 = vadd.f32 %v5496_v23, %v5495_v36  ;;  %v5498_v25 = vpop.f32.mrb[66].mxu1  ;;  %1829 = vmatmul.mubr.bf16.gmra.mrb[28].mxu1 %v1633_v19  ;;  %5926 = vmatmul.mubr.bf16.gmra.mrb[116].mxu0 %v1633_v19  ;;  %v6869_v23 = vld [vmem:[#allocation6 + $0x150] ss:$28 sps:$4 sm:$0xff]  }
 0x359   :  { %v5499_v42 = vpop.f32.mrb[67].mxu1  ;;  %1838 = vmatprep.mubr.bf16.mxu1 %v8550_v61  ;;  %2533 = vmatpush1.bf16.msra.mxu1 %v6861_v55 }
 0x35a   :  { %v1600_v63 = vadd.f32 %v5497_v4, %v1503_v49  ;;  %v5500_v45 = vadd.f32 %v5499_v42, %v5498_v25  ;;  %2416 = vmatpush1.bf16.msra.mxu0 %v6862_v58  ;;  %2534 = vmatprep.subr.bf16.mxu1 %v6863_v62  ;;  %v6868_v49 = vld [vmem:[#allocation6 + $0x154] ss:$28 sps:$4 sm:$0xff]   ;;  %v6870_v4 = vld [vmem:[#allocation6 + $0x18c] ss:$28 sps:$4 sm:$0xff]   ;;  %v1519_v42 = vadd.f32 %v7598_v47, %v200_v30 }
 0x35b   :  { %2417 = vmatprep.subr.bf16.mxu0 %v6864_v46  ;;  %v6872_v62 = vld [vmem:[#allocation6 + $0x14] ss:$28 sps:$4 sm:$0xff]  }
 0x35c   :  { %v1603_v54 = vadd.f32 %v5500_v45, %v1506_v15  ;;  %v201_v45 = vld [vmem:[#allocation8 + $0x68] sm:$0xff]  ;;  %v202_v47 = vld [vmem:[#allocation8 + $0x70] sm:$0xff] }
 0x35d   :  { %2535 = vmatpush1.bf16.msra.mxu1 %v6865_v1 }
 0x35e   :  { %v5501_v48 = vpop.f32.mrb[68].mxu1  ;;  %v1634_v59 = vpack.c.bf16 %v1603_v54, %v1600_v63  ;;  %2418 = vmatpush1.bf16.msra.mxu0 %v6866_v21  ;;  %5937 = vmatprep.subr.bf16.mxu1 %v7617_v41  ;;  %v6871_v63 = vld [vmem:[#allocation6 + $0x188] ss:$28 sps:$4 sm:$0xff]   ;;  %v1522_v54 = vadd.f32 %v7600_v35, %v201_v45 }
 0x35f   :  { %v5502_v22 = vpop.f32.mrb[69].mxu1  ;;  %2419 = vmatprep.subr.bf16.mxu0 %v6868_v49 }
 0x360   :  { %v5503_v36 = vadd.f32 %v5502_v22, %v5501_v48  ;;  %v5504_v19 = vpop.f32.mrb[70].mxu1  ;;  %1839 = vmatmul.mubr.bf16.gmra.mrb[32].mxu1 %v1634_v59  ;;  %5929 = vmatprep.mubr.bf16.mxu0 %v1634_v59  ;;  %v1527_v59 = vadd.f32 %v7602_v11, %v202_v47  ;;  %v203_v22 = vld [vmem:[#allocation8 + $0x78] sm:$0xff]  ;;  %v2009_v11 = vlaneseq }
 0x361   :  { %v5505_v14 = vpop.f32.mrb[71].mxu1  ;;  %1848 = vmatprep.mubr.bf16.mxu1 %v8550_v61 }
 0x362   :  { %v1608_v26 = vadd.f32 %v5503_v36, %v1511_v37  ;;  %v5506_v28 = vadd.f32 %v5505_v14, %v5504_v19  ;;  %2420 = vmatpush1.bf16.msra.mxu0 %v6869_v23  ;;  %v2010_v30 = vshrl.u32 %v2009_v11, 7 }
 0x363   :  { %2421 = vmatprep.subr.bf16.mxu0 %v6870_v4 }
 0x364   :  { %v1611_v25 = vadd.f32 %v5506_v28, %v1514_v44  ;;  %v1530_v44 = vadd.f32 %v7605_v20, %v203_v22  ;;  %v2011_v4 = vsub.s32 0, %v2010_v30 }
 0x366   :  { %v5507_v55 = vpop.f32.mrb[72].mxu1  ;;  %v1635_v15 = vpack.c.bf16 %v1611_v25, %v1608_v26  ;;  %2422 = vmatpush1.bf16.msra.mxu0 %v6871_v63  ;;  %v236_v25 = vld [vmem:[%s8507_s7] sm:$0x3] }
 0x367   :  { %v5508_v58 = vpop.f32.mrb[73].mxu1  ;;  %2633 = vmatprep.subr.bf16.mxu0 %v6872_v62 }
 0x368   :  { %v5509_v5 = vadd.f32 %v5508_v58, %v5507_v55  ;;  %v5510_v16 = vpop.f32.mrb[74].mxu1  ;;  %1849 = vmatmul.mubr.bf16.gmra.mrb[36].mxu1 %v1635_v15  ;;  %5930 = vmatmul.mubr.bf16.gmra.mrb[120].mxu0 %v1635_v15  ;;  %v7633_v55 = vrot.slane %v236_v25, %v2011_v4 }
 0x369   :  { %v5511_v46 = vpop.f32.mrb[75].mxu1  ;;  %1858 = vmatprep.mubr.bf16.mxu1 %v8550_v61 }
 0x36a   :  { %v1616_v1 = vadd.f32 %v5509_v5, %v1519_v42  ;;  %v5512_v37 = vadd.f32 %v5511_v46, %v5510_v16  ;;  %v2015_v42 = vsub.s32 1, %v2010_v30 }
 0x36c   :  { %v1619_v48 = vadd.f32 %v5512_v37, %v1522_v54  ;;  %v7635_v20 = vrot.slane %v236_v25, %v2015_v42 }
 0x36e   :  { %v5513_v21 = vpop.f32.mrb[76].mxu1  ;;  %v1636_v60 = vpack.c.bf16 %v1619_v48, %v1616_v1 }
 0x36f   :  { %v5514_v49 = vpop.f32.mrb[77].mxu1 }
 0x370   :  { %v5515_v36 = vadd.f32 %v5514_v49, %v5513_v21  ;;  %v5516_v19 = vpop.f32.mrb[78].mxu1  ;;  %1859 = vmatmul.mubr.bf16.gmra.mrb[40].mxu1 %v1636_v60  ;;  %5933 = vmatprep.mubr.bf16.mxu0 %v1636_v60 }
 0x371   :  { %v5517_v14 = vpop.f32.mrb[79].mxu1  ;;  %1868 = vmatprep.mubr.bf16.mxu1 %v8550_v61 }
 0x372   :  { %v1624_v35 = vadd.f32 %v5515_v36, %v1527_v59  ;;  %v5518_v26 = vadd.f32 %v5517_v14, %v5516_v19 }
 0x374   :  { %v1627_v28 = vadd.f32 %v5518_v26, %v1530_v44 }
 0x376   :  { %v1637_v23 = vpack.c.bf16 %v1627_v28, %v1624_v35 }
 0x378   :  { %1869 = vmatmul.mubr.bf16.gmra.mrb[44].mxu1 %v1637_v23  ;;  %5934 = vmatmul.mubr.bf16.gmra.mrb[124].mxu0 %v1637_v23 }
 0x379   :  { %2439 = vmatprep.mubr.bf16.mxu0 %v8550_v61  ;;  %2552 = vmatprep.mubr.bf16.mxu1 %v8550_v61 }
 0x413   :  { %v1800_v15 = vpop.f32.mrb[16].mxu1 }
 0x414   :  { %v2019_v63 = vadd.f32 %v7633_v55, %v1800_v15  ;;  %v1802_v45 = vpop.f32.mrb[17].mxu1 }
 0x415   :  { %v2020_v58 = vadd.f32 %v7635_v20, %v1802_v45  ;;  %v1804_v62 = vpop.f32.mrb[18].mxu1 }
 0x416   :  { %v5268_v5 = vmul.f32 -1.442695, %v2019_v63  ;;  %v2021_v16 = vadd.f32 %v7633_v55, %v1804_v62  ;;  %v1806_v46 = vpop.f32.mrb[19].mxu1 }
 0x417   :  { %v5269_v54 = vmul.f32 -1.442695, %v2020_v58  ;;  %v2022_v1 = vadd.f32 %v7635_v20, %v1806_v46 }
 0x418   :  { %6360 = vpow2.f32 %v5268_v5  ;;  %v5270_v37 = vmul.f32 -1.442695, %v2021_v16 }
 0x419   :  { %6362 = vpow2.f32 %v5269_v54  ;;  %v5271_v47 = vmul.f32 -1.442695, %v2022_v1 }
 0x41a   :  { %6364 = vpow2.f32 %v5270_v37 }
 0x41b   :  { %v1810_v48 = vpop.f32.mrb[20].mxu1  ;;  %v7641_v59 = vpop.f32.mrb[112].mxu0  ;;  %6366 = vpow2.f32 %v5271_v47 }
 0x41c   :  { %v2023_v21 = vadd.f32 %v7633_v55, %v1810_v48  ;;  %v1812_v60 = vpop.f32.mrb[21].mxu1  ;;  %v7644_v22 = vpop.f32.mrb[113].mxu0 }
 0x41d   :  { %v2024_v49 = vadd.f32 %v7635_v20, %v1812_v60  ;;  %v1814_v36 = vpop.f32.mrb[22].mxu1  ;;  %v7647_v19 = vpop.f32.mrb[114].mxu0 }
 0x41e   :  { %v5272_v14 = vmul.f32 -1.442695, %v2023_v21  ;;  %v2025_v44 = vadd.f32 %v7633_v55, %v1814_v36  ;;  %v1816_v35 = vpop.f32.mrb[23].mxu1  ;;  %v7650_v26 = vpop.f32.mrb[115].mxu0 }
 0x41f   :  { %v2026_v28 = vadd.f32 %v7635_v20, %v1816_v35  ;;  %v5273_v23 = vmul.f32 -1.442695, %v2024_v49 }
 0x420   :  { %6368 = vpow2.f32 %v5272_v14  ;;  %v5274_v11 = vmul.f32 -1.442695, %v2025_v44  ;;  %v7660_v14 = vld [vmem:[%s8509_s9] ss:$0 sm:$0xff] }
 0x421   :  { %v5275_v4 = vmul.f32 -1.442695, %v2026_v28 }
 0x422   :  { %v6361_v30 = vpop.eup %6360  ;;  %6370 = vpow2.f32 %v5274_v11 }
 0x423   :  { %v6363_v25 = vpop.eup %6362  ;;  %v2147_v42 = vadd.f32 1.0, %v6361_v30  ;;  %v1820_v15 = vpop.f32.mrb[24].mxu1  ;;  %6372 = vpow2.f32 %v5273_v23 }
 0x424   :  { %v6365_v63 = vpop.eup %6364  ;;  %v2027_v45 = vadd.f32 %v7633_v55, %v1820_v15  ;;  %v1822_v58 = vpop.f32.mrb[25].mxu1  ;;  %v2148_v46 = vadd.f32 1.0, %v6363_v25 }
 0x425   :  { %6374 = vrcp.f32 %v2147_v42  ;;  %v2149_v62 = vadd.f32 1.0, %v6365_v63  ;;  %v2028_v5 = vadd.f32 %v7635_v20, %v1822_v58  ;;  %v1824_v16 = vpop.f32.mrb[26].mxu1  ;;  %v6367_v60 = vpop.eup %6366  ;;  %v7670_v42 = vld [vmem:[%s8508_s8] ss:$0 sm:$0xff] }
 0x426   :  { %6376 = vpow2.f32 %v5275_v4  ;;  %v5276_v54 = vmul.f32 -1.442695, %v2027_v45  ;;  %v2029_v1 = vadd.f32 %v7633_v55, %v1824_v16  ;;  %v1826_v37 = vpop.f32.mrb[27].mxu1  ;;  %v2150_v11 = vadd.f32 1.0, %v6367_v60 }
 0x427   :  { %6378 = vrcp.f32 %v2149_v62  ;;  %v2030_v47 = vadd.f32 %v7635_v20, %v1826_v37  ;;  %v5277_v48 = vmul.f32 -1.442695, %v2028_v5  ;;  %v2271_v5 = vadd.f32 %v7660_v14, %v7550_v13 }
 0x428   :  { %v5278_v21 = vmul.f32 -1.442695, %v2029_v1  ;;  %6380 = vpow2.f32 %v5276_v54  ;;  %v2249_v60 = vadd.f32 %v7670_v42, %v7644_v22 }
 0x429   :  { %6382 = vrcp.f32 %v2148_v46  ;;  %v5279_v36 = vmul.f32 -1.442695, %v2030_v47  ;;  %v2272_v47 = vadd.f32 %v7660_v14, %v7554_v9 }
 0x42a   :  { %v6369_v49 = vpop.eup %6368  ;;  %6384 = vpow2.f32 %v5278_v21 }
 0x42b   :  { %v2151_v44 = vadd.f32 1.0, %v6369_v49  ;;  %v1830_v35 = vpop.f32.mrb[28].mxu1  ;;  %v7662_v28 = vpop.f32.mrb[116].mxu0  ;;  %6386 = vpow2.f32 %v5277_v48 }
 0x42c   :  { %v6371_v23 = vpop.eup %6370  ;;  %v2031_v30 = vadd.f32 %v7633_v55, %v1830_v35  ;;  %v1832_v4 = vpop.f32.mrb[29].mxu1  ;;  %v2250_v35 = vadd.f32 %v7670_v42, %v7650_v26 }
 0x42d   :  { %v7665_v25 = vpop.f32.mrb[117].mxu0  ;;  %6388 = vrcp.f32 %v2151_v44  ;;  %v2153_v15 = vadd.f32 1.0, %v6371_v23  ;;  %v2032_v63 = vadd.f32 %v7635_v20, %v1832_v4  ;;  %v1834_v45 = vpop.f32.mrb[30].mxu1 }
 0x42e   :  { %v7673_v58 = vpop.f32.mrb[118].mxu0  ;;  %v6373_v62 = vpop.eup %6372  ;;  %6390 = vpow2.f32 %v5279_v36  ;;  %v5280_v16 = vmul.f32 -1.442695, %v2031_v30  ;;  %v2033_v46 = vadd.f32 %v7633_v55, %v1834_v45 }
 0x42f   :  { %v1836_v54 = vpop.f32.mrb[31].mxu1  ;;  %v7678_v1 = vpop.f32.mrb[119].mxu0  ;;  %6392 = vrcp.f32 %v2153_v15  ;;  %v5281_v48 = vmul.f32 -1.442695, %v2032_v63  ;;  %v2152_v44 = vadd.f32 1.0, %v6373_v62 }
 0x430   :  { %v6375_v37 = vpop.eup %6374  ;;  %6394 = vrcp.f32 %v2150_v11  ;;  %v5282_v13 = vmul.f32 -1.442695, %v2033_v46  ;;  %v2034_v9 = vadd.f32 %v7635_v20, %v1836_v54 }
 0x431   :  { %v6377_v21 = vpop.eup %6376  ;;  %v2287_v49 = vmul.f32 %v6375_v37, %v2271_v5  ;;  %6396 = vpow2.f32 %v5280_v16  ;;  %v2273_v37 = vadd.f32 %v7548_v24, %v7660_v14  ;;  %v7698_v24 = vadd.f32 %v7556_v10, %v7660_v14 }
 0x432   :  { %v6379_v36 = vpop.eup %6378  ;;  %6398 = vpow2.f32 %v5281_v48  ;;  %v2154_v15 = vadd.f32 1.0, %v6377_v21 }
 0x433   :  { %v2303_v23 = vadd.f32 %v2287_v49, %v2249_v60  ;;  %v2288_v30 = vmul.f32 %v6379_v36, %v2272_v47  ;;  %v6381_v4 = vpop.eup %6380  ;;  %6400 = vpow2.f32 %v5282_v13  ;;  %v1840_v11 = vpop.f32.mrb[32].mxu1  ;;  %v5283_v47 = vmul.f32 -1.442695, %v2034_v9 }
 0x434   :  { %v7687_v63 = vpop.eup %6382  ;;  %v2155_v45 = vadd.f32 1.0, %v6381_v4  ;;  %v2035_v62 = vadd.f32 %v7633_v55, %v1840_v11  ;;  %v1842_v5 = vpop.f32.mrb[33].mxu1  ;;  %v2274_v13 = vadd.f32 %v7552_v51, %v7660_v14  ;;  %v2251_v36 = vadd.f32 %v7641_v59, %v7670_v42 }
 0x435   :  { %6402 = vtanh.f32 %v2303_v23  ;;  %v2304_v22 = vadd.f32 %v2288_v30, %v2250_v35  ;;  %v6385_v46 = vpop.eup %6384  ;;  %v1844_v26 = vpop.f32.mrb[34].mxu1  ;;  %v2252_v23 = vadd.f32 %v7647_v19, %v7670_v42  ;;  %v2036_v51 = vadd.f32 %v7635_v20, %v1842_v5 }
 0x436   :  { %6404 = vrcp.f32 %v2152_v44  ;;  %v6387_v16 = vpop.eup %6386  ;;  %v2157_v54 = vadd.f32 1.0, %v6385_v46  ;;  %v1846_v48 = vpop.f32.mrb[35].mxu1  ;;  %v5284_v60 = vmul.f32 -1.442695, %v2035_v62  ;;  %v2275_v59 = vadd.f32 %v7660_v14, %v7558_v27 }
 0x437   :  { %6406 = vtanh.f32 %v2304_v22  ;;  %v6389_v21 = vpop.eup %6388  ;;  %v2156_v30 = vadd.f32 1.0, %v6387_v16  ;;  %v2037_v10 = vadd.f32 %v7633_v55, %v1844_v26  ;;  %v2276_v27 = vadd.f32 %v7660_v14, %v7562_v56 }
 0x438   :  { %6408 = vrcp.f32 %v2155_v45  ;;  %v6391_v49 = vpop.eup %6390  ;;  %v2289_v44 = vmul.f32 %v6389_v21, %v2273_v37 }
 0x439   :  { %6410 = vrcp.f32 %v2154_v15  ;;  %v6393_v35 = vpop.eup %6392  ;;  %v7707_v15 = vadd.f32 %v7560_v50, %v7660_v14  ;;  %v2158_v16 = vadd.f32 1.0, %v6391_v49  ;;  %v2335_v50 = vsub.f32 1.0, %v7687_v63 }
 0x43a   :  { %6412 = vrcp.f32 %v2157_v54  ;;  %v6395_v9 = vpop.eup %6394  ;;  %v2305_v4 = vadd.f32 %v2289_v44, %v2251_v36  ;;  %v2290_v11 = vmul.f32 %v6393_v35, %v2274_v13  ;;  %v5285_v44 = vmul.f32 -1.442695, %v2036_v51 }
 0x43b   :  { %6414 = vpow2.f32 %v5283_v47  ;;  %v6397_v22 = vpop.eup %6396  ;;  %v1850_v19 = vpop.f32.mrb[36].mxu1  ;;  %v2336_v36 = vsub.f32 1.0, %v6395_v9  ;;  %v5286_v56 = vmul.f32 -1.442695, %v2037_v10 }
 0x43c   :  { %6416 = vpow2.f32 %v5284_v60  ;;  %v7710_v45 = vpop.f32.mrb[120].mxu0  ;;  %v6399_v62 = vpop.eup %6398  ;;  %v2306_v46 = vadd.f32 %v2290_v11, %v2252_v23  ;;  %v2159_v37 = vadd.f32 1.0, %v6397_v22  ;;  %v2039_v26 = vadd.f32 %v7633_v55, %v1850_v19 }
 0x43d   :  { %6418 = vtanh.f32 %v2305_v4  ;;  %v1852_v5 = vpop.f32.mrb[37].mxu1  ;;  %v7712_v54 = vpop.f32.mrb[121].mxu0  ;;  %v2038_v22 = vadd.f32 %v7635_v20, %v1846_v48  ;;  %v8551_v19 = vmax.f32 %v7383_v31, 0.0  ;;  %v2160_v33 = vadd.f32 1.0, %v6399_v62 }
 0x43e   :  { %v6401_v47 = vpop.eup %6400  ;;  %6420 = vrcp.f32 %v2156_v30  ;;  %v1854_v21 = vpop.f32.mrb[38].mxu1  ;;  %v2040_v48 = vadd.f32 %v7635_v20, %v1852_v5 }
 0x43f   :  { %v7718_v60 = vpop.f32.mrb[122].mxu0  ;;  %v6403_v13 = vpop.eup %6402  ;;  %6422 = vtanh.f32 %v2306_v46  ;;  %v2161_v49 = vadd.f32 1.0, %v6401_v47  ;;  %v2367_v29 = vmul.f32 %v7687_v63, %v8551_v19  ;;  %v2253_v46 = vadd.f32 %v7670_v42, %v7665_v25 }
 0x440   :  { %v1856_v35 = vpop.f32.mrb[39].mxu1  ;;  %v7720_v23 = vpop.f32.mrb[123].mxu0  ;;  %v2351_v11 = vmul.f32 %v6403_v13, %v2335_v50  ;;  %6424 = vrcp.f32 %v2159_v37  ;;  %v8552_v47 = vmax.f32 %v7386_v34, 0.0  ;;  %v5288_v37 = vmul.f32 -1.442695, %v2039_v26 }
 0x441   :  { %v6405_v4 = vpop.eup %6404  ;;  %6426 = vrcp.f32 %v2158_v16  ;;  %v5287_v62 = vmul.f32 -1.442695, %v2038_v22  ;;  %v2041_v16 = vadd.f32 %v7633_v55, %v1854_v21  ;;  %v2254_v26 = vadd.f32 %v7670_v42, %v7678_v1 }
 0x442   :  { %v6407_v30 = vpop.eup %6406  ;;  %v2368_v3 = vmul.f32 %v6395_v9, %v8552_v47  ;;  %6428 = vrcp.f32 %v2161_v49  ;;  %v7731_v31 = vadd.f32 %v2367_v29, %v2351_v11  ;;  %v5289_v11 = vmul.f32 -1.442695, %v2040_v48 }
 0x443   :  { %v6409_v51 = vpop.eup %6408  ;;  %v2352_v39 = vmul.f32 %v6407_v30, %v2336_v36  ;;  %6430 = vpow2.f32 %v5285_v44  ;;  %v1860_v25 = vpop.f32.mrb[40].mxu1  ;;  %v8553_v30 = vmax.f32 %v7400_v43, 0.0 }
 0x444   :  { %v6411_v10 = vpop.eup %6410  ;;  %v2291_v50 = vmul.f32 %v6409_v51, %v2275_v59  ;;  %6432 = vpow2.f32 %v5286_v56  ;;  %v7738_v36 = vpop.f32.mrb[41].mxu1  ;;  %v2043_v29 = vadd.f32 %v7633_v55, %v1860_v25  ;;  %v6873_v25 = vld [vmem:[#allocation6 + $0x10] ss:$28 sps:$4 sm:$0xff]  }
 0x445   :  { %v6413_v63 = vpop.eup %6412  ;;  %v7734_v13 = vadd.f32 %v2368_v3, %v2352_v39  ;;  %6434 = vrcp.f32 %v2160_v33  ;;  %v1864_v49 = vpop.f32.mrb[42].mxu1  ;;  %v2337_v3 = vsub.f32 1.0, %v6405_v4  ;;  %v2338_v22 = vsub.f32 1.0, %v6411_v10 }
 0x446   :  { %v6415_v34 = vpop.eup %6414  ;;  %v2307_v9 = vadd.f32 %v2291_v50, %v2253_v46  ;;  %v2292_v59 = vmul.f32 %v6413_v63, %v2276_v27  ;;  %6436 = vpow2.f32 %v5288_v37  ;;  %v7745_v56 = vpop.f32.mrb[43].mxu1  ;;  %v5290_v27 = vmul.f32 -1.442695, %v2041_v16 }
 0x447   :  { %v6417_v5 = vpop.eup %6416  ;;  %v7743_v21 = vpack.c.bf16 %v7734_v13, %v7731_v31  ;;  %v2369_v19 = vmul.f32 %v6405_v4, %v8553_v30  ;;  %v2162_v51 = vadd.f32 1.0, %v6415_v34  ;;  %v8554_v37 = vmax.f32 %v7391_v38, 0.0  ;;  %v6876_v30 = vld [vmem:[#allocation6 + $0x48] ss:$28 sps:$4 sm:$0xff]  }
 0x448   :  { %v6419_v39 = vpop.eup %6418  ;;  %6438 = vtanh.f32 %v2307_v9  ;;  %v2308_v33 = vadd.f32 %v2292_v59, %v2254_v26  ;;  %v2163_v44 = vadd.f32 1.0, %v6417_v5  ;;  %v2042_v63 = vadd.f32 %v7635_v20, %v1856_v35  ;;  %v6875_v9 = vld [vmem:[#allocation6 + $0x50] ss:$28 sps:$4 sm:$0xff]  }
 0x449   :  { %v7747_v1 = vpop.eup %6420  ;;  %6440 = vpow2.f32 %v5287_v62  ;;  %2440 = vmatmul.mubr.bf16.vlgmr.msra.gmra.mrb[128].mxu0 %v7743_v21  ;;  %2553 = vmatmul.mubr.bf16.vlgmr.msra.gmra.mrb[80].mxu1 %v7743_v21  ;;  %v2353_v47 = vmul.f32 %v6419_v39, %v2337_v3  ;;  %v2370_v50 = vmul.f32 %v6411_v10, %v8554_v37  ;;  %v5292_v62 = vmul.f32 -1.442695, %v2043_v29  ;;  %v6874_v10 = vld [vmem:[#allocation6 + $0x4c] ss:$28 sps:$4 sm:$0xff]  }
 0x44a   :  { %v6423_v46 = vpop.eup %6422  ;;  %6442 = vtanh.f32 %v2308_v33  ;;  %2449 = vmatprep.mubr.bf16.mxu0 %v8550_v61  ;;  %2562 = vmatprep.mubr.bf16.mxu1 %v8550_v61  ;;  %v2255_v4 = vadd.f32 %v7662_v28, %v7670_v42  ;;  %v2256_v28 = vadd.f32 %v7673_v58, %v7670_v42  ;;  %v6878_v37 = vld [vmem:[#allocation6 + $0x88] ss:$28 sps:$4 sm:$0xff]  }
 0x44b   :  { %v6425_v48 = vpop.eup %6424  ;;  %6444 = vrcp.f32 %v2163_v44  ;;  %v2354_v16 = vmul.f32 %v6423_v46, %v2338_v22  ;;  %2634 = vmatpush1.bf16.msra.mxu0 %v6873_v25  ;;  %5938 = vmatpush3.bf16.msra.mxu1 %v7617_v41  ;;  %v7764_v38 = vadd.f32 %v2369_v19, %v2353_v47  ;;  %v1870_v26 = vpop.f32.mrb[44].mxu1  ;;  %v5291_v44 = vmul.f32 -1.442695, %v2042_v63 }
 0x44c   :  { %v7759_v43 = vpop.eup %6426  ;;  %v2293_v34 = vmul.f32 %v6425_v48, %v7698_v24  ;;  %6446 = vpow2.f32 %v5289_v11  ;;  %2635 = vmatprep.subr.bf16.mxu0 %v6874_v10  ;;  %5939 = vmatprep.subr.bf16.mxu1 %v6875_v9  ;;  %v7766_v59 = vpop.f32.mrb[124].mxu0  ;;  %v2045_v11 = vadd.f32 %v7633_v55, %v1864_v49  ;;  %v2044_v46 = vadd.f32 %v7635_v20, %v7738_v36  ;;  %v6877_v49 = vld [vmem:[#allocation6 + $0x84] ss:$28 sps:$4 sm:$0xff]  }
 0x44d   :  { %v6429_v35 = vpop.eup %6428  ;;  %6448 = vpow2.f32 %v5290_v27  ;;  %v7768_v41 = vadd.f32 %v2370_v50, %v2354_v16  ;;  %v7773_v3 = vpop.f32.mrb[45].mxu1  ;;  %v2279_v48 = vadd.f32 %v7660_v14, %v7566_v12  ;;  %v2257_v63 = vadd.f32 %v7670_v42, %v7712_v54 }
 0x44e   :  { %v6431_v5 = vpop.eup %6430  ;;  %v2309_v29 = vadd.f32 %v2293_v34, %v2255_v4  ;;  %v2294_v24 = vmul.f32 %v6429_v35, %v7707_v15  ;;  %6450 = vrcp.f32 %v2162_v51  ;;  %v7775_v39 = vpop.f32.mrb[125].mxu0  ;;  %v2339_v4 = vsub.f32 1.0, %v7747_v1  ;;  %v6879_v35 = vld [vmem:[#allocation6 + $0x80] ss:$28 sps:$4 sm:$0xff]  }
 0x44f   :  { %v6433_v33 = vpop.eup %6432  ;;  %6452 = vpow2.f32 %v5292_v62  ;;  %v7778_v27 = vpop.f32.mrb[46].mxu1  ;;  %2636 = vmatpush1.bf16.msra.mxu0 %v6876_v30  ;;  %5940 = vmatpush3.bf16.msra.mxu1 %v6875_v9  ;;  %v2047_v62 = vadd.f32 %v7633_v55, %v1870_v26  ;;  %v2164_v36 = vadd.f32 1.0, %v6431_v5  ;;  %v5294_v10 = vmul.f32 -1.442695, %v2045_v11 }
 0x450   :  { %v7780_v22 = vpop.f32.mrb[126].mxu0  ;;  %v7782_v58 = vpop.eup %6434  ;;  %6454 = vtanh.f32 %v2309_v29  ;;  %v2310_v15 = vadd.f32 %v2294_v24, %v2256_v28  ;;  %v2165_v19 = vadd.f32 1.0, %v6433_v33  ;;  %2637 = vmatprep.subr.bf16.mxu0 %v6877_v49  ;;  %5941 = vmatprep.subr.bf16.mxu1 %v6878_v37  ;;  %v7798_v9 = vpack.c.bf16 %v7768_v41, %v7764_v38  ;;  %v6880_v24 = vld [vmem:[#allocation6 + $0xbc] ss:$28 sps:$4 sm:$0xff]  }
 0x451   :  { %v7786_v51 = vpop.f32.mrb[47].mxu1  ;;  %v7788_v47 = vpop.f32.mrb[127].mxu0  ;;  %v2340_v12 = vsub.f32 1.0, %v7759_v43  ;;  %v5293_v26 = vmul.f32 -1.442695, %v2044_v46  ;;  %v8555_v5 = vmax.f32 %v7413_v52, 0.0 }
 0x452   :  { %v6437_v50 = vpop.eup %6436  ;;  %6456 = vtanh.f32 %v2310_v15  ;;  %v6881_v33 = vld [vmem:[#allocation6 + $0xc0] ss:$28 sps:$4 sm:$0xff]   ;;  %v5296_v30 = vmul.f32 -1.442695, %v2047_v62  ;;  %2450 = vmatmul.mubr.bf16.gmra.mrb[132].mxu0 %v7798_v9  ;;  %2563 = vmatmul.mubr.bf16.gmra.mrb[84].mxu1 %v7798_v9 }
 0x453   :  { %v6439_v16 = vpop.eup %6438  ;;  %v2167_v25 = vadd.f32 1.0, %v6437_v50  ;;  %6458 = vrcp.f32 %v2165_v19  ;;  %2638 = vmatpush1.bf16.msra.mxu0 %v6879_v35  ;;  %5942 = vmatpush3.bf16.msra.mxu1 %v6878_v37  ;;  %v2371_v28 = vmul.f32 %v7747_v1, %v8555_v5  ;;  %v2046_v1 = vadd.f32 %v7635_v20, %v7745_v56 }
 0x454   :  { %v6441_v34 = vpop.eup %6440  ;;  %6460 = vpow2.f32 %v5291_v44  ;;  %v2355_v29 = vmul.f32 %v6439_v16, %v2339_v4  ;;  %2639 = vmatprep.subr.bf16.mxu0 %v6880_v24  ;;  %5943 = vmatprep.subr.bf16.mxu1 %v6881_v33  ;;  %v8556_v44 = vmax.f32 %v7416_v53, 0.0  ;;  %v2048_v53 = vadd.f32 %v7635_v20, %v7773_v3  ;;  %v6884_v4 = vld [vmem:[#allocation6 + $0xf8] ss:$28 sps:$4 sm:$0xff]  }
 0x455   :  { %v6443_v54 = vpop.eup %6442  ;;  %6462 = vrcp.f32 %v2167_v25  ;;  %2459 = vmatprep.mubr.bf16.mxu0 %v8550_v61  ;;  %2572 = vmatprep.mubr.bf16.mxu1 %v8550_v61  ;;  %v2166_v50 = vadd.f32 1.0, %v6441_v34  ;;  %v6883_v25 = vld [vmem:[#allocation6 + $0xf4] ss:$28 sps:$4 sm:$0xff]  }
 0x456   :  { %v6445_v11 = vpop.eup %6444  ;;  %v2356_v15 = vmul.f32 %v6443_v54, %v2340_v12  ;;  %v2372_v19 = vmul.f32 %v7759_v43, %v8556_v44  ;;  %6464 = vrcp.f32 %v2164_v36  ;;  %v7813_v49 = vadd.f32 %v2371_v28, %v2355_v29  ;;  %v6882_v43 = vld [vmem:[#allocation6 + $0xb8] ss:$28 sps:$4 sm:$0xff]   ;;  %v6885_v28 = vld [vmem:[#allocation6 + $0xf0] ss:$28 sps:$4 sm:$0xff]  }
 0x457   :  { %v6447_v46 = vpop.eup %6446  ;;  %v2295_v52 = vmul.f32 %v6445_v11, %v2279_v48  ;;  %6466 = vpow2.f32 %v5294_v10  ;;  %2640 = vmatpush1.bf16.msra.mxu0 %v6882_v43  ;;  %5944 = vmatpush3.bf16.msra.mxu1 %v6881_v33  ;;  %v2049_v36 = vadd.f32 %v7633_v55, %v7778_v27  ;;  %v2341_v10 = vsub.f32 1.0, %v7782_v58  ;;  %v6887_v44 = vld [vmem:[#allocation6 + $0x130] ss:$28 sps:$4 sm:$0xff]  }
 0x458   :  { %v6449_v37 = vpop.eup %6448  ;;  %v7817_v62 = vadd.f32 %v2372_v19, %v2356_v15  ;;  %6468 = vpow2.f32 %v5293_v26  ;;  %2641 = vmatprep.subr.bf16.mxu0 %v6883_v25  ;;  %5945 = vmatprep.subr.bf16.mxu1 %v6884_v4  ;;  %v2168_v35 = vadd.f32 1.0, %v6447_v46  ;;  %v5295_v54 = vmul.f32 -1.442695, %v2046_v1  ;;  %v6886_v15 = vld [vmem:[#allocation6 + $0x12c] ss:$28 sps:$4 sm:$0xff]  }
 0x459   :  { %v6451_v48 = vpop.eup %6450  ;;  %v2311_v16 = vadd.f32 %v2295_v52, %v2257_v63  ;;  %v2169_v56 = vadd.f32 1.0, %v6449_v37  ;;  %6470 = vpow2.f32 %v5296_v30  ;;  %v8557_v29 = vmax.f32 %v7437_v7, 0.0  ;;  %v6890_v25 = vld [vmem:[#allocation6 + $0x168] ss:$28 sps:$4 sm:$0xff]  }
 0x45a   :  { %v6453_v34 = vpop.eup %6452  ;;  %v7823_v3 = vpack.c.bf16 %v7817_v62, %v7813_v49  ;;  %v2342_v26 = vsub.f32 1.0, %v6451_v48  ;;  %v2280_v33 = vadd.f32 %v7660_v14, %v7570_v18  ;;  %v5297_v11 = vmul.f32 -1.442695, %v2048_v53 }
 0x45b   :  { %v6455_v12 = vpop.eup %6454  ;;  %6472 = vtanh.f32 %v2311_v16  ;;  %v2171_v63 = vadd.f32 1.0, %v6453_v34  ;;  %v2373_v5 = vmul.f32 %v7782_v58, %v8557_v29  ;;  %2642 = vmatpush1.bf16.msra.mxu0 %v6885_v28  ;;  %5946 = vmatpush3.bf16.msra.mxu1 %v6884_v4  ;;  %v5298_v30 = vmul.f32 -1.442695, %v2049_v36  ;;  %v6889_v36 = vld [vmem:[#allocation6 + $0x164] ss:$28 sps:$4 sm:$0xff]  }
 0x45c   :  { %6474 = vrcp.f32 %v2169_v56  ;;  %v2357_v27 = vmul.f32 %v6455_v12, %v2341_v10  ;;  %v6457_v24 = vpop.eup %6456  ;;  %2643 = vmatprep.subr.bf16.mxu0 %v6886_v15  ;;  %5947 = vmatprep.subr.bf16.mxu1 %v6887_v44  ;;  %v8558_v58 = vmax.f32 %v7440_v8, 0.0  ;;  %v2281_v1 = vadd.f32 %v7564_v6, %v7660_v14  ;;  %v6892_v28 = vld [vmem:[#allocation6 + $0x19c] ss:$28 sps:$4 sm:$0xff]  }
 0x45d   :  { %6476 = vrcp.f32 %v2166_v50  ;;  %v6459_v19 = vpop.eup %6458  ;;  %2460 = vmatmul.mubr.bf16.gmra.mrb[136].mxu0 %v7823_v3  ;;  %2573 = vmatmul.mubr.bf16.gmra.mrb[88].mxu1 %v7823_v3  ;;  %v2358_v7 = vmul.f32 %v6457_v24, %v2342_v26  ;;  %v2258_v37 = vadd.f32 %v7670_v42, %v7720_v23  ;;  %v2259_v8 = vadd.f32 %v7710_v45, %v7670_v42  ;;  %v6891_v26 = vld [vmem:[#allocation6 + $0x160] ss:$28 sps:$4 sm:$0xff]  }
 0x45e   :  { %6478 = vrcp.f32 %v2171_v63  ;;  %v2374_v46 = vmul.f32 %v6451_v48, %v8558_v58  ;;  %v7835_v52 = vadd.f32 %v2373_v5, %v2357_v27  ;;  %v6461_v18 = vpop.eup %6460  ;;  %v2296_v50 = vmul.f32 %v6459_v19, %v2280_v33  ;;  %2469 = vmatprep.mubr.bf16.mxu0 %v8550_v61  ;;  %2582 = vmatprep.mubr.bf16.mxu1 %v8550_v61  ;;  %v6888_v48 = vld [vmem:[#allocation6 + $0x128] ss:$28 sps:$4 sm:$0xff]   ;;  %v6893_v24 = vld [vmem:[#allocation6 + $0x1a0] ss:$28 sps:$4 sm:$0xff]  }
 0x45f   :  { %6480 = vrcp.f32 %v2168_v35  ;;  %v6463_v53 = vpop.eup %6462  ;;  %2644 = vmatpush1.bf16.msra.mxu0 %v6888_v48  ;;  %5948 = vmatpush3.bf16.msra.mxu1 %v6887_v44  ;;  %v2050_v23 = vadd.f32 %v7635_v20, %v7786_v51  ;;  %v2170_v12 = vadd.f32 1.0, %v6461_v18  ;;  %v2282_v27 = vadd.f32 %v7568_v17, %v7660_v14 }
 0x460   :  { %6482 = vpow2.f32 %v5295_v54  ;;  %v7845_v43 = vadd.f32 %v2374_v46, %v2358_v7  ;;  %v6465_v6 = vpop.eup %6464  ;;  %v2297_v16 = vmul.f32 %v6463_v53, %v2281_v1  ;;  %v2312_v56 = vadd.f32 %v2296_v50, %v2258_v37  ;;  %2645 = vmatprep.subr.bf16.mxu0 %v6889_v36  ;;  %5949 = vmatprep.subr.bf16.mxu1 %v6890_v25  ;;  %v6894_v1 = vld [vmem:[#allocation6 + $0x198] ss:$28 sps:$4 sm:$0xff]  }
 0x461   :  { %6484 = vpow2.f32 %v5298_v30  ;;  %v6467_v4 = vpop.eup %6466  ;;  %v2343_v54 = vsub.f32 1.0, %v6465_v6  ;;  %v5299_v5 = vmul.f32 -1.442695, %v2050_v23  ;;  %v8559_v15 = vmax.f32 %v7419_v57, 0.0 }
 0x462   :  { %6486 = vpow2.f32 %v5297_v11  ;;  %v7851_v45 = vpack.c.bf16 %v7845_v43, %v7835_v52  ;;  %v6469_v34 = vpop.eup %6468  ;;  %v2313_v10 = vadd.f32 %v2297_v16, %v2259_v8  ;;  %v2173_v35 = vadd.f32 1.0, %v6467_v4 }
 0x463   :  { %6488 = vtanh.f32 %v2312_v56  ;;  %v6471_v63 = vpop.eup %6470  ;;  %2646 = vmatpush1.bf16.msra.mxu0 %v6891_v26  ;;  %5950 = vmatpush3.bf16.msra.mxu1 %v6890_v25  ;;  %v2172_v11 = vadd.f32 1.0, %v6469_v34  ;;  %v2375_v44 = vmul.f32 %v6465_v6, %v8559_v15  ;;  %v2283_v17 = vadd.f32 %v7660_v14, %v7574_v32 }
 0x464   :  { %6490 = vtanh.f32 %v2313_v10  ;;  %v2175_v29 = vadd.f32 1.0, %v6471_v63  ;;  %2647 = vmatprep.subr.bf16.mxu0 %v6892_v28  ;;  %5951 = vmatprep.subr.bf16.mxu1 %v6893_v24  ;;  %v2260_v7 = vadd.f32 %v7718_v60, %v7670_v42  ;;  %v2261_v32 = vadd.f32 %v7670_v42, %v7775_v39 }
 0x465   :  { %v6473_v51 = vpop.eup %6472  ;;  %6492 = vrcp.f32 %v2173_v35  ;;  %2470 = vmatmul.mubr.bf16.gmra.mrb[140].mxu0 %v7851_v45  ;;  %2583 = vmatmul.mubr.bf16.gmra.mrb[92].mxu1 %v7851_v45  ;;  %v8560_v25 = vmax.f32 %v7427_v0, 0.0  ;;  %v2284_v39 = vadd.f32 %v7660_v14, %v7578_v40  ;;  %v8561_v26 = vmax.f32 %v7430_v2, 0.0 }
 0x466   :  { %v6475_v33 = vpop.eup %6474  ;;  %v2359_v30 = vmul.f32 %v6473_v51, %v2343_v54  ;;  %6494 = vrcp.f32 %v2170_v12  ;;  %2479 = vmatprep.mubr.bf16.mxu0 %v8550_v61  ;;  %2592 = vmatprep.mubr.bf16.mxu1 %v8550_v61  ;;  %v2262_v0 = vadd.f32 %v7670_v42, %v7788_v47  ;;  %v2263_v2 = vadd.f32 %v7766_v59, %v7670_v42 }
 0x467   :  { %v6477_v19 = vpop.eup %6476  ;;  %v2298_v58 = vmul.f32 %v6475_v33, %v2282_v27  ;;  %6496 = vrcp.f32 %v2175_v29  ;;  %2648 = vmatpush1.bf16.msra.mxu0 %v6894_v1  ;;  %5952 = vmatpush3.bf16.msra.mxu1 %v6893_v24  ;;  %v8562_v29 = vld [vmem:[#allocation21_spill] sm:$0xff] }
 0x468   :  { %v6479_v46 = vpop.eup %6478  ;;  %v7865_v18 = vadd.f32 %v2375_v44, %v2359_v30  ;;  %6498 = vpow2.f32 %v5299_v5  ;;  %v2344_v16 = vsub.f32 1.0, %v6477_v19  ;;  %v2376_v4 = vmul.f32 %v6477_v19, %v8560_v25 }
 0x469   :  { %v6481_v57 = vpop.eup %6480  ;;  %v2314_v37 = vadd.f32 %v2298_v58, %v2260_v7  ;;  %v2299_v50 = vmul.f32 %v6479_v46, %v2283_v17  ;;  %6500 = vrcp.f32 %v2172_v11  ;;  %v2285_v5 = vadd.f32 %v8562_v29, %v7660_v14  ;;  %v8563_v46 = vld [vmem:[#allocation16_spill] sm:$0xff]  ;;  %v8573_v29 = vld [vmem:[#allocation19_spill] sm:$0xff] }
 0x46a   :  { %v6483_v60 = vpop.eup %6482  ;;  %v2345_v34 = vsub.f32 1.0, %v6481_v57  ;;  %v2377_v51 = vmul.f32 %v6481_v57, %v8561_v26  ;;  %v8564_v59 = vmax.f32 %v8563_v46, 0.0 }
 0x46b   :  { %v6485_v53 = vpop.eup %6484  ;;  %6502 = vtanh.f32 %v2314_v37  ;;  %v2315_v8 = vadd.f32 %v2299_v50, %v2261_v32  ;;  %v2174_v23 = vadd.f32 1.0, %v6483_v60  ;;  %v8565_v32 = vld [vmem:[#allocation22_spill] sm:$0xff] }
 0x46c   :  { %v6487_v48 = vpop.eup %6486  ;;  %v2177_v6 = vadd.f32 1.0, %v6485_v53  ;;  %v2286_v50 = vadd.f32 %v8565_v32, %v7660_v14 }
 0x46d   :  { %v6489_v56 = vpop.eup %6488  ;;  %6504 = vtanh.f32 %v2315_v8  ;;  %v2176_v12 = vadd.f32 1.0, %v6487_v48  ;;  %v8567_v48 = vld [vmem:[#allocation17_spill] sm:$0xff] }
 0x46e   :  { %v2360_v36 = vmul.f32 %v6489_v56, %v2344_v16  ;;  %v6491_v10 = vpop.eup %6490  ;;  %6506 = vrcp.f32 %v2177_v6  ;;  %v8568_v6 = vmax.f32 %v8567_v48, 0.0  ;;  %v2264_v56 = vadd.f32 %v7780_v22, %v7670_v42  ;;  %v8570_v22 = vld [vmem:[#allocation18_spill] sm:$0xff] }
 0x46f   :  { %v6493_v35 = vpop.eup %6492  ;;  %v2361_v54 = vmul.f32 %v6491_v10, %v2345_v34  ;;  %6508 = vrcp.f32 %v2174_v23 }
 0x470   :  { %v7873_v63 = vadd.f32 %v2376_v4, %v2360_v36  ;;  %v6495_v27 = vpop.eup %6494  ;;  %v2300_v28 = vmul.f32 %v6493_v35, %v2284_v39  ;;  %6510 = vrcp.f32 %v2176_v12  ;;  %v8571_v12 = vmax.f32 %v8570_v22, 0.0 }
 0x471   :  { %v6497_v24 = vpop.eup %6496  ;;  %v7885_v33 = vadd.f32 %v2377_v51, %v2361_v54  ;;  %v2346_v47 = vsub.f32 1.0, %v6495_v27  ;;  %v2378_v1 = vmul.f32 %v6495_v27, %v8564_v59 }
 0x472   :  { %v7883_v40 = vpack.c.bf16 %v7873_v63, %v7865_v18  ;;  %v6499_v11 = vpop.eup %6498  ;;  %v2301_v30 = vmul.f32 %v6497_v24, %v2285_v5  ;;  %v2316_v15 = vadd.f32 %v2300_v28, %v2262_v0  ;;  %v8574_v5 = vmax.f32 %v8573_v29, 0.0 }
 0x473   :  { %v6501_v44 = vpop.eup %6500  ;;  %v2178_v7 = vadd.f32 1.0, %v6499_v11 }
 0x474   :  { %2480 = vmatmul.mubr.bf16.gmra.mrb[144].mxu0 %v7883_v40  ;;  %2593 = vmatmul.mubr.bf16.gmra.mrb[96].mxu1 %v7883_v40  ;;  %v2317_v17 = vadd.f32 %v2301_v30, %v2263_v2  ;;  %6512 = vtanh.f32 %v2316_v15  ;;  %v2347_v57 = vsub.f32 1.0, %v6501_v44  ;;  %v2379_v16 = vmul.f32 %v6501_v44, %v8568_v6  ;;  %v8576_v44 = vld [vmem:[#allocation20_spill] sm:$0xff] }
 0x475   :  { %v6503_v19 = vpop.eup %6502  ;;  %2489 = vmatprep.mubr.bf16.mxu0 %v8550_v61  ;;  %2602 = vmatprep.mubr.bf16.mxu1 %v8550_v61 }
 0x476   :  { %v2362_v58 = vmul.f32 %v6503_v19, %v2346_v47  ;;  %6514 = vtanh.f32 %v2317_v17  ;;  %v8577_v47 = vmax.f32 %v8576_v44, 0.0 }
 0x477   :  { %v6505_v37 = vpop.eup %6504  ;;  %6516 = vrcp.f32 %v2178_v7 }
 0x478   :  { %v7897_v60 = vadd.f32 %v2378_v1, %v2362_v58  ;;  %v6507_v53 = vpop.eup %6506  ;;  %v2363_v8 = vmul.f32 %v6505_v37, %v2347_v57 }
 0x479   :  { %v2302_v23 = vmul.f32 %v6507_v53, %v2286_v50  ;;  %v6509_v25 = vpop.eup %6508 }
 0x47a   :  { %8566 = vst [vmem:[#allocation21_spill] sm:$0xff] %v7897_v60  ;;  %v2404_v36 = vpack.c.bf16 %v7897_v60, %v7885_v33  ;;  %v7905_v4 = vadd.f32 %v2379_v16, %v2363_v8  ;;  %v6511_v14 = vpop.eup %6510  ;;  %v2348_v10 = vsub.f32 1.0, %v6509_v25  ;;  %v2380_v35 = vmul.f32 %v6509_v25, %v8571_v12 }
 0x47b   :  { %v2318_v34 = vadd.f32 %v2302_v23, %v2264_v56  ;;  %v2349_v54 = vsub.f32 1.0, %v6511_v14  ;;  %v2381_v0 = vmul.f32 %v6511_v14, %v8574_v5 }
 0x47c   :  { %8569 = vst [vmem:[#allocation16_spill] sm:$0xff] %v7905_v4  ;;  %2490 = vmatmul.mubr.bf16.gmra.mrb[148].mxu0 %v2404_v36  ;;  %2603 = vmatmul.mubr.bf16.gmra.mrb[100].mxu1 %v2404_v36 }
 0x47d   :  { %2499 = vmatprep.mubr.bf16.mxu0 %v8550_v61  ;;  %2612 = vmatprep.mubr.bf16.mxu1 %v8550_v61  ;;  %6518 = vtanh.f32 %v2318_v34 }
 0x47e   :  { %v6513_v39 = vpop.eup %6512 }
 0x47f   :  { %v2364_v42 = vmul.f32 %v6513_v39, %v2348_v10 }
 0x480   :  { %v6515_v26 = vpop.eup %6514 }
 0x481   :  { %v7911_v51 = vadd.f32 %v2380_v35, %v2364_v42  ;;  %v2365_v27 = vmul.f32 %v6515_v26, %v2349_v54  ;;  %v6517_v28 = vpop.eup %6516 }
 0x482   :  { %v2350_v2 = vsub.f32 1.0, %v6517_v28  ;;  %v2382_v19 = vmul.f32 %v6517_v28, %v8577_v47 }
 0x483   :  { %8572 = vst [vmem:[#allocation22_spill] sm:$0xff] %v7911_v51  ;;  %v2405_v24 = vpack.c.bf16 %v7911_v51, %v7905_v4  ;;  %v7917_v11 = vadd.f32 %v2381_v0, %v2365_v27 }
 0x485   :  { %8575 = vst [vmem:[#allocation17_spill] sm:$0xff] %v7917_v11  ;;  %2500 = vmatmul.mubr.bf16.gmra.mrb[152].mxu0 %v2405_v24  ;;  %2613 = vmatmul.mubr.bf16.gmra.mrb[104].mxu1 %v2405_v24 }
 0x486   :  { %2509 = vmatprep.mubr.bf16.mxu0 %v8550_v61  ;;  %2622 = vmatprep.mubr.bf16.mxu1 %v8550_v61 }
 0x487   :  { %v6519_v30 = vpop.eup %6518 }
 0x488   :  { %v2366_v15 = vmul.f32 %v6519_v30, %v2350_v2 }
 0x48a   :  { %v7923_v17 = vadd.f32 %v2382_v19, %v2366_v15 }
 0x48c   :  { %8578 = vst [vmem:[#allocation18_spill] sm:$0xff] %v7923_v17  ;;  %v2406_v7 = vpack.c.bf16 %v7923_v17, %v7917_v11 }
 0x48e   :  { %2510 = vmatmul.mubr.bf16.gmra.mrb[156].mxu0 %v2406_v7  ;;  %2623 = vmatmul.mubr.bf16.gmra.mrb[108].mxu1 %v2406_v7 }
 0x48f   :  { %5953 = vmatprep.mubr.bf16.mxu1 %v7743_v21  ;;  %2665 = vmatprep.mubr.bf16.mxu0 %v8550_v61 }
 0x496   :  { %2666 = vmatmul.mubr.bf16.vlgmr.msra.gmra.mrb[160].mxu0 %v7743_v21  ;;  %5954 = vmatmul.mubr.bf16.vlgmr.msra.gmra.mrb[112].mxu1 %v7798_v9  ;;  %v6895_v21 = vld [vmem:[#allocation3 + $0xc] ss:$16 sps:$4 sm:$0xff]  }
 0x497   :  { %5957 = vmatprep.mubr.bf16.mxu1 %v7823_v3  ;;  %2675 = vmatprep.mubr.bf16.mxu0 %v8550_v61 }
 0x49e   :  { %2676 = vmatmul.mubr.bf16.gmra.mrb[164].mxu0 %v7798_v9  ;;  %5958 = vmatmul.mubr.bf16.gmra.mrb[116].mxu1 %v7851_v45  ;;  %v6896_v9 = vld [vmem:[#allocation3 + $0x4] ss:$16 sps:$4 sm:$0xff]  }
 0x49f   :  { %5961 = vmatprep.mubr.bf16.mxu1 %v7883_v40  ;;  %2685 = vmatprep.mubr.bf16.mxu0 %v8550_v61 }
 0x4a6   :  { %2686 = vmatmul.mubr.bf16.gmra.mrb[168].mxu0 %v7823_v3  ;;  %5962 = vmatmul.mubr.bf16.gmra.mrb[120].mxu1 %v2404_v36 }
 0x4a7   :  { %5965 = vmatprep.mubr.bf16.mxu1 %v2405_v24  ;;  %2695 = vmatprep.mubr.bf16.mxu0 %v8550_v61 }
 0x4ae   :  { %2696 = vmatmul.mubr.bf16.gmra.mrb[172].mxu0 %v7851_v45  ;;  %5966 = vmatmul.mubr.bf16.gmra.mrb[124].mxu1 %v2406_v7 }
 0x4af   :  { %2705 = vmatprep.mubr.bf16.mxu0 %v8550_v61  ;;  %3068 = vmatprep.mubr.bf16.mxu1 %v6895_v21 }
 0x4b6   :  { %2706 = vmatmul.mubr.bf16.gmra.mrb[176].mxu0 %v7883_v40 }
 0x4b7   :  { %2715 = vmatprep.mubr.bf16.mxu0 %v8550_v61 }
 0x4be   :  { %2716 = vmatmul.mubr.bf16.gmra.mrb[180].mxu0 %v2404_v36 }
 0x4bf   :  { %2725 = vmatprep.mubr.bf16.mxu0 %v8550_v61 }
 0x4c6   :  { %2726 = vmatmul.mubr.bf16.gmra.mrb[184].mxu0 %v2405_v24 }
 0x4c7   :  { %2735 = vmatprep.mubr.bf16.mxu0 %v8550_v61 }
 0x4ce   :  { %2736 = vmatmul.mubr.bf16.gmra.mrb[188].mxu0 %v2406_v7 }
 0x4cf   :  { %2971 = vmatprep.mubr.bf16.mxu0 %v6896_v9 }
 0x51c   :  { %v2441_v3 = vpop.f32.mrb[128].mxu0  ;;  %v2554_v45 = vpop.f32.mrb[80].mxu1 }
 0x51d   :  { %v2443_v58 = vpop.f32.mrb[129].mxu0  ;;  %v2556_v46 = vpop.f32.mrb[81].mxu1 }
 0x51e   :  { %v2445_v59 = vpop.f32.mrb[130].mxu0  ;;  %v2558_v1 = vpop.f32.mrb[82].mxu1 }
 0x51f   :  { %v2843_v57 = vpack.c.bf16 %v2445_v59, %v2441_v3  ;;  %v2845_v37 = vpack.c.bf16 %v2558_v1, %v2554_v45  ;;  %v2447_v40 = vpop.f32.mrb[131].mxu0  ;;  %v2560_v32 = vpop.f32.mrb[83].mxu1 }
 0x520   :  { %v2844_v50 = vpack.c.bf16 %v2447_v40, %v2443_v58  ;;  %v2846_v53 = vpack.c.bf16 %v2560_v32, %v2556_v46 }
 0x522   :  { %5551 = vmatprep.subr.bf16.mxu0 %v2844_v50  ;;  %5615 = vmatprep.subr.bf16.mxu1 %v2846_v53 }
 0x523   :  { %5552 = vmatpush3.bf16.msra.mxu0 %v2843_v57  ;;  %5616 = vmatpush3.bf16.msra.mxu1 %v2845_v37 }
 0x525   :  { %v2451_v8 = vpop.f32.mrb[132].mxu0  ;;  %v2564_v48 = vpop.f32.mrb[84].mxu1 }
 0x526   :  { %v2453_v6 = vpop.f32.mrb[133].mxu0  ;;  %v2566_v16 = vpop.f32.mrb[85].mxu1 }
 0x527   :  { %v2455_v56 = vpop.f32.mrb[134].mxu0  ;;  %v2568_v23 = vpop.f32.mrb[86].mxu1 }
 0x528   :  { %v2847_v36 = vpack.c.bf16 %v2455_v56, %v2451_v8  ;;  %v2849_v25 = vpack.c.bf16 %v2568_v23, %v2564_v48  ;;  %v2457_v34 = vpop.f32.mrb[135].mxu0  ;;  %v2570_v14 = vpop.f32.mrb[87].mxu1 }
 0x529   :  { %v2848_v10 = vpack.c.bf16 %v2457_v34, %v2453_v6  ;;  %v2850_v39 = vpack.c.bf16 %v2570_v14, %v2566_v16 }
 0x52b   :  { %5553 = vmatprep.subr.bf16.mxu0 %v2848_v10  ;;  %5617 = vmatprep.subr.bf16.mxu1 %v2850_v39 }
 0x52c   :  { %5554 = vmatpush3.bf16.msra.mxu0 %v2847_v36  ;;  %5618 = vmatpush3.bf16.msra.mxu1 %v2849_v25 }
 0x530   :  { %v2461_v42 = vpop.f32.mrb[136].mxu0  ;;  %v2574_v22 = vpop.f32.mrb[88].mxu1 }
 0x531   :  { %v2463_v12 = vpop.f32.mrb[137].mxu0  ;;  %v2576_v35 = vpop.f32.mrb[89].mxu1 }
 0x532   :  { %v2465_v54 = vpop.f32.mrb[138].mxu0  ;;  %v2578_v26 = vpop.f32.mrb[90].mxu1 }
 0x533   :  { %v2851_v27 = vpack.c.bf16 %v2465_v54, %v2461_v42  ;;  %v2853_v29 = vpack.c.bf16 %v2578_v26, %v2574_v22  ;;  %v2467_v5 = vpop.f32.mrb[139].mxu0  ;;  %v2580_v0 = vpop.f32.mrb[91].mxu1 }
 0x534   :  { %v2852_v28 = vpack.c.bf16 %v2467_v5, %v2463_v12  ;;  %v2854_v24 = vpack.c.bf16 %v2580_v0, %v2576_v35 }
 0x536   :  { %5555 = vmatprep.subr.bf16.mxu0 %v2852_v28  ;;  %5619 = vmatprep.subr.bf16.mxu1 %v2854_v24 }
 0x537   :  { %5556 = vmatpush3.bf16.msra.mxu0 %v2851_v27  ;;  %5620 = vmatpush3.bf16.msra.mxu1 %v2853_v29 }
 0x538   :  { %v2471_v2 = vpop.f32.mrb[140].mxu0  ;;  %v2584_v30 = vpop.f32.mrb[92].mxu1 }
 0x539   :  { %v2473_v15 = vpop.f32.mrb[141].mxu0  ;;  %v2586_v44 = vpop.f32.mrb[93].mxu1 }
 0x53a   :  { %v2475_v47 = vpop.f32.mrb[142].mxu0  ;;  %v2588_v19 = vpop.f32.mrb[94].mxu1 }
 0x53b   :  { %v2855_v7 = vpack.c.bf16 %v2475_v47, %v2471_v2  ;;  %v2857_v21 = vpack.c.bf16 %v2588_v19, %v2584_v30  ;;  %v2477_v9 = vpop.f32.mrb[143].mxu0  ;;  %v2590_v3 = vpop.f32.mrb[95].mxu1 }
 0x53c   :  { %v2856_v45 = vpack.c.bf16 %v2477_v9, %v2473_v15  ;;  %v2858_v58 = vpack.c.bf16 %v2590_v3, %v2586_v44 }
 0x53e   :  { %5557 = vmatprep.subr.bf16.mxu0 %v2856_v45  ;;  %5621 = vmatprep.subr.bf16.mxu1 %v2858_v58 }
 0x53f   :  { %5558 = vmatpush3.bf16.msra.mxu0 %v2855_v7  ;;  %5622 = vmatpush3.bf16.msra.mxu1 %v2857_v21 }
 0x547   :  { %v2481_v46 = vpop.f32.mrb[144].mxu0  ;;  %v2594_v59 = vpop.f32.mrb[96].mxu1 }
 0x548   :  { %v2483_v1 = vpop.f32.mrb[145].mxu0  ;;  %v2596_v57 = vpop.f32.mrb[97].mxu1 }
 0x549   :  { %v2485_v37 = vpop.f32.mrb[146].mxu0  ;;  %v2598_v40 = vpop.f32.mrb[98].mxu1 }
 0x54a   :  { %v2859_v32 = vpack.c.bf16 %v2485_v37, %v2481_v46  ;;  %v2861_v50 = vpack.c.bf16 %v2598_v40, %v2594_v59  ;;  %v2487_v53 = vpop.f32.mrb[147].mxu0  ;;  %v2600_v8 = vpop.f32.mrb[99].mxu1  ;;  %v6897_v37 = vld [vmem:[#allocation9 + $0x4] ss:$12 sps:$4 sm:$0xff]   ;;  %v6898_v40 = vld [vmem:[#allocation9 + $0x8] ss:$12 sps:$4 sm:$0xff]  }
 0x54b   :  { %v2860_v48 = vpack.c.bf16 %v2487_v53, %v2483_v1  ;;  %v2862_v6 = vpack.c.bf16 %v2600_v8, %v2596_v57  ;;  %v6899_v53 = vld [vmem:[#allocation3] ss:$16 sps:$4 sm:$0xff]   ;;  %v6900_v8 = vld [vmem:[#allocation3 + $0x8] ss:$16 sps:$4 sm:$0xff]  }
 0x54d   :  { %5559 = vmatprep.subr.bf16.mxu0 %v2860_v48  ;;  %5623 = vmatprep.subr.bf16.mxu1 %v2862_v6  ;;  %v6901_v6 = vld [vmem:[#allocation3 + $0x24] ss:$16 sps:$4 sm:$0xff]  }
 0x54e   :  { %5560 = vmatpush3.bf16.msra.mxu0 %v2859_v32  ;;  %5624 = vmatpush3.bf16.msra.mxu1 %v2861_v50 }
 0x54f   :  { %v2491_v16 = vpop.f32.mrb[148].mxu0  ;;  %v2604_v56 = vpop.f32.mrb[100].mxu1 }
 0x550   :  { %v2493_v23 = vpop.f32.mrb[149].mxu0  ;;  %v2606_v36 = vpop.f32.mrb[101].mxu1 }
 0x551   :  { %v2495_v25 = vpop.f32.mrb[150].mxu0  ;;  %v2608_v34 = vpop.f32.mrb[102].mxu1 }
 0x552   :  { %v2863_v14 = vpack.c.bf16 %v2495_v25, %v2491_v16  ;;  %v2865_v10 = vpack.c.bf16 %v2608_v34, %v2604_v56  ;;  %v2497_v39 = vpop.f32.mrb[151].mxu0  ;;  %v2610_v42 = vpop.f32.mrb[103].mxu1  ;;  %v6902_v16 = vld [vmem:[#allocation3 + $0x2c] ss:$16 sps:$4 sm:$0xff]   ;;  %v6906_v34 = vld [vmem:[#allocation9 + $0x18] ss:$12 sps:$4 sm:$0xff]  }
 0x553   :  { %v2864_v22 = vpack.c.bf16 %v2497_v39, %v2493_v23  ;;  %v2866_v12 = vpack.c.bf16 %v2610_v42, %v2606_v36  ;;  %v6903_v56 = vld [vmem:[#allocation9] ss:$12 sps:$4 sm:$0xff]   ;;  %v6904_v23 = vld [vmem:[#allocation9 + $0x1c] ss:$12 sps:$4 sm:$0xff]   ;;  %v6908_v39 = vld [vmem:[#allocation9 + $0x38] ss:$12 sps:$4 sm:$0xff]  }
 0x554   :  { %v6905_v36 = vld [vmem:[#allocation9 + $0x20] ss:$12 sps:$4 sm:$0xff]  }
 0x555   :  { %5561 = vmatprep.subr.bf16.mxu0 %v2864_v22  ;;  %5625 = vmatprep.subr.bf16.mxu1 %v2866_v12  ;;  %v6909_v22 = vld [vmem:[#allocation3 + $0x20] ss:$16 sps:$4 sm:$0xff]   ;;  %v6910_v12 = vld [vmem:[#allocation3 + $0x28] ss:$16 sps:$4 sm:$0xff]  }
 0x556   :  { %5562 = vmatpush3.bf16.msra.mxu0 %v2863_v14  ;;  %5626 = vmatpush3.bf16.msra.mxu1 %v2865_v10  ;;  %v6907_v10 = vld [vmem:[#allocation9 + $0x34] ss:$12 sps:$4 sm:$0xff]  }
 0x558   :  { %v2501_v35 = vpop.f32.mrb[152].mxu0  ;;  %v2614_v54 = vpop.f32.mrb[104].mxu1 }
 0x559   :  { %v2503_v26 = vpop.f32.mrb[153].mxu0  ;;  %v2616_v27 = vpop.f32.mrb[105].mxu1 }
 0x55a   :  { %v2505_v29 = vpop.f32.mrb[154].mxu0  ;;  %v2618_v5 = vpop.f32.mrb[106].mxu1 }
 0x55b   :  { %v2867_v0 = vpack.c.bf16 %v2505_v29, %v2501_v35  ;;  %v2869_v28 = vpack.c.bf16 %v2618_v5, %v2614_v54  ;;  %v2507_v24 = vpop.f32.mrb[155].mxu0  ;;  %v2620_v2 = vpop.f32.mrb[107].mxu1  ;;  %v6911_v54 = vld [vmem:[#allocation3 + $0x44] ss:$16 sps:$4 sm:$0xff]   ;;  %v6914_v29 = vld [vmem:[#allocation9 + $0x4c] ss:$12 sps:$4 sm:$0xff]  }
 0x55c   :  { %v2868_v30 = vpack.c.bf16 %v2507_v24, %v2503_v26  ;;  %v2870_v15 = vpack.c.bf16 %v2620_v2, %v2616_v27  ;;  %v6912_v26 = vld [vmem:[#allocation3 + $0x4c] ss:$16 sps:$4 sm:$0xff]   ;;  %v6917_v2 = vld [vmem:[#allocation9 + $0x64] ss:$12 sps:$4 sm:$0xff]  }
 0x55d   :  { %v6913_v27 = vld [vmem:[#allocation9 + $0x30] ss:$12 sps:$4 sm:$0xff]  }
 0x55e   :  { %5563 = vmatprep.subr.bf16.mxu0 %v2868_v30  ;;  %5627 = vmatprep.subr.bf16.mxu1 %v2870_v15  ;;  %v6915_v5 = vld [vmem:[#allocation9 + $0x50] ss:$12 sps:$4 sm:$0xff]   ;;  %v6918_v30 = vld [vmem:[#allocation9 + $0x68] ss:$12 sps:$4 sm:$0xff]  }
 0x55f   :  { %5564 = vmatpush3.bf16.msra.mxu0 %v2867_v0  ;;  %5628 = vmatpush3.bf16.msra.mxu1 %v2869_v28  ;;  %v6916_v28 = vld [vmem:[#allocation9 + $0x48] ss:$12 sps:$4 sm:$0xff]  }
 0x561   :  { %v2511_v44 = vpop.f32.mrb[156].mxu0  ;;  %v2624_v47 = vpop.f32.mrb[108].mxu1 }
 0x562   :  { %v2513_v19 = vpop.f32.mrb[157].mxu0  ;;  %v2626_v7 = vpop.f32.mrb[109].mxu1 }
 0x563   :  { %v2515_v21 = vpop.f32.mrb[158].mxu0  ;;  %v2628_v9 = vpop.f32.mrb[110].mxu1 }
 0x564   :  { %v2871_v3 = vpack.c.bf16 %v2515_v21, %v2511_v44  ;;  %v2873_v45 = vpack.c.bf16 %v2628_v9, %v2624_v47  ;;  %v2517_v58 = vpop.f32.mrb[159].mxu0  ;;  %v2630_v46 = vpop.f32.mrb[111].mxu1  ;;  %v6919_v44 = vld [vmem:[#allocation3 + $0x40] ss:$16 sps:$4 sm:$0xff]   ;;  %v6920_v47 = vld [vmem:[#allocation3 + $0x48] ss:$16 sps:$4 sm:$0xff]  }
 0x565   :  { %v2872_v59 = vpack.c.bf16 %v2517_v58, %v2513_v19  ;;  %v2874_v1 = vpack.c.bf16 %v2630_v46, %v2626_v7  ;;  %v6921_v7 = vld [vmem:[#allocation3 + $0x64] ss:$16 sps:$4 sm:$0xff]   ;;  %v6922_v21 = vld [vmem:[#allocation3 + $0x6c] ss:$16 sps:$4 sm:$0xff]  }
 0x566   :  { %v6923_v9 = vld [vmem:[#allocation9 + $0x60] ss:$12 sps:$4 sm:$0xff]   ;;  %v6926_v46 = vld [vmem:[#allocation9 + $0x78] ss:$12 sps:$4 sm:$0xff]  }
 0x567   :  { %5565 = vmatprep.subr.bf16.mxu0 %v2872_v59  ;;  %5629 = vmatprep.subr.bf16.mxu1 %v2874_v1  ;;  %v6927_v1 = vld [vmem:[#allocation9 + $0x94] ss:$12 sps:$4 sm:$0xff]  }
 0x568   :  { %5566 = vmatpush3.bf16.msra.mxu0 %v2871_v3  ;;  %5630 = vmatpush3.bf16.msra.mxu1 %v2873_v45  ;;  %v6924_v3 = vld [vmem:[#allocation9 + $0x7c] ss:$12 sps:$4 sm:$0xff]   ;;  %v6925_v45 = vld [vmem:[#allocation9 + $0x80] ss:$12 sps:$4 sm:$0xff]  }
 0x569   :  { %v7945_v57 = vpop.f32.mrb[112].mxu1  ;;  %3141 = vmatprep.subr.bf16.mxu0 %v6897_v37  ;;  %5969 = vmatprep.subr.bf16.mxu1 %v6898_v40  ;;  %v6928_v37 = vld [vmem:[#allocation9 + $0x98] ss:$12 sps:$4 sm:$0xff]  }
 0x56a   :  { %v7947_v32 = vpop.f32.mrb[113].mxu1 }
 0x56b   :  { %v7949_v50 = vpop.f32.mrb[114].mxu1  ;;  %2972 = vmatmul.mubr.bf16.vlgmr.msra.gmra.mrb[192].mxu0 %v6899_v53  ;;  %3069 = vmatmul.mubr.bf16.vlgmr.msra.gmra.mrb[128].mxu1 %v6900_v8  ;;  %v6929_v53 = vld [vmem:[#allocation3 + $0x60] ss:$16 sps:$4 sm:$0xff]   ;;  %v6930_v8 = vld [vmem:[#allocation3 + $0x68] ss:$16 sps:$4 sm:$0xff]  }
 0x56c   :  { %v7951_v48 = vpop.f32.mrb[115].mxu1  ;;  %2979 = vmatprep.mubr.bf16.mxu0 %v6901_v6  ;;  %3076 = vmatprep.mubr.bf16.mxu1 %v6902_v16  ;;  %v6931_v16 = vld [vmem:[#allocation3 + $0x84] ss:$16 sps:$4 sm:$0xff]  }
 0x56d   :  { %3142 = vmatpush1.bf16.msra.mxu0 %v6903_v56  ;;  %5970 = vmatpush3.bf16.msra.mxu1 %v6898_v40  ;;  %v6932_v56 = vld [vmem:[#allocation3 + $0x8c] ss:$16 sps:$4 sm:$0xff]  }
 0x56e   :  { %3143 = vmatprep.subr.bf16.mxu0 %v6904_v23  ;;  %5971 = vmatprep.subr.bf16.mxu1 %v6905_v36  ;;  %v6933_v23 = vld [vmem:[#allocation9 + $0x90] ss:$12 sps:$4 sm:$0xff]  }
 0x571   :  { %v7953_v25 = vpop.f32.mrb[116].mxu1  ;;  %3144 = vmatpush1.bf16.msra.mxu0 %v6906_v34  ;;  %5972 = vmatpush3.bf16.msra.mxu1 %v6905_v36  ;;  %v6934_v36 = vld [vmem:[#allocation9 + $0xac] ss:$12 sps:$4 sm:$0xff]   ;;  %v6935_v34 = vld [vmem:[#allocation9 + $0xb0] ss:$12 sps:$4 sm:$0xff]  }
 0x572   :  { %v7955_v14 = vpop.f32.mrb[117].mxu1  ;;  %3145 = vmatprep.subr.bf16.mxu0 %v6907_v10  ;;  %5973 = vmatprep.subr.bf16.mxu1 %v6908_v39  ;;  %v6936_v10 = vld [vmem:[#allocation9 + $0xa8] ss:$12 sps:$4 sm:$0xff]  }
 0x573   :  { %v7957_v42 = vpop.f32.mrb[118].mxu1  ;;  %2980 = vmatmul.mubr.bf16.gmra.mrb[196].mxu0 %v6909_v22  ;;  %3077 = vmatmul.mubr.bf16.gmra.mrb[132].mxu1 %v6910_v12  ;;  %v6938_v22 = vld [vmem:[#allocation6 + $0x4] ss:$28 sps:$4 sm:$0xff]  }
 0x574   :  { %v7959_v35 = vpop.f32.mrb[119].mxu1  ;;  %2987 = vmatprep.mubr.bf16.mxu0 %v6911_v54  ;;  %3084 = vmatprep.mubr.bf16.mxu1 %v6912_v26  ;;  %v6939_v12 = vld [vmem:[#allocation3 + $0x80] ss:$16 sps:$4 sm:$0xff]   ;;  %v6940_v54 = vld [vmem:[#allocation3 + $0x88] ss:$16 sps:$4 sm:$0xff]  }
 0x575   :  { %3146 = vmatpush1.bf16.msra.mxu0 %v6913_v27  ;;  %5974 = vmatpush3.bf16.msra.mxu1 %v6908_v39  ;;  %v6937_v39 = vld [vmem:[#allocation6 + $0xc] ss:$28 sps:$4 sm:$0xff]   ;;  %v6941_v26 = vld [vmem:[#allocation3 + $0xa4] ss:$16 sps:$4 sm:$0xff]  }
 0x576   :  { %3147 = vmatprep.subr.bf16.mxu0 %v6914_v29  ;;  %5975 = vmatprep.subr.bf16.mxu1 %v6915_v5  ;;  %v6942_v27 = vld [vmem:[#allocation3 + $0xac] ss:$16 sps:$4 sm:$0xff]   ;;  %v6943_v29 = vld [vmem:[#allocation3 + $0xa0] ss:$16 sps:$4 sm:$0xff]  }
 0x579   :  { %v7961_v0 = vpop.f32.mrb[120].mxu1  ;;  %3148 = vmatpush1.bf16.msra.mxu0 %v6916_v28  ;;  %5976 = vmatpush3.bf16.msra.mxu1 %v6915_v5  ;;  %v6944_v5 = vld [vmem:[#allocation3 + $0xa8] ss:$16 sps:$4 sm:$0xff]   ;;  %v6945_v28 = vld [vmem:[#allocation3 + $0xc4] ss:$16 sps:$4 sm:$0xff]  }
 0x57a   :  { %v7963_v24 = vpop.f32.mrb[121].mxu1  ;;  %3149 = vmatprep.subr.bf16.mxu0 %v6917_v2  ;;  %5977 = vmatprep.subr.bf16.mxu1 %v6918_v30  ;;  %v6946_v2 = vld [vmem:[#allocation3 + $0xcc] ss:$16 sps:$4 sm:$0xff]  }
 0x57b   :  { %v7965_v15 = vpop.f32.mrb[122].mxu1  ;;  %2988 = vmatmul.mubr.bf16.gmra.mrb[200].mxu0 %v6919_v44  ;;  %3085 = vmatmul.mubr.bf16.gmra.mrb[136].mxu1 %v6920_v47  ;;  %v6948_v44 = vld [vmem:[#allocation3 + $0xc8] ss:$16 sps:$4 sm:$0xff]   ;;  %v6949_v47 = vld [vmem:[#allocation3 + $0xe4] ss:$16 sps:$4 sm:$0xff]  }
 0x57c   :  { %v7967_v19 = vpop.f32.mrb[123].mxu1  ;;  %2995 = vmatprep.mubr.bf16.mxu0 %v6921_v7  ;;  %3092 = vmatprep.mubr.bf16.mxu1 %v6922_v21  ;;  %v6950_v7 = vld [vmem:[#allocation3 + $0xec] ss:$16 sps:$4 sm:$0xff]   ;;  %v6951_v21 = vld [vmem:[#allocation3 + $0xe0] ss:$16 sps:$4 sm:$0xff]  }
 0x57d   :  { %3150 = vmatpush1.bf16.msra.mxu0 %v6923_v9  ;;  %5978 = vmatpush3.bf16.msra.mxu1 %v6918_v30  ;;  %v6947_v30 = vld [vmem:[#allocation3 + $0xc0] ss:$16 sps:$4 sm:$0xff]   ;;  %v6952_v9 = vld [vmem:[#allocation3 + $0xe8] ss:$16 sps:$4 sm:$0xff]  }
 0x57e   :  { %3151 = vmatprep.subr.bf16.mxu0 %v6924_v3  ;;  %5979 = vmatprep.subr.bf16.mxu1 %v6925_v45 }
 0x581   :  { %v7969_v58 = vpop.f32.mrb[124].mxu1  ;;  %3152 = vmatpush1.bf16.msra.mxu0 %v6926_v46  ;;  %5980 = vmatpush3.bf16.msra.mxu1 %v6925_v45 }
 0x582   :  { %v7971_v59 = vpop.f32.mrb[125].mxu1  ;;  %3153 = vmatprep.subr.bf16.mxu0 %v6927_v1  ;;  %5981 = vmatprep.subr.bf16.mxu1 %v6928_v37 }
 0x583   :  { %v7973_v40 = vpop.f32.mrb[126].mxu1  ;;  %2996 = vmatmul.mubr.bf16.gmra.mrb[204].mxu0 %v6929_v53  ;;  %3093 = vmatmul.mubr.bf16.gmra.mrb[140].mxu1 %v6930_v8 }
 0x584   :  { %8579 = vst [vmem:[#allocation19_spill] sm:$0xff] %v7973_v40  ;;  %v7975_v6 = vpop.f32.mrb[127].mxu1  ;;  %3003 = vmatprep.mubr.bf16.mxu0 %v6931_v16  ;;  %3100 = vmatprep.mubr.bf16.mxu1 %v6932_v56 }
 0x585   :  { %3154 = vmatpush1.bf16.msra.mxu0 %v6933_v23  ;;  %5982 = vmatpush3.bf16.msra.mxu1 %v6928_v37 }
 0x586   :  { %3155 = vmatprep.subr.bf16.mxu0 %v6934_v36  ;;  %5983 = vmatprep.subr.bf16.mxu1 %v6935_v34  ;;  %v6953_v36 = vld [vmem:[#allocation8] sm:$0xff] }
 0x589   :  { %3156 = vmatpush1.bf16.msra.mxu0 %v6936_v10  ;;  %5984 = vmatpush3.bf16.msra.mxu1 %v6935_v34 }
 0x58a   :  { %3872 = vmatprep.subr.bf16.mxu0 %v6937_v39  ;;  %3759 = vmatprep.subr.bf16.mxu1 %v6938_v22 }
 0x58b   :  { %3004 = vmatmul.mubr.bf16.gmra.mrb[208].mxu0 %v6939_v12  ;;  %3101 = vmatmul.mubr.bf16.gmra.mrb[144].mxu1 %v6940_v54  ;;  %v6954_v12 = vld [vmem:[#allocation8 + $0x8] sm:$0xff] }
 0x58c   :  { %3011 = vmatprep.mubr.bf16.mxu0 %v6941_v26  ;;  %3108 = vmatprep.mubr.bf16.mxu1 %v6942_v27 }
 0x593   :  { %3012 = vmatmul.mubr.bf16.gmra.mrb[212].mxu0 %v6943_v29  ;;  %3109 = vmatmul.mubr.bf16.gmra.mrb[148].mxu1 %v6944_v5 }
 0x594   :  { %3019 = vmatprep.mubr.bf16.mxu0 %v6945_v28  ;;  %3116 = vmatprep.mubr.bf16.mxu1 %v6946_v2 }
 0x59b   :  { %3020 = vmatmul.mubr.bf16.gmra.mrb[216].mxu0 %v6947_v30  ;;  %3117 = vmatmul.mubr.bf16.gmra.mrb[152].mxu1 %v6948_v44 }
 0x59c   :  { %3027 = vmatprep.mubr.bf16.mxu0 %v6949_v47  ;;  %3124 = vmatprep.mubr.bf16.mxu1 %v6950_v7 }
 0x5a3   :  { %3028 = vmatmul.mubr.bf16.gmra.mrb[220].mxu0 %v6951_v21  ;;  %3125 = vmatmul.mubr.bf16.gmra.mrb[156].mxu1 %v6952_v9 }
 0x5a4   :  { %3173 = vmatprep.mubr.bf16.mxu0 %v8550_v61 }
 0x63e   :  { %v5567_v3 = vpop.f32.mrb[192].mxu0  ;;  %v5631_v45 = vpop.f32.mrb[128].mxu1 }
 0x63f   :  { %v5568_v46 = vpop.f32.mrb[193].mxu0  ;;  %v5632_v1 = vpop.f32.mrb[129].mxu1 }
 0x640   :  { %v5569_v37 = vadd.f32 %v5568_v46, %v5567_v3  ;;  %v5570_v53 = vpop.f32.mrb[194].mxu0  ;;  %v5633_v8 = vadd.f32 %v5632_v1, %v5631_v45  ;;  %v5634_v16 = vpop.f32.mrb[130].mxu1  ;;  %v6955_v3 = vld [vmem:[#allocation8 + $0x10] sm:$0xff] }
 0x641   :  { %v5571_v56 = vpop.f32.mrb[195].mxu0  ;;  %v5635_v23 = vpop.f32.mrb[131].mxu1 }
 0x642   :  { %v2974_v34 = vadd.f32 %v6953_v36, %v5569_v37  ;;  %v5572_v10 = vadd.f32 %v5571_v56, %v5570_v53  ;;  %v5636_v39 = vadd.f32 %v5635_v23, %v5634_v16  ;;  %v6956_v37 = vld [vmem:[#allocation6 + $0x8] ss:$28 sps:$4 sm:$0xff]  }
 0x643   :  { %v6958_v56 = vld [vmem:[#allocation6 + $0x44] ss:$28 sps:$4 sm:$0xff]  }
 0x644   :  { %v3071_v22 = vadd.f32 %v5633_v8, %v2974_v34  ;;  %v2977_v54 = vadd.f32 %v6954_v12, %v5572_v10  ;;  %v6957_v8 = vld [vmem:[#allocation8 + $0x18] sm:$0xff] }
 0x646   :  { %v3074_v26 = vadd.f32 %v5636_v39, %v2977_v54  ;;  %v5573_v27 = vpop.f32.mrb[196].mxu0  ;;  %v5637_v29 = vpop.f32.mrb[132].mxu1 }
 0x647   :  { %v5574_v5 = vpop.f32.mrb[197].mxu0  ;;  %v5638_v28 = vpop.f32.mrb[133].mxu1 }
 0x648   :  { %v3133_v2 = vpack.c.bf16 %v3074_v26, %v3071_v22  ;;  %v5575_v30 = vadd.f32 %v5574_v5, %v5573_v27  ;;  %v5576_v44 = vpop.f32.mrb[198].mxu0  ;;  %v5639_v47 = vadd.f32 %v5638_v28, %v5637_v29  ;;  %v5640_v7 = vpop.f32.mrb[134].mxu1  ;;  %v6959_v22 = vld [vmem:[#allocation6 + $0x40] ss:$28 sps:$4 sm:$0xff]  }
 0x649   :  { %v5577_v21 = vpop.f32.mrb[199].mxu0  ;;  %v5641_v9 = vpop.f32.mrb[135].mxu1  ;;  %v6960_v5 = vld [vmem:[#allocation6 + $0x7c] ss:$28 sps:$4 sm:$0xff]  }
 0x64a   :  { %v2982_v45 = vadd.f32 %v6955_v3, %v5575_v30  ;;  %v5578_v46 = vadd.f32 %v5577_v21, %v5576_v44  ;;  %v5642_v1 = vadd.f32 %v5641_v9, %v5640_v7  ;;  %3174 = vmatmul.mubr.bf16.vlgmr.msra.gmra.mrb[160].mxu0 %v3133_v2  ;;  %5985 = vmatprep.mubr.bf16.mxu1 %v3133_v2  ;;  %v6961_v30 = vld [vmem:[#allocation8 + $0x20] sm:$0xff]  ;;  %v6962_v21 = vld [vmem:[#allocation6 + $0x78] ss:$28 sps:$4 sm:$0xff]   ;;  %v6963_v3 = vld [vmem:[#allocation8 + $0x28] sm:$0xff] }
 0x64b   :  { %3183 = vmatprep.mubr.bf16.mxu0 %v8550_v61  ;;  %3873 = vmatpush1.bf16.msra.mxu0 %v6956_v37  ;;  %v6966_v37 = vld [vmem:[#allocation6 + $0x3c] ss:$28 sps:$4 sm:$0xff]  }
 0x64c   :  { %v3079_v53 = vadd.f32 %v5639_v47, %v2982_v45  ;;  %v2985_v16 = vadd.f32 %v6957_v8, %v5578_v46  ;;  %3874 = vmatprep.subr.bf16.mxu0 %v6958_v56  ;;  %v6964_v46 = vld [vmem:[#allocation6 + $0xb4] ss:$28 sps:$4 sm:$0xff]  }
 0x64e   :  { %v3082_v23 = vadd.f32 %v5642_v1, %v2985_v16  ;;  %v5579_v36 = vpop.f32.mrb[200].mxu0  ;;  %v5643_v34 = vpop.f32.mrb[136].mxu1  ;;  %v6965_v1 = vld [vmem:[#allocation6] ss:$28 sps:$4 sm:$0xff]  }
 0x64f   :  { %v5580_v10 = vpop.f32.mrb[201].mxu0  ;;  %v5644_v39 = vpop.f32.mrb[137].mxu1  ;;  %3875 = vmatpush1.bf16.msra.mxu0 %v6959_v22 }
 0x650   :  { %v5581_v12 = vadd.f32 %v5580_v10, %v5579_v36  ;;  %v5582_v54 = vpop.f32.mrb[202].mxu0  ;;  %v5645_v26 = vadd.f32 %v5644_v39, %v5643_v34  ;;  %v5646_v27 = vpop.f32.mrb[138].mxu1  ;;  %v3134_v29 = vpack.c.bf16 %v3082_v23, %v3079_v53  ;;  %3876 = vmatprep.subr.bf16.mxu0 %v6960_v5  ;;  %v6967_v36 = vld [vmem:[#allocation6 + $0xb0] ss:$28 sps:$4 sm:$0xff]  }
 0x651   :  { %v5583_v28 = vpop.f32.mrb[203].mxu0  ;;  %v5647_v2 = vpop.f32.mrb[139].mxu1  ;;  %v6970_v5 = vld [vmem:[#allocation6 + $0x74] ss:$28 sps:$4 sm:$0xff]  }
 0x652   :  { %v2990_v44 = vadd.f32 %v6961_v30, %v5581_v12  ;;  %v5584_v47 = vadd.f32 %v5583_v28, %v5582_v54  ;;  %v5648_v7 = vadd.f32 %v5647_v2, %v5646_v27  ;;  %3184 = vmatmul.mubr.bf16.gmra.mrb[164].mxu0 %v3134_v29  ;;  %5986 = vmatmul.mubr.bf16.vlgmr.msra.gmra.mrb[160].mxu1 %v3134_v29  ;;  %v6968_v54 = vld [vmem:[#allocation6 + $0x38] ss:$28 sps:$4 sm:$0xff]  }
 0x653   :  { %3193 = vmatprep.mubr.bf16.mxu0 %v8550_v61  ;;  %3877 = vmatpush1.bf16.msra.mxu0 %v6962_v21  ;;  %v6971_v28 = vld [vmem:[#allocation8 + $0x30] sm:$0xff]  ;;  %v6973_v21 = vld [vmem:[#allocation8 + $0x38] sm:$0xff] }
 0x654   :  { %v3087_v9 = vadd.f32 %v5645_v26, %v2990_v44  ;;  %v2993_v45 = vadd.f32 %v6963_v3, %v5584_v47  ;;  %3878 = vmatprep.subr.bf16.mxu0 %v6964_v46  ;;  %3760 = vmatpush1.bf16.msra.mxu1 %v6965_v1  ;;  %v6969_v26 = vld [vmem:[#allocation6 + $0xec] ss:$28 sps:$4 sm:$0xff]  }
 0x655   :  { %3761 = vmatprep.subr.bf16.mxu1 %v6966_v37  ;;  %v6972_v47 = vld [vmem:[#allocation6 + $0xe8] ss:$28 sps:$4 sm:$0xff]   ;;  %v6974_v3 = vld [vmem:[#allocation6 + $0x70] ss:$28 sps:$4 sm:$0xff]  }
 0x656   :  { %v3090_v53 = vadd.f32 %v5648_v7, %v2993_v45  ;;  %v5585_v8 = vpop.f32.mrb[204].mxu0  ;;  %v5649_v16 = vpop.f32.mrb[140].mxu1  ;;  %v6975_v45 = vld [vmem:[#allocation6 + $0x124] ss:$28 sps:$4 sm:$0xff]   ;;  %v6976_v46 = vld [vmem:[#allocation6 + $0xac] ss:$28 sps:$4 sm:$0xff]  }
 0x657   :  { %v5586_v56 = vpop.f32.mrb[205].mxu0  ;;  %v5650_v23 = vpop.f32.mrb[141].mxu1  ;;  %3879 = vmatpush1.bf16.msra.mxu0 %v6967_v36 }
 0x658   :  { %v5587_v34 = vadd.f32 %v5586_v56, %v5585_v8  ;;  %v5588_v10 = vpop.f32.mrb[206].mxu0  ;;  %v5651_v39 = vadd.f32 %v5650_v23, %v5649_v16  ;;  %v5652_v22 = vpop.f32.mrb[142].mxu1  ;;  %v3135_v12 = vpack.c.bf16 %v3090_v53, %v3087_v9  ;;  %3762 = vmatpush1.bf16.msra.mxu1 %v6968_v54  ;;  %3880 = vmatprep.subr.bf16.mxu0 %v6969_v26  ;;  %v6977_v56 = vld [vmem:[#allocation6 + $0x120] ss:$28 sps:$4 sm:$0xff]  }
 0x659   :  { %v5589_v27 = vpop.f32.mrb[207].mxu0  ;;  %v5653_v29 = vpop.f32.mrb[143].mxu1  ;;  %3763 = vmatprep.subr.bf16.mxu1 %v6970_v5 }
 0x65a   :  { %v2998_v2 = vadd.f32 %v6971_v28, %v5587_v34  ;;  %v5590_v30 = vadd.f32 %v5589_v27, %v5588_v10  ;;  %v5654_v44 = vadd.f32 %v5653_v29, %v5652_v22  ;;  %3194 = vmatmul.mubr.bf16.gmra.mrb[168].mxu0 %v3135_v12  ;;  %5989 = vmatprep.mubr.bf16.mxu1 %v3135_v12  ;;  %v6978_v22 = vld [vmem:[#allocation6 + $0xa8] ss:$28 sps:$4 sm:$0xff]   ;;  %v6979_v12 = vld [vmem:[#allocation6 + $0x15c] ss:$28 sps:$4 sm:$0xff]  }
 0x65b   :  { %3203 = vmatprep.mubr.bf16.mxu0 %v8550_v61  ;;  %3881 = vmatpush1.bf16.msra.mxu0 %v6972_v47  ;;  %v6980_v27 = vld [vmem:[#allocation6 + $0xe4] ss:$28 sps:$4 sm:$0xff]   ;;  %v6983_v47 = vld [vmem:[#allocation8 + $0x48] sm:$0xff] }
 0x65c   :  { %v3095_v7 = vadd.f32 %v5651_v39, %v2998_v2  ;;  %v3001_v9 = vadd.f32 %v6973_v21, %v5590_v30  ;;  %3764 = vmatpush1.bf16.msra.mxu1 %v6974_v3  ;;  %3882 = vmatprep.subr.bf16.mxu0 %v6975_v45  ;;  %v6981_v29 = vld [vmem:[#allocation8 + $0x40] sm:$0xff]  ;;  %v6982_v30 = vld [vmem:[#allocation6 + $0x158] ss:$28 sps:$4 sm:$0xff]  }
 0x65d   :  { %3765 = vmatprep.subr.bf16.mxu1 %v6976_v46  ;;  %v6984_v21 = vld [vmem:[#allocation6 + $0xe0] ss:$28 sps:$4 sm:$0xff]  }
 0x65e   :  { %v3098_v1 = vadd.f32 %v5654_v44, %v3001_v9  ;;  %v5591_v37 = vpop.f32.mrb[208].mxu0  ;;  %v5655_v53 = vpop.f32.mrb[144].mxu1  ;;  %v6985_v9 = vld [vmem:[#allocation6 + $0x194] ss:$28 sps:$4 sm:$0xff]   ;;  %v6986_v3 = vld [vmem:[#allocation6 + $0x11c] ss:$28 sps:$4 sm:$0xff]  }
 0x65f   :  { %v5592_v8 = vpop.f32.mrb[209].mxu0  ;;  %v5656_v16 = vpop.f32.mrb[145].mxu1  ;;  %3883 = vmatpush1.bf16.msra.mxu0 %v6977_v56 }
 0x660   :  { %v5593_v23 = vadd.f32 %v5592_v8, %v5591_v37  ;;  %v5594_v36 = vpop.f32.mrb[210].mxu0  ;;  %v5657_v34 = vadd.f32 %v5656_v16, %v5655_v53  ;;  %v5658_v10 = vpop.f32.mrb[146].mxu1  ;;  %v3136_v39 = vpack.c.bf16 %v3098_v1, %v3095_v7  ;;  %3766 = vmatpush1.bf16.msra.mxu1 %v6978_v22  ;;  %3884 = vmatprep.subr.bf16.mxu0 %v6979_v12  ;;  %v6987_v8 = vld [vmem:[#allocation6 + $0x190] ss:$28 sps:$4 sm:$0xff]  }
 0x661   :  { %v5595_v54 = vpop.f32.mrb[211].mxu0  ;;  %v5659_v26 = vpop.f32.mrb[147].mxu1  ;;  %3767 = vmatprep.subr.bf16.mxu1 %v6980_v27 }
 0x662   :  { %v3006_v5 = vadd.f32 %v6981_v29, %v5593_v23  ;;  %v5596_v28 = vadd.f32 %v5595_v54, %v5594_v36  ;;  %v5660_v2 = vadd.f32 %v5659_v26, %v5658_v10  ;;  %3204 = vmatmul.mubr.bf16.gmra.mrb[172].mxu0 %v3136_v39  ;;  %5990 = vmatmul.mubr.bf16.gmra.mrb[164].mxu1 %v3136_v39  ;;  %v6988_v10 = vld [vmem:[#allocation6 + $0x118] ss:$28 sps:$4 sm:$0xff]  }
 0x663   :  { %3213 = vmatprep.mubr.bf16.mxu0 %v8550_v61  ;;  %3885 = vmatpush1.bf16.msra.mxu0 %v6982_v30  ;;  %v7982_v39 = vld [vmem:[#allocation6 + $0x18] ss:$28 sps:$4 sm:$0xff]  }
 0x664   :  { %v3103_v44 = vadd.f32 %v5657_v34, %v3006_v5  ;;  %v3009_v7 = vadd.f32 %v6983_v47, %v5596_v28  ;;  %3768 = vmatpush1.bf16.msra.mxu1 %v6984_v21  ;;  %3886 = vmatprep.subr.bf16.mxu0 %v6985_v9  ;;  %v6990_v54 = vld [vmem:[#allocation6 + $0x154] ss:$28 sps:$4 sm:$0xff]   ;;  %v6994_v47 = vld [vmem:[#allocation6 + $0x18c] ss:$28 sps:$4 sm:$0xff]  }
 0x665   :  { %3769 = vmatprep.subr.bf16.mxu1 %v6986_v3  ;;  %v6991_v26 = vld [vmem:[#allocation8 + $0x50] sm:$0xff] }
 0x666   :  { %v3106_v45 = vadd.f32 %v5660_v2, %v3009_v7  ;;  %v5597_v46 = vpop.f32.mrb[212].mxu0  ;;  %v5661_v1 = vpop.f32.mrb[148].mxu1  ;;  %v6992_v2 = vld [vmem:[#allocation8 + $0x58] sm:$0xff] }
 0x667   :  { %v5598_v37 = vpop.f32.mrb[213].mxu0  ;;  %v5662_v53 = vpop.f32.mrb[149].mxu1  ;;  %3887 = vmatpush1.bf16.msra.mxu0 %v6987_v8 }
 0x668   :  { %v5599_v16 = vadd.f32 %v5598_v37, %v5597_v46  ;;  %v5600_v56 = vpop.f32.mrb[214].mxu0  ;;  %v5663_v23 = vadd.f32 %v5662_v53, %v5661_v1  ;;  %v5664_v36 = vpop.f32.mrb[150].mxu1  ;;  %v3137_v34 = vpack.c.bf16 %v3106_v45, %v3103_v44  ;;  %3770 = vmatpush1.bf16.msra.mxu1 %v6988_v10  ;;  %6001 = vmatprep.subr.bf16.mxu0 %v7982_v39  ;;  %v6993_v44 = vld [vmem:[#allocation6 + $0x150] ss:$28 sps:$4 sm:$0xff]  }
 0x669   :  { %v5601_v22 = vpop.f32.mrb[215].mxu0  ;;  %v5665_v12 = vpop.f32.mrb[151].mxu1  ;;  %3771 = vmatprep.subr.bf16.mxu1 %v6990_v54 }
 0x66a   :  { %v3014_v27 = vadd.f32 %v6991_v26, %v5599_v16  ;;  %v5602_v29 = vadd.f32 %v5601_v22, %v5600_v56  ;;  %v5666_v5 = vadd.f32 %v5665_v12, %v5664_v36  ;;  %3214 = vmatmul.mubr.bf16.gmra.mrb[176].mxu0 %v3137_v34  ;;  %5993 = vmatprep.mubr.bf16.mxu1 %v3137_v34  ;;  %v6995_v16 = vld [vmem:[#allocation6 + $0x188] ss:$28 sps:$4 sm:$0xff]   ;;  %v6996_v36 = vld [vmem:[#allocation6 + $0x14] ss:$28 sps:$4 sm:$0xff]  }
 0x66b   :  { %3223 = vmatprep.mubr.bf16.mxu0 %v8550_v61  ;;  %v6997_v34 = vld [vmem:[#allocation8 + $0x60] sm:$0xff]  ;;  %v6998_v26 = vld [vmem:[#allocation8 + $0x68] sm:$0xff] }
 0x66c   :  { %v3111_v28 = vadd.f32 %v5663_v23, %v3014_v27  ;;  %v3017_v30 = vadd.f32 %v6992_v2, %v5602_v29  ;;  %3772 = vmatpush1.bf16.msra.mxu1 %v6993_v44 }
 0x66d   :  { %3773 = vmatprep.subr.bf16.mxu1 %v6994_v47 }
 0x66e   :  { %v3114_v7 = vadd.f32 %v5666_v5, %v3017_v30  ;;  %v5603_v21 = vpop.f32.mrb[216].mxu0  ;;  %v5667_v9 = vpop.f32.mrb[152].mxu1 }
 0x66f   :  { %v5604_v3 = vpop.f32.mrb[217].mxu0  ;;  %v5668_v45 = vpop.f32.mrb[153].mxu1 }
 0x670   :  { %v5605_v46 = vadd.f32 %v5604_v3, %v5603_v21  ;;  %v5606_v1 = vpop.f32.mrb[218].mxu0  ;;  %v5669_v37 = vadd.f32 %v5668_v45, %v5667_v9  ;;  %v5670_v53 = vpop.f32.mrb[154].mxu1  ;;  %v3138_v8 = vpack.c.bf16 %v3114_v7, %v3111_v28  ;;  %3774 = vmatpush1.bf16.msra.mxu1 %v6995_v16  ;;  %v7000_v16 = vld [vmem:[#allocation8 + $0x78] sm:$0xff] }
 0x671   :  { %v5607_v56 = vpop.f32.mrb[219].mxu0  ;;  %v5671_v23 = vpop.f32.mrb[155].mxu1  ;;  %3985 = vmatprep.subr.bf16.mxu1 %v6996_v36 }
 0x672   :  { %v3022_v10 = vadd.f32 %v6997_v34, %v5605_v46  ;;  %v5608_v22 = vadd.f32 %v5607_v56, %v5606_v1  ;;  %v5672_v12 = vadd.f32 %v5671_v23, %v5670_v53  ;;  %3224 = vmatmul.mubr.bf16.gmra.mrb[180].mxu0 %v3138_v8  ;;  %5994 = vmatmul.mubr.bf16.gmra.mrb[168].mxu1 %v3138_v8  ;;  %v6999_v46 = vld [vmem:[#allocation8 + $0x70] sm:$0xff] }
 0x673   :  { %3233 = vmatprep.mubr.bf16.mxu0 %v8550_v61 }
 0x674   :  { %v3119_v54 = vadd.f32 %v5669_v37, %v3022_v10  ;;  %v3025_v27 = vadd.f32 %v6998_v26, %v5608_v22 }
 0x676   :  { %v3122_v29 = vadd.f32 %v5672_v12, %v3025_v27  ;;  %v5609_v5 = vpop.f32.mrb[220].mxu0  ;;  %v5673_v28 = vpop.f32.mrb[156].mxu1 }
 0x677   :  { %v5610_v2 = vpop.f32.mrb[221].mxu0  ;;  %v5674_v30 = vpop.f32.mrb[157].mxu1 }
 0x678   :  { %v5611_v44 = vadd.f32 %v5610_v2, %v5609_v5  ;;  %v5612_v47 = vpop.f32.mrb[222].mxu0  ;;  %v5675_v7 = vadd.f32 %v5674_v30, %v5673_v28  ;;  %v5676_v21 = vpop.f32.mrb[158].mxu1  ;;  %v3139_v9 = vpack.c.bf16 %v3122_v29, %v3119_v54 }
 0x679   :  { %v5613_v3 = vpop.f32.mrb[223].mxu0  ;;  %v5677_v45 = vpop.f32.mrb[159].mxu1 }
 0x67a   :  { %v3030_v1 = vadd.f32 %v6999_v46, %v5611_v44  ;;  %v5614_v53 = vadd.f32 %v5613_v3, %v5612_v47  ;;  %v5678_v8 = vadd.f32 %v5677_v45, %v5676_v21  ;;  %3234 = vmatmul.mubr.bf16.gmra.mrb[184].mxu0 %v3139_v9  ;;  %5997 = vmatprep.mubr.bf16.mxu1 %v3139_v9 }
 0x67b   :  { %3243 = vmatprep.mubr.bf16.mxu0 %v8550_v61 }
 0x67c   :  { %v3127_v37 = vadd.f32 %v5675_v7, %v3030_v1  ;;  %v3033_v56 = vadd.f32 %v7000_v16, %v5614_v53 }
 0x67e   :  { %v3130_v23 = vadd.f32 %v5678_v8, %v3033_v56 }
 0x680   :  { %v3140_v36 = vpack.c.bf16 %v3130_v23, %v3127_v37 }
 0x682   :  { %3244 = vmatmul.mubr.bf16.gmra.mrb[188].mxu0 %v3140_v36  ;;  %5998 = vmatmul.mubr.bf16.gmra.mrb[172].mxu1 %v3140_v36 }
 0x683   :  { %3791 = vmatprep.mubr.bf16.mxu1 %v8550_v61  ;;  %3904 = vmatprep.mubr.bf16.mxu0 %v8550_v61 }
 0x71d   :  { %v3175_v34 = vpop.f32.mrb[160].mxu0 }
 0x71e   :  { %v3383_v10 = vadd.f32 %v3175_v34, %v7633_v55  ;;  %v3177_v22 = vpop.f32.mrb[161].mxu0 }
 0x71f   :  { %v3384_v12 = vadd.f32 %v3177_v22, %v7635_v20  ;;  %v3179_v54 = vpop.f32.mrb[162].mxu0 }
 0x720   :  { %v5302_v26 = vmul.f32 -1.442695, %v3383_v10  ;;  %v3385_v27 = vadd.f32 %v3179_v54, %v7633_v55  ;;  %v3181_v29 = vpop.f32.mrb[163].mxu0 }
 0x721   :  { %v5303_v5 = vmul.f32 -1.442695, %v3384_v12  ;;  %v3386_v28 = vadd.f32 %v3181_v29, %v7635_v20 }
 0x722   :  { %6520 = vpow2.f32 %v5302_v26  ;;  %v5304_v2 = vmul.f32 -1.442695, %v3385_v27 }
 0x723   :  { %6522 = vpow2.f32 %v5303_v5  ;;  %v5305_v30 = vmul.f32 -1.442695, %v3386_v28 }
 0x724   :  { %6524 = vpow2.f32 %v5304_v2 }
 0x725   :  { %v3185_v44 = vpop.f32.mrb[164].mxu0  ;;  %v7994_v47 = vpop.f32.mrb[160].mxu1  ;;  %6526 = vpow2.f32 %v5305_v30 }
 0x726   :  { %v3387_v7 = vadd.f32 %v3185_v44, %v7633_v55  ;;  %v3187_v21 = vpop.f32.mrb[165].mxu0  ;;  %v7997_v9 = vpop.f32.mrb[161].mxu1 }
 0x727   :  { %v3388_v3 = vadd.f32 %v3187_v21, %v7635_v20  ;;  %v3189_v45 = vpop.f32.mrb[166].mxu0  ;;  %v8000_v46 = vpop.f32.mrb[162].mxu1 }
 0x728   :  { %v5306_v1 = vmul.f32 -1.442695, %v3387_v7  ;;  %v3389_v53 = vadd.f32 %v3189_v45, %v7633_v55  ;;  %v3191_v8 = vpop.f32.mrb[167].mxu0  ;;  %v8003_v37 = vpop.f32.mrb[163].mxu1 }
 0x729   :  { %v3390_v16 = vadd.f32 %v3191_v8, %v7635_v20  ;;  %v5307_v56 = vmul.f32 -1.442695, %v3388_v3 }
 0x72a   :  { %6528 = vpow2.f32 %v5306_v1  ;;  %v5308_v23 = vmul.f32 -1.442695, %v3389_v53 }
 0x72b   :  { %v5309_v34 = vmul.f32 -1.442695, %v3390_v16 }
 0x72c   :  { %v6521_v36 = vpop.eup %6520  ;;  %6530 = vpow2.f32 %v5308_v23 }
 0x72d   :  { %v6523_v10 = vpop.eup %6522  ;;  %v3511_v22 = vadd.f32 1.0, %v6521_v36  ;;  %v3195_v12 = vpop.f32.mrb[168].mxu0  ;;  %6532 = vpow2.f32 %v5307_v56 }
 0x72e   :  { %v6525_v54 = vpop.eup %6524  ;;  %v3391_v26 = vadd.f32 %v3195_v12, %v7633_v55  ;;  %v3197_v27 = vpop.f32.mrb[169].mxu0  ;;  %v3512_v2 = vadd.f32 1.0, %v6523_v10 }
 0x72f   :  { %6534 = vrcp.f32 %v3511_v22  ;;  %v3513_v29 = vadd.f32 1.0, %v6525_v54  ;;  %v3392_v5 = vadd.f32 %v3197_v27, %v7635_v20  ;;  %v3199_v28 = vpop.f32.mrb[170].mxu0  ;;  %v6527_v1 = vpop.eup %6526 }
 0x730   :  { %6536 = vpow2.f32 %v5309_v34  ;;  %v5310_v30 = vmul.f32 -1.442695, %v3391_v26  ;;  %v3393_v44 = vadd.f32 %v3199_v28, %v7633_v55  ;;  %v3201_v7 = vpop.f32.mrb[171].mxu0  ;;  %v3514_v34 = vadd.f32 1.0, %v6527_v1  ;;  %v8021_v28 = vld [vmem:[%s8509_s9] ss:$0 sm:$0xff] }
 0x731   :  { %6538 = vrcp.f32 %v3513_v29  ;;  %v3394_v21 = vadd.f32 %v3201_v7, %v7635_v20  ;;  %v5311_v3 = vmul.f32 -1.442695, %v3392_v5 }
 0x732   :  { %v5312_v45 = vmul.f32 -1.442695, %v3393_v44  ;;  %6540 = vpow2.f32 %v5310_v30 }
 0x733   :  { %6542 = vrcp.f32 %v3512_v2  ;;  %v5313_v8 = vmul.f32 -1.442695, %v3394_v21  ;;  %v3623_v2 = vadd.f32 %v8021_v28, %v7947_v32 }
 0x734   :  { %v6529_v53 = vpop.eup %6528  ;;  %6544 = vpow2.f32 %v5312_v45  ;;  %v3624_v45 = vadd.f32 %v8021_v28, %v7951_v48 }
 0x735   :  { %v3515_v16 = vadd.f32 1.0, %v6529_v53  ;;  %v3205_v56 = vpop.f32.mrb[172].mxu0  ;;  %v8010_v23 = vpop.f32.mrb[164].mxu1  ;;  %6546 = vpow2.f32 %v5311_v3 }
 0x736   :  { %v6531_v36 = vpop.eup %6530  ;;  %v3395_v10 = vadd.f32 %v3205_v56, %v7633_v55  ;;  %v3207_v22 = vpop.f32.mrb[173].mxu0 }
 0x737   :  { %v8013_v12 = vpop.f32.mrb[165].mxu1  ;;  %6548 = vrcp.f32 %v3515_v16  ;;  %v3517_v54 = vadd.f32 1.0, %v6531_v36  ;;  %v3396_v26 = vadd.f32 %v3207_v22, %v7635_v20  ;;  %v3209_v27 = vpop.f32.mrb[174].mxu0  ;;  %v8033_v16 = vld [vmem:[%s8508_s8] ss:$0 sm:$0xff] }
 0x738   :  { %v8016_v29 = vpop.f32.mrb[166].mxu1  ;;  %v6533_v5 = vpop.eup %6532  ;;  %6550 = vpow2.f32 %v5313_v8  ;;  %v5314_v30 = vmul.f32 -1.442695, %v3395_v10  ;;  %v3397_v44 = vadd.f32 %v3209_v27, %v7633_v55  ;;  %v3607_v32 = vadd.f32 %v8033_v16, %v7997_v9 }
 0x739   :  { %v3211_v7 = vpop.f32.mrb[175].mxu0  ;;  %v8026_v21 = vpop.f32.mrb[167].mxu1  ;;  %6552 = vrcp.f32 %v3517_v54  ;;  %v5315_v1 = vmul.f32 -1.442695, %v3396_v26  ;;  %v3516_v10 = vadd.f32 1.0, %v6533_v5  ;;  %v3608_v22 = vadd.f32 %v8033_v16, %v8003_v37 }
 0x73a   :  { %v6535_v3 = vpop.eup %6534  ;;  %6554 = vrcp.f32 %v3514_v34  ;;  %v5316_v56 = vmul.f32 -1.442695, %v3397_v44  ;;  %v3398_v34 = vadd.f32 %v3211_v7, %v7635_v20 }
 0x73b   :  { %v6537_v53 = vpop.eup %6536  ;;  %v3639_v8 = vmul.f32 %v6535_v3, %v3623_v2  ;;  %6556 = vpow2.f32 %v5314_v30 }
 0x73c   :  { %v6539_v36 = vpop.eup %6538  ;;  %6558 = vpow2.f32 %v5315_v1  ;;  %v3518_v27 = vadd.f32 1.0, %v6537_v53  ;;  %v5317_v1 = vmul.f32 -1.442695, %v3398_v34 }
 0x73d   :  { %v3655_v48 = vadd.f32 %v3639_v8, %v3607_v32  ;;  %v3640_v54 = vmul.f32 %v6539_v36, %v3624_v45  ;;  %v6541_v26 = vpop.eup %6540  ;;  %6560 = vpow2.f32 %v5316_v56  ;;  %v3215_v17 = vpop.f32.mrb[176].mxu0  ;;  %v3625_v45 = vadd.f32 %v8021_v28, %v7945_v57 }
 0x73e   :  { %v8040_v11 = vpop.eup %6542  ;;  %v3519_v2 = vadd.f32 1.0, %v6541_v26  ;;  %v3399_v5 = vadd.f32 %v3215_v17, %v7633_v55  ;;  %v3217_v44 = vpop.f32.mrb[177].mxu0  ;;  %v3626_v36 = vadd.f32 %v8021_v28, %v7949_v50  ;;  %v3609_v17 = vadd.f32 %v8033_v16, %v7994_v47 }
 0x73f   :  { %6562 = vtanh.f32 %v3655_v48  ;;  %v3656_v9 = vadd.f32 %v3640_v54, %v3608_v22  ;;  %v6545_v3 = vpop.eup %6544  ;;  %v3219_v37 = vpop.f32.mrb[178].mxu0  ;;  %v8051_v57 = vadd.f32 %v8021_v28, %v7953_v25  ;;  %v3610_v48 = vadd.f32 %v8033_v16, %v8000_v46 }
 0x740   :  { %6564 = vrcp.f32 %v3516_v10  ;;  %v6547_v30 = vpop.eup %6546  ;;  %v3521_v7 = vadd.f32 1.0, %v6545_v3  ;;  %v3221_v53 = vpop.f32.mrb[179].mxu0  ;;  %v5318_v8 = vmul.f32 -1.442695, %v3399_v5  ;;  %v3400_v50 = vadd.f32 %v3217_v44, %v7635_v20 }
 0x741   :  { %6566 = vtanh.f32 %v3656_v9  ;;  %v6549_v32 = vpop.eup %6548  ;;  %v3520_v54 = vadd.f32 1.0, %v6547_v30  ;;  %v3627_v47 = vadd.f32 %v8021_v28, %v7955_v14  ;;  %v3401_v25 = vadd.f32 %v3219_v37, %v7633_v55 }
 0x742   :  { %6568 = vrcp.f32 %v3519_v2  ;;  %v6551_v56 = vpop.eup %6550  ;;  %v3641_v10 = vmul.f32 %v6549_v32, %v3625_v45  ;;  %v3628_v14 = vadd.f32 %v8021_v28, %v7959_v35  ;;  %v3402_v51 = vadd.f32 %v3221_v53, %v7635_v20 }
 0x743   :  { %6570 = vrcp.f32 %v3518_v27  ;;  %v6553_v22 = vpop.eup %6552  ;;  %v8060_v27 = vadd.f32 %v8021_v28, %v7957_v42  ;;  %v3522_v45 = vadd.f32 1.0, %v6551_v56  ;;  %v3687_v42 = vsub.f32 1.0, %v8040_v11 }
 0x744   :  { %6572 = vrcp.f32 %v3521_v7  ;;  %v6555_v34 = vpop.eup %6554  ;;  %v3657_v26 = vadd.f32 %v3641_v10, %v3609_v17  ;;  %v3642_v9 = vmul.f32 %v6553_v22, %v3626_v36  ;;  %v5319_v22 = vmul.f32 -1.442695, %v3400_v50 }
 0x745   :  { %6574 = vpow2.f32 %v5317_v1  ;;  %v6557_v2 = vpop.eup %6556  ;;  %v3225_v46 = vpop.f32.mrb[180].mxu0  ;;  %v3688_v10 = vsub.f32 1.0, %v6555_v34  ;;  %v5320_v35 = vmul.f32 -1.442695, %v3401_v25  ;;  %v3720_v50 = vmul.f32 %v6555_v34, %v7734_v13 }
 0x746   :  { %6576 = vpow2.f32 %v5318_v8  ;;  %v8063_v5 = vpop.f32.mrb[168].mxu1  ;;  %v6559_v3 = vpop.eup %6558  ;;  %v3658_v30 = vadd.f32 %v3642_v9, %v3610_v48  ;;  %v3523_v7 = vadd.f32 1.0, %v6557_v2  ;;  %v3403_v37 = vadd.f32 %v3225_v46, %v7633_v55 }
 0x747   :  { %6578 = vtanh.f32 %v3657_v26  ;;  %v3227_v44 = vpop.f32.mrb[181].mxu0  ;;  %v8065_v1 = vpop.f32.mrb[169].mxu1  ;;  %v3719_v46 = vmul.f32 %v8040_v11, %v7731_v31  ;;  %v3524_v4 = vadd.f32 1.0, %v6559_v3  ;;  %v5321_v31 = vmul.f32 -1.442695, %v3402_v51 }
 0x748   :  { %v6561_v32 = vpop.eup %6560  ;;  %6580 = vrcp.f32 %v3520_v54  ;;  %v3229_v8 = vpop.f32.mrb[182].mxu0  ;;  %v5322_v60 = vmul.f32 -1.442695, %v3403_v37  ;;  %v3404_v53 = vadd.f32 %v3227_v44, %v7635_v20  ;;  %v3612_v34 = vadd.f32 %v8033_v16, %v8026_v21 }
 0x749   :  { %v8071_v36 = vpop.f32.mrb[170].mxu1  ;;  %v6563_v17 = vpop.eup %6562  ;;  %6582 = vtanh.f32 %v3658_v30  ;;  %v3525_v56 = vadd.f32 1.0, %v6561_v32  ;;  %v3611_v30 = vadd.f32 %v8033_v16, %v8013_v12  ;;  %v3405_v11 = vadd.f32 %v3229_v8, %v7633_v55 }
 0x74a   :  { %v3231_v48 = vpop.f32.mrb[183].mxu0  ;;  %v8073_v26 = vpop.f32.mrb[171].mxu1  ;;  %v3703_v2 = vmul.f32 %v6563_v17, %v3687_v42  ;;  %6584 = vrcp.f32 %v3523_v7 }
 0x74b   :  { %v6565_v9 = vpop.eup %6564  ;;  %6586 = vrcp.f32 %v3522_v45 }
 0x74c   :  { %v6567_v54 = vpop.eup %6566  ;;  %6588 = vrcp.f32 %v3525_v56  ;;  %v8082_v25 = vadd.f32 %v3719_v46, %v3703_v2  ;;  %v5323_v2 = vmul.f32 -1.442695, %v3404_v53  ;;  %v3406_v53 = vadd.f32 %v3231_v48, %v7635_v20 }
 0x74d   :  { %v6569_v32 = vpop.eup %6568  ;;  %v3704_v40 = vmul.f32 %v6567_v54, %v3688_v10  ;;  %6590 = vpow2.f32 %v5319_v22  ;;  %v3235_v3 = vpop.f32.mrb[184].mxu0  ;;  %v3721_v54 = vmul.f32 %v6565_v9, %v7764_v38 }
 0x74e   :  { %v6571_v42 = vpop.eup %6570  ;;  %v3643_v7 = vmul.f32 %v6569_v32, %v3627_v47  ;;  %6592 = vpow2.f32 %v5320_v35  ;;  %v8089_v37 = vpop.f32.mrb[185].mxu0  ;;  %v3407_v10 = vadd.f32 %v3235_v3, %v7633_v55 }
 0x74f   :  { %v6573_v17 = vpop.eup %6572  ;;  %v8085_v12 = vadd.f32 %v3720_v50, %v3704_v40  ;;  %6594 = vrcp.f32 %v3524_v4  ;;  %v3239_v56 = vpop.f32.mrb[186].mxu0  ;;  %v3689_v40 = vsub.f32 1.0, %v6565_v9  ;;  %v3722_v50 = vmul.f32 %v6571_v42, %v7768_v41  ;;  %v7004_v41 = vld [vmem:[#allocation6 + $0x4c] ss:$28 sps:$4 sm:$0xff]  }
 0x750   :  { %v6575_v45 = vpop.eup %6574  ;;  %v3659_v13 = vadd.f32 %v3643_v7, %v3611_v30  ;;  %v3644_v47 = vmul.f32 %v6573_v17, %v3628_v14  ;;  %6596 = vpow2.f32 %v5322_v60  ;;  %v8096_v35 = vpop.f32.mrb[187].mxu0  ;;  %v5324_v14 = vmul.f32 -1.442695, %v3405_v11  ;;  %v7003_v11 = vld [vmem:[#allocation6 + $0x10] ss:$28 sps:$4 sm:$0xff]  }
 0x751   :  { %v6577_v44 = vpop.eup %6576  ;;  %v8094_v51 = vpack.c.bf16 %v8085_v12, %v8082_v25  ;;  %v3690_v60 = vsub.f32 1.0, %v6571_v42  ;;  %v3526_v30 = vadd.f32 1.0, %v6575_v45  ;;  %v5326_v17 = vmul.f32 -1.442695, %v3407_v10  ;;  %v7005_v42 = vld [vmem:[#allocation6 + $0x50] ss:$28 sps:$4 sm:$0xff]  }
 0x752   :  { %v6579_v8 = vpop.eup %6578  ;;  %6598 = vtanh.f32 %v3659_v13  ;;  %v3660_v4 = vadd.f32 %v3644_v47, %v3612_v34  ;;  %v3527_v22 = vadd.f32 1.0, %v6577_v44  ;;  %v3613_v9 = vadd.f32 %v8033_v16, %v8010_v23 }
 0x753   :  { %v8098_v21 = vpop.eup %6580  ;;  %6600 = vpow2.f32 %v5321_v31  ;;  %3792 = vmatmul.mubr.bf16.vlgmr.msra.gmra.mrb[176].mxu1 %v8094_v51  ;;  %3905 = vmatmul.mubr.bf16.vlgmr.msra.gmra.mrb[224].mxu0 %v8094_v51  ;;  %v3705_v32 = vmul.f32 %v6579_v8, %v3689_v40  ;;  %v3614_v23 = vadd.f32 %v8033_v16, %v8016_v29 }
 0x754   :  { %v6583_v46 = vpop.eup %6582  ;;  %6602 = vtanh.f32 %v3660_v4  ;;  %3801 = vmatprep.mubr.bf16.mxu1 %v8550_v61  ;;  %3914 = vmatprep.mubr.bf16.mxu0 %v8550_v61  ;;  %v5325_v4 = vmul.f32 -1.442695, %v3406_v53  ;;  %v3631_v53 = vadd.f32 %v8021_v28, %v7963_v24 }
 0x755   :  { %v6585_v7 = vpop.eup %6584  ;;  %6604 = vrcp.f32 %v3527_v22  ;;  %v3706_v31 = vmul.f32 %v6583_v46, %v3690_v60  ;;  %3986 = vmatpush1.bf16.msra.mxu1 %v7003_v11  ;;  %6002 = vmatpush3.bf16.msra.mxu0 %v7982_v39  ;;  %v8113_v45 = vadd.f32 %v3721_v54, %v3705_v32  ;;  %v3245_v13 = vpop.f32.mrb[188].mxu0  ;;  %v3409_v22 = vadd.f32 %v3239_v56, %v7633_v55  ;;  %v7006_v60 = vld [vmem:[#allocation6 + $0x48] ss:$28 sps:$4 sm:$0xff]  }
 0x756   :  { %v8108_v38 = vpop.eup %6586  ;;  %v3645_v3 = vmul.f32 %v6585_v7, %v8051_v57  ;;  %6606 = vpow2.f32 %v5323_v2  ;;  %3987 = vmatprep.subr.bf16.mxu1 %v7004_v41  ;;  %6003 = vmatprep.subr.bf16.mxu0 %v7005_v42  ;;  %v8115_v34 = vpop.f32.mrb[172].mxu1  ;;  %v3408_v46 = vadd.f32 %v8089_v37, %v7635_v20  ;;  %v7007_v56 = vld [vmem:[#allocation6 + $0x84] ss:$28 sps:$4 sm:$0xff]  }
 0x757   :  { %v6589_v48 = vpop.eup %6588  ;;  %6608 = vpow2.f32 %v5324_v14  ;;  %v8117_v39 = vadd.f32 %v3722_v50, %v3706_v31  ;;  %v8122_v10 = vpop.f32.mrb[189].mxu0  ;;  %v7008_v50 = vld [vmem:[#allocation6 + $0x88] ss:$28 sps:$4 sm:$0xff]   ;;  %v3411_v31 = vadd.f32 %v3245_v13, %v7633_v55  ;;  %v3692_v24 = vsub.f32 1.0, %v8108_v38 }
 0x758   :  { %v6591_v47 = vpop.eup %6590  ;;  %v3661_v44 = vadd.f32 %v3645_v3, %v3613_v9  ;;  %v3646_v57 = vmul.f32 %v6589_v48, %v8060_v27  ;;  %6610 = vrcp.f32 %v3526_v30  ;;  %v8124_v40 = vpop.f32.mrb[173].mxu1  ;;  %v3691_v3 = vsub.f32 1.0, %v8098_v21 }
 0x759   :  { %v6593_v8 = vpop.eup %6592  ;;  %6612 = vpow2.f32 %v5326_v17  ;;  %v8127_v2 = vpop.f32.mrb[190].mxu0  ;;  %3988 = vmatpush1.bf16.msra.mxu1 %v7006_v60  ;;  %6004 = vmatpush3.bf16.msra.mxu0 %v7005_v42  ;;  %v3615_v17 = vadd.f32 %v8033_v16, %v8065_v1  ;;  %v3528_v37 = vadd.f32 1.0, %v6591_v47  ;;  %v5328_v42 = vmul.f32 -1.442695, %v3409_v22 }
 0x75a   :  { %v8129_v14 = vpop.f32.mrb[174].mxu1  ;;  %v8131_v29 = vpop.eup %6594  ;;  %6614 = vtanh.f32 %v3661_v44  ;;  %v3662_v27 = vadd.f32 %v3646_v57, %v3614_v23  ;;  %v3529_v54 = vadd.f32 1.0, %v6593_v8  ;;  %3989 = vmatprep.subr.bf16.mxu1 %v7007_v56  ;;  %6005 = vmatprep.subr.bf16.mxu0 %v7008_v50  ;;  %v8147_v48 = vpack.c.bf16 %v8117_v39, %v8113_v45  ;;  %v7009_v44 = vld [vmem:[#allocation6 + $0x80] ss:$28 sps:$4 sm:$0xff]  }
 0x75b   :  { %v8135_v30 = vpop.f32.mrb[191].mxu0  ;;  %v8137_v32 = vpop.f32.mrb[175].mxu1  ;;  %v5327_v13 = vmul.f32 -1.442695, %v3408_v46  ;;  %v3723_v47 = vmul.f32 %v8098_v21, %v7813_v49  ;;  %v7010_v57 = vld [vmem:[#allocation6 + $0xbc] ss:$28 sps:$4 sm:$0xff]   ;;  %v3410_v49 = vadd.f32 %v8096_v35, %v7635_v20 }
 0x75c   :  { %v6597_v7 = vpop.eup %6596  ;;  %6616 = vtanh.f32 %v3662_v27  ;;  %v7011_v8 = vld [vmem:[#allocation6 + $0xc0] ss:$28 sps:$4 sm:$0xff]   ;;  %v5330_v60 = vmul.f32 -1.442695, %v3411_v31  ;;  %3802 = vmatmul.mubr.bf16.gmra.mrb[180].mxu1 %v8147_v48  ;;  %3915 = vmatmul.mubr.bf16.gmra.mrb[228].mxu0 %v8147_v48 }
 0x75d   :  { %v6599_v11 = vpop.eup %6598  ;;  %v3531_v9 = vadd.f32 1.0, %v6597_v7  ;;  %6618 = vrcp.f32 %v3529_v54  ;;  %3990 = vmatpush1.bf16.msra.mxu1 %v7009_v44  ;;  %6006 = vmatpush3.bf16.msra.mxu0 %v7008_v50  ;;  %v3412_v7 = vadd.f32 %v8122_v10, %v7635_v20  ;;  %v5329_v44 = vmul.f32 -1.442695, %v3410_v49 }
 0x75e   :  { %v6601_v41 = vpop.eup %6600  ;;  %6620 = vpow2.f32 %v5325_v4  ;;  %v3707_v23 = vmul.f32 %v6599_v11, %v3691_v3  ;;  %3991 = vmatprep.subr.bf16.mxu1 %v7010_v57  ;;  %6007 = vmatprep.subr.bf16.mxu0 %v7011_v8  ;;  %v3724_v4 = vmul.f32 %v8108_v38, %v7817_v62  ;;  %v7012_v62 = vld [vmem:[#allocation6 + $0xb8] ss:$28 sps:$4 sm:$0xff]   ;;  %v3413_v11 = vadd.f32 %v8127_v2, %v7633_v55 }
 0x75f   :  { %v6603_v1 = vpop.eup %6602  ;;  %6622 = vrcp.f32 %v3531_v9  ;;  %3811 = vmatprep.mubr.bf16.mxu1 %v8550_v61  ;;  %3924 = vmatprep.mubr.bf16.mxu0 %v8550_v61  ;;  %v3530_v50 = vadd.f32 1.0, %v6601_v41  ;;  %v7014_v9 = vld [vmem:[#allocation6 + $0xf8] ss:$28 sps:$4 sm:$0xff]   ;;  %v3693_v41 = vsub.f32 1.0, %v8131_v29  ;;  %v3632_v57 = vadd.f32 %v8021_v28, %v7967_v19 }
 0x760   :  { %v6605_v22 = vpop.eup %6604  ;;  %v3708_v27 = vmul.f32 %v6603_v1, %v3692_v24  ;;  %6624 = vrcp.f32 %v3528_v37  ;;  %v8160_v21 = vadd.f32 %v3723_v47, %v3707_v23  ;;  %v7013_v37 = vld [vmem:[#allocation6 + $0xf4] ss:$28 sps:$4 sm:$0xff]   ;;  %v3633_v19 = vadd.f32 %v8021_v28, %v7961_v0 }
 0x761   :  { %v6607_v54 = vpop.eup %6606  ;;  %v3647_v46 = vmul.f32 %v6605_v22, %v3631_v53  ;;  %6626 = vpow2.f32 %v5328_v42  ;;  %3992 = vmatpush1.bf16.msra.mxu1 %v7012_v62  ;;  %6008 = vmatpush3.bf16.msra.mxu0 %v7011_v8  ;;  %v7015_v23 = vld [vmem:[#allocation6 + $0xf0] ss:$28 sps:$4 sm:$0xff]   ;;  %v5331_v8 = vmul.f32 -1.442695, %v3412_v7  ;;  %v5332_v22 = vmul.f32 -1.442695, %v3413_v11 }
 0x762   :  { %v6609_v56 = vpop.eup %6608  ;;  %v8164_v31 = vadd.f32 %v3724_v4, %v3708_v27  ;;  %6628 = vpow2.f32 %v5327_v13  ;;  %3993 = vmatprep.subr.bf16.mxu1 %v7013_v37  ;;  %6009 = vmatprep.subr.bf16.mxu0 %v7014_v9  ;;  %v3532_v24 = vadd.f32 1.0, %v6607_v54  ;;  %v3725_v13 = vmul.f32 %v8131_v29, %v7835_v52  ;;  %v7017_v27 = vld [vmem:[#allocation6 + $0x130] ss:$28 sps:$4 sm:$0xff]   ;;  %v7018_v62 = vld [vmem:[#allocation6 + $0x128] ss:$28 sps:$4 sm:$0xff]  }
 0x763   :  { %v6611_v38 = vpop.eup %6610  ;;  %v3663_v53 = vadd.f32 %v3647_v46, %v3615_v17  ;;  %v3533_v35 = vadd.f32 1.0, %v6609_v56  ;;  %6630 = vpow2.f32 %v5330_v60  ;;  %v7016_v60 = vld [vmem:[#allocation6 + $0x12c] ss:$28 sps:$4 sm:$0xff]   ;;  %v3616_v49 = vadd.f32 %v8033_v16, %v8073_v26 }
 0x764   :  { %v6613_v3 = vpop.eup %6612  ;;  %v8170_v10 = vpack.c.bf16 %v8164_v31, %v8160_v21  ;;  %v3694_v1 = vsub.f32 1.0, %v6611_v38  ;;  %v3726_v29 = vmul.f32 %v6611_v38, %v7845_v43  ;;  %v3617_v7 = vadd.f32 %v8033_v16, %v8063_v5  ;;  %v7020_v11 = vld [vmem:[#allocation6 + $0x168] ss:$28 sps:$4 sm:$0xff]  }
 0x765   :  { %v6615_v42 = vpop.eup %6614  ;;  %6632 = vtanh.f32 %v3663_v53  ;;  %v3535_v17 = vadd.f32 1.0, %v6613_v3  ;;  %3994 = vmatpush1.bf16.msra.mxu1 %v7015_v23  ;;  %6010 = vmatpush3.bf16.msra.mxu0 %v7014_v9  ;;  %v3414_v26 = vadd.f32 %v8135_v30, %v7635_v20  ;;  %v7022_v23 = vld [vmem:[#allocation6 + $0x19c] ss:$28 sps:$4 sm:$0xff]  }
 0x766   :  { %6634 = vrcp.f32 %v3533_v35  ;;  %v3709_v2 = vmul.f32 %v6615_v42, %v3693_v41  ;;  %v6617_v47 = vpop.eup %6616  ;;  %3995 = vmatprep.subr.bf16.mxu1 %v7016_v60  ;;  %6011 = vmatprep.subr.bf16.mxu0 %v7017_v27  ;;  %v7019_v35 = vld [vmem:[#allocation6 + $0x164] ss:$28 sps:$4 sm:$0xff]  }
 0x767   :  { %6636 = vrcp.f32 %v3530_v50  ;;  %v6619_v4 = vpop.eup %6618  ;;  %3812 = vmatmul.mubr.bf16.gmra.mrb[184].mxu1 %v8170_v10  ;;  %3925 = vmatmul.mubr.bf16.gmra.mrb[232].mxu0 %v8170_v10  ;;  %v3710_v52 = vmul.f32 %v6617_v47, %v3694_v1  ;;  %v3634_v1 = vadd.f32 %v8021_v28, %v7965_v15  ;;  %v7023_v47 = vld [vmem:[#allocation6 + $0x1a0] ss:$28 sps:$4 sm:$0xff]   ;;  %v3635_v15 = vadd.f32 %v8021_v28, %v7971_v59 }
 0x768   :  { %6638 = vrcp.f32 %v3535_v17  ;;  %v8180_v54 = vadd.f32 %v3725_v13, %v3709_v2  ;;  %v6621_v46 = vpop.eup %6620  ;;  %v3648_v56 = vmul.f32 %v6619_v4, %v3632_v57  ;;  %3821 = vmatprep.mubr.bf16.mxu1 %v8550_v61  ;;  %3934 = vmatprep.mubr.bf16.mxu0 %v8550_v61  ;;  %v5333_v13 = vmul.f32 -1.442695, %v3414_v26 }
 0x769   :  { %6640 = vrcp.f32 %v3532_v24  ;;  %v6623_v50 = vpop.eup %6622  ;;  %v8190_v43 = vadd.f32 %v3726_v29, %v3710_v52  ;;  %3996 = vmatpush1.bf16.msra.mxu1 %v7018_v62  ;;  %6012 = vmatpush3.bf16.msra.mxu0 %v7017_v27  ;;  %v3534_v41 = vadd.f32 1.0, %v6621_v46  ;;  %v3618_v4 = vadd.f32 %v8033_v16, %v8071_v36 }
 0x76a   :  { %6642 = vpow2.f32 %v5329_v44  ;;  %v6625_v0 = vpop.eup %6624  ;;  %v3649_v38 = vmul.f32 %v6623_v50, %v3633_v19  ;;  %v3664_v53 = vadd.f32 %v3648_v56, %v3616_v49  ;;  %3997 = vmatprep.subr.bf16.mxu1 %v7019_v35  ;;  %6013 = vmatprep.subr.bf16.mxu0 %v7020_v11  ;;  %v7021_v44 = vld [vmem:[#allocation6 + $0x160] ss:$28 sps:$4 sm:$0xff]   ;;  %v7024_v19 = vld [vmem:[#allocation6 + $0x198] ss:$28 sps:$4 sm:$0xff]   ;;  %v3619_v59 = vadd.f32 %v8033_v16, %v8124_v40 }
 0x76b   :  { %6644 = vpow2.f32 %v5332_v22  ;;  %v6627_v37 = vpop.eup %6626  ;;  %v8196_v5 = vpack.c.bf16 %v8190_v43, %v8180_v54  ;;  %v3695_v17 = vsub.f32 1.0, %v6625_v0  ;;  %v3727_v60 = vmul.f32 %v6625_v0, %v7865_v18 }
 0x76c   :  { %6646 = vpow2.f32 %v5331_v8  ;;  %v6629_v9 = vpop.eup %6628  ;;  %v3665_v3 = vadd.f32 %v3649_v38, %v3617_v7  ;;  %v3537_v42 = vadd.f32 1.0, %v6627_v37  ;;  %v3636_v40 = vadd.f32 %v8021_v28, %v7975_v6 }
 0x76d   :  { %6648 = vtanh.f32 %v3664_v53  ;;  %v6631_v24 = vpop.eup %6630  ;;  %3998 = vmatpush1.bf16.msra.mxu1 %v7021_v44  ;;  %6014 = vmatpush3.bf16.msra.mxu0 %v7020_v11  ;;  %v3536_v8 = vadd.f32 1.0, %v6629_v9 }
 0x76e   :  { %6650 = vtanh.f32 %v3665_v3  ;;  %v3539_v2 = vadd.f32 1.0, %v6631_v24  ;;  %3999 = vmatprep.subr.bf16.mxu1 %v7022_v23  ;;  %6015 = vmatprep.subr.bf16.mxu0 %v7023_v47 }
 0x76f   :  { %v6633_v30 = vpop.eup %6632  ;;  %6652 = vrcp.f32 %v3537_v42  ;;  %3822 = vmatmul.mubr.bf16.gmra.mrb[188].mxu1 %v8196_v5  ;;  %3935 = vmatmul.mubr.bf16.gmra.mrb[236].mxu0 %v8196_v5 }
 0x770   :  { %v6635_v57 = vpop.eup %6634  ;;  %v3711_v22 = vmul.f32 %v6633_v30, %v3695_v17  ;;  %6654 = vrcp.f32 %v3534_v41  ;;  %3831 = vmatprep.mubr.bf16.mxu1 %v8550_v61  ;;  %3944 = vmatprep.mubr.bf16.mxu0 %v8550_v61  ;;  %v3637_v30 = vadd.f32 %v8021_v28, %v7969_v58 }
 0x771   :  { %v6637_v27 = vpop.eup %6636  ;;  %v3650_v52 = vmul.f32 %v6635_v57, %v3634_v1  ;;  %6656 = vrcp.f32 %v3539_v2  ;;  %4000 = vmatpush1.bf16.msra.mxu1 %v7024_v19  ;;  %6016 = vmatpush3.bf16.msra.mxu0 %v7023_v47 }
 0x772   :  { %v6639_v29 = vpop.eup %6638  ;;  %v8209_v46 = vadd.f32 %v3727_v60, %v3711_v22  ;;  %6658 = vpow2.f32 %v5333_v13  ;;  %v3696_v38 = vsub.f32 1.0, %v6637_v27  ;;  %v3728_v11 = vmul.f32 %v6637_v27, %v7873_v63 }
 0x773   :  { %v6641_v18 = vpop.eup %6640  ;;  %v3666_v49 = vadd.f32 %v3650_v52, %v3618_v4  ;;  %v3651_v56 = vmul.f32 %v6639_v29, %v3635_v15  ;;  %6660 = vrcp.f32 %v3536_v8  ;;  %v3620_v63 = vadd.f32 %v8033_v16, %v8137_v32  ;;  %v8580_v15 = vld [vmem:[#allocation21_spill] sm:$0xff]  ;;  %v8581_v29 = vld [vmem:[#allocation19_spill] sm:$0xff] }
 0x774   :  { %v6643_v36 = vpop.eup %6642  ;;  %v3697_v37 = vsub.f32 1.0, %v6641_v18  ;;  %v3729_v17 = vmul.f32 %v6641_v18, %v7885_v33  ;;  %v3621_v33 = vadd.f32 %v8033_v16, %v8115_v34  ;;  %v3638_v19 = vadd.f32 %v8021_v28, %v8581_v29 }
 0x775   :  { %v6645_v50 = vpop.eup %6644  ;;  %6662 = vtanh.f32 %v3666_v49  ;;  %v3667_v7 = vadd.f32 %v3651_v56, %v3619_v59  ;;  %v3538_v26 = vadd.f32 1.0, %v6643_v36  ;;  %v8582_v56 = vld [vmem:[#allocation16_spill] sm:$0xff] }
 0x776   :  { %v6647_v62 = vpop.eup %6646  ;;  %v3541_v0 = vadd.f32 1.0, %v6645_v50  ;;  %v3622_v50 = vadd.f32 %v8033_v16, %v8129_v14  ;;  %v8584_v14 = vld [vmem:[#allocation22_spill] sm:$0xff] }
 0x777   :  { %v6649_v53 = vpop.eup %6648  ;;  %6664 = vtanh.f32 %v3667_v7  ;;  %v3540_v3 = vadd.f32 1.0, %v6647_v62 }
 0x778   :  { %v3712_v35 = vmul.f32 %v6649_v53, %v3696_v38  ;;  %v6651_v9 = vpop.eup %6650  ;;  %6666 = vrcp.f32 %v3541_v0 }
 0x779   :  { %v6653_v41 = vpop.eup %6652  ;;  %v3713_v24 = vmul.f32 %v6651_v9, %v3697_v37  ;;  %6668 = vrcp.f32 %v3538_v26 }
 0x77a   :  { %v8216_v42 = vadd.f32 %v3728_v11, %v3712_v35  ;;  %v6655_v44 = vpop.eup %6654  ;;  %v3652_v1 = vmul.f32 %v6653_v41, %v3636_v40  ;;  %6670 = vrcp.f32 %v3540_v3  ;;  %v8586_v41 = vld [vmem:[#allocation17_spill] sm:$0xff] }
 0x77b   :  { %v6657_v2 = vpop.eup %6656  ;;  %v8227_v13 = vadd.f32 %v3729_v17, %v3713_v24  ;;  %v3698_v32 = vsub.f32 1.0, %v6655_v44  ;;  %v3730_v34 = vmul.f32 %v6655_v44, %v8580_v15 }
 0x77c   :  { %v8225_v6 = vpack.c.bf16 %v8216_v42, %v8209_v46  ;;  %v6659_v23 = vpop.eup %6658  ;;  %v3653_v47 = vmul.f32 %v6657_v2, %v3637_v30  ;;  %v3668_v57 = vadd.f32 %v3652_v1, %v3620_v63 }
 0x77d   :  { %v6661_v58 = vpop.eup %6660  ;;  %v3542_v60 = vadd.f32 1.0, %v6659_v23  ;;  %v8588_v23 = vld [vmem:[#allocation18_spill] sm:$0xff] }
 0x77e   :  { %3832 = vmatmul.mubr.bf16.gmra.mrb[192].mxu1 %v8225_v6  ;;  %3945 = vmatmul.mubr.bf16.gmra.mrb[240].mxu0 %v8225_v6  ;;  %v3669_v22 = vadd.f32 %v3653_v47, %v3621_v33  ;;  %6672 = vtanh.f32 %v3668_v57  ;;  %v3699_v4 = vsub.f32 1.0, %v6661_v58  ;;  %v3731_v36 = vmul.f32 %v6661_v58, %v8582_v56 }
 0x77f   :  { %v6663_v8 = vpop.eup %6662  ;;  %3841 = vmatprep.mubr.bf16.mxu1 %v8550_v61  ;;  %3954 = vmatprep.mubr.bf16.mxu0 %v8550_v61 }
 0x780   :  { %v3714_v27 = vmul.f32 %v6663_v8, %v3698_v32  ;;  %6674 = vtanh.f32 %v3669_v22 }
 0x781   :  { %v6665_v52 = vpop.eup %6664  ;;  %6676 = vrcp.f32 %v3542_v60 }
 0x782   :  { %v8238_v18 = vadd.f32 %v3730_v34, %v3714_v27  ;;  %v6667_v49 = vpop.eup %6666  ;;  %v3715_v59 = vmul.f32 %v6665_v52, %v3699_v4 }
 0x783   :  { %v3654_v7 = vmul.f32 %v6667_v49, %v3638_v19  ;;  %v6669_v0 = vpop.eup %6668 }
 0x784   :  { %v3756_v62 = vpack.c.bf16 %v8238_v18, %v8227_v13  ;;  %v8245_v38 = vadd.f32 %v3731_v36, %v3715_v59  ;;  %v6671_v28 = vpop.eup %6670  ;;  %v3700_v26 = vsub.f32 1.0, %v6669_v0  ;;  %v3732_v11 = vmul.f32 %v6669_v0, %v8584_v14 }
 0x785   :  { %v3670_v53 = vadd.f32 %v3654_v7, %v3622_v50  ;;  %v3701_v37 = vsub.f32 1.0, %v6671_v28  ;;  %v3733_v24 = vmul.f32 %v6671_v28, %v8586_v41 }
 0x786   :  { %8583 = vst [vmem:[#allocation20_spill] sm:$0xff] %v8245_v38  ;;  %3842 = vmatmul.mubr.bf16.gmra.mrb[196].mxu1 %v3756_v62  ;;  %3955 = vmatmul.mubr.bf16.gmra.mrb[244].mxu0 %v3756_v62 }
 0x787   :  { %3851 = vmatprep.mubr.bf16.mxu1 %v8550_v61  ;;  %3964 = vmatprep.mubr.bf16.mxu0 %v8550_v61  ;;  %6678 = vtanh.f32 %v3670_v53 }
 0x788   :  { %v6673_v35 = vpop.eup %6672 }
 0x789   :  { %v3716_v16 = vmul.f32 %v6673_v35, %v3700_v26 }
 0x78a   :  { %v6675_v9 = vpop.eup %6674 }
 0x78b   :  { %v8250_v40 = vadd.f32 %v3732_v11, %v3716_v16  ;;  %v3717_v3 = vmul.f32 %v6675_v9, %v3701_v37  ;;  %v6677_v17 = vpop.eup %6676 }
 0x78c   :  { %v3702_v63 = vsub.f32 1.0, %v6677_v17  ;;  %v3734_v33 = vmul.f32 %v6677_v17, %v8588_v23 }
 0x78d   :  { %8585 = vst [vmem:[#allocation21_spill] sm:$0xff] %v8250_v40  ;;  %v3757_v44 = vpack.c.bf16 %v8250_v40, %v8245_v38  ;;  %v8255_v30 = vadd.f32 %v3733_v24, %v3717_v3 }
 0x78f   :  { %8587 = vst [vmem:[#allocation19_spill] sm:$0xff] %v8255_v30  ;;  %3852 = vmatmul.mubr.bf16.gmra.mrb[200].mxu1 %v3757_v44  ;;  %3965 = vmatmul.mubr.bf16.gmra.mrb[248].mxu0 %v3757_v44 }
 0x790   :  { %3861 = vmatprep.mubr.bf16.mxu1 %v8550_v61  ;;  %3974 = vmatprep.mubr.bf16.mxu0 %v8550_v61 }
 0x791   :  { %v6679_v1 = vpop.eup %6678 }
 0x792   :  { %v3718_v2 = vmul.f32 %v6679_v1, %v3702_v63 }
 0x794   :  { %v8260_v47 = vadd.f32 %v3734_v33, %v3718_v2 }
 0x796   :  { %8589 = vst [vmem:[#allocation16_spill] sm:$0xff] %v8260_v47  ;;  %v3758_v57 = vpack.c.bf16 %v8260_v47, %v8255_v30 }
 0x798   :  { %3862 = vmatmul.mubr.bf16.gmra.mrb[204].mxu1 %v3758_v57  ;;  %3975 = vmatmul.mubr.bf16.gmra.mrb[252].mxu0 %v3758_v57 }
 0x799   :  { %6017 = vmatprep.mubr.bf16.mxu0 %v8094_v51  ;;  %4017 = vmatprep.mubr.bf16.mxu1 %v8550_v61 }
 0x7a0   :  { %4018 = vmatmul.mubr.bf16.vlgmr.msra.gmra.mrb[208].mxu1 %v8094_v51  ;;  %6018 = vmatmul.mubr.bf16.vlgmr.msra.gmra.mrb[0].mxu0 %v8147_v48  ;;  %v7025_v51 = vld [vmem:[#allocation3 + $0x4] ss:$16 sps:$4 sm:$0xff]  }
 0x7a1   :  { %6021 = vmatprep.mubr.bf16.mxu0 %v8170_v10  ;;  %4027 = vmatprep.mubr.bf16.mxu1 %v8550_v61 }
 0x7a8   :  { %4028 = vmatmul.mubr.bf16.gmra.mrb[212].mxu1 %v8147_v48  ;;  %6022 = vmatmul.mubr.bf16.gmra.mrb[4].mxu0 %v8196_v5  ;;  %v7026_v48 = vld [vmem:[#allocation3 + $0xc] ss:$16 sps:$4 sm:$0xff]  }
 0x7a9   :  { %6025 = vmatprep.mubr.bf16.mxu0 %v8225_v6  ;;  %4037 = vmatprep.mubr.bf16.mxu1 %v8550_v61 }
 0x7b0   :  { %4038 = vmatmul.mubr.bf16.gmra.mrb[216].mxu1 %v8170_v10  ;;  %6026 = vmatmul.mubr.bf16.gmra.mrb[8].mxu0 %v3756_v62 }
 0x7b1   :  { %6029 = vmatprep.mubr.bf16.mxu0 %v3757_v44  ;;  %4047 = vmatprep.mubr.bf16.mxu1 %v8550_v61 }
 0x7b8   :  { %4048 = vmatmul.mubr.bf16.gmra.mrb[220].mxu1 %v8196_v5  ;;  %6030 = vmatmul.mubr.bf16.gmra.mrb[12].mxu0 %v3758_v57 }
 0x7b9   :  { %4057 = vmatprep.mubr.bf16.mxu1 %v8550_v61  ;;  %4323 = vmatprep.mubr.bf16.mxu0 %v7025_v51 }
 0x7c0   :  { %4058 = vmatmul.mubr.bf16.gmra.mrb[224].mxu1 %v8225_v6 }
 0x7c1   :  { %4067 = vmatprep.mubr.bf16.mxu1 %v8550_v61 }
 0x7c8   :  { %4068 = vmatmul.mubr.bf16.gmra.mrb[228].mxu1 %v3756_v62 }
 0x7c9   :  { %4077 = vmatprep.mubr.bf16.mxu1 %v8550_v61 }
 0x7d0   :  { %4078 = vmatmul.mubr.bf16.gmra.mrb[232].mxu1 %v3757_v44 }
 0x7d1   :  { %4087 = vmatprep.mubr.bf16.mxu1 %v8550_v61 }
 0x7d8   :  { %4088 = vmatmul.mubr.bf16.gmra.mrb[236].mxu1 %v3758_v57 }
 0x7d9   :  { %4420 = vmatprep.mubr.bf16.mxu1 %v7026_v48 }
 0x826   :  { %v3793_v10 = vpop.f32.mrb[176].mxu1  ;;  %v3906_v5 = vpop.f32.mrb[224].mxu0 }
 0x827   :  { %v3795_v58 = vpop.f32.mrb[177].mxu1  ;;  %v3908_v32 = vpop.f32.mrb[225].mxu0 }
 0x828   :  { %v3797_v8 = vpop.f32.mrb[178].mxu1  ;;  %v3910_v22 = vpop.f32.mrb[226].mxu0 }
 0x829   :  { %v4195_v60 = vpack.c.bf16 %v3797_v8, %v3793_v10  ;;  %v4197_v27 = vpack.c.bf16 %v3910_v22, %v3906_v5  ;;  %v3799_v6 = vpop.f32.mrb[179].mxu1  ;;  %v3912_v15 = vpop.f32.mrb[227].mxu0 }
 0x82a   :  { %v4196_v34 = vpack.c.bf16 %v3799_v6, %v3795_v58  ;;  %v4198_v4 = vpack.c.bf16 %v3912_v15, %v3908_v32 }
 0x82c   :  { %5711 = vmatprep.subr.bf16.mxu0 %v4196_v34  ;;  %5775 = vmatprep.subr.bf16.mxu1 %v4198_v4 }
 0x82d   :  { %5712 = vmatpush3.bf16.msra.mxu0 %v4195_v60  ;;  %5776 = vmatpush3.bf16.msra.mxu1 %v4197_v27 }
 0x82f   :  { %v3803_v52 = vpop.f32.mrb[180].mxu1  ;;  %v3916_v29 = vpop.f32.mrb[228].mxu0 }
 0x830   :  { %v3805_v19 = vpop.f32.mrb[181].mxu1  ;;  %v3918_v49 = vpop.f32.mrb[229].mxu0 }
 0x831   :  { %v3807_v59 = vpop.f32.mrb[182].mxu1  ;;  %v3920_v56 = vpop.f32.mrb[230].mxu0 }
 0x832   :  { %v4199_v36 = vpack.c.bf16 %v3807_v59, %v3803_v52  ;;  %v4201_v50 = vpack.c.bf16 %v3920_v56, %v3916_v29  ;;  %v3809_v7 = vpop.f32.mrb[183].mxu1  ;;  %v3922_v62 = vpop.f32.mrb[231].mxu0 }
 0x833   :  { %v4200_v0 = vpack.c.bf16 %v3809_v7, %v3805_v19  ;;  %v4202_v53 = vpack.c.bf16 %v3922_v62, %v3918_v49 }
 0x835   :  { %5713 = vmatprep.subr.bf16.mxu0 %v4200_v0  ;;  %5777 = vmatprep.subr.bf16.mxu1 %v4202_v53 }
 0x836   :  { %5714 = vmatpush3.bf16.msra.mxu0 %v4199_v36  ;;  %5778 = vmatpush3.bf16.msra.mxu1 %v4201_v50 }
 0x83a   :  { %v3813_v28 = vpop.f32.mrb[184].mxu1  ;;  %v3926_v26 = vpop.f32.mrb[232].mxu0 }
 0x83b   :  { %v3815_v35 = vpop.f32.mrb[185].mxu1  ;;  %v3928_v16 = vpop.f32.mrb[233].mxu0 }
 0x83c   :  { %v3817_v14 = vpop.f32.mrb[186].mxu1  ;;  %v3930_v11 = vpop.f32.mrb[234].mxu0 }
 0x83d   :  { %v4203_v37 = vpack.c.bf16 %v3817_v14, %v3813_v28  ;;  %v4205_v9 = vpack.c.bf16 %v3930_v11, %v3926_v26  ;;  %v3819_v3 = vpop.f32.mrb[187].mxu1  ;;  %v3932_v41 = vpop.f32.mrb[235].mxu0 }
 0x83e   :  { %v4204_v24 = vpack.c.bf16 %v3819_v3, %v3815_v35  ;;  %v4206_v17 = vpack.c.bf16 %v3932_v41, %v3928_v16 }
 0x840   :  { %5715 = vmatprep.subr.bf16.mxu0 %v4204_v24  ;;  %5779 = vmatprep.subr.bf16.mxu1 %v4206_v17 }
 0x841   :  { %5716 = vmatpush3.bf16.msra.mxu0 %v4203_v37  ;;  %5780 = vmatpush3.bf16.msra.mxu1 %v4205_v9 }
 0x842   :  { %v3823_v44 = vpop.f32.mrb[188].mxu1  ;;  %v3936_v63 = vpop.f32.mrb[236].mxu0 }
 0x843   :  { %v3825_v1 = vpop.f32.mrb[189].mxu1  ;;  %v3938_v2 = vpop.f32.mrb[237].mxu0 }
 0x844   :  { %v3827_v23 = vpop.f32.mrb[190].mxu1  ;;  %v3940_v33 = vpop.f32.mrb[238].mxu0 }
 0x845   :  { %v4207_v57 = vpack.c.bf16 %v3827_v23, %v3823_v44  ;;  %v4209_v51 = vpack.c.bf16 %v3940_v33, %v3936_v63  ;;  %v3829_v48 = vpop.f32.mrb[191].mxu1  ;;  %v3942_v10 = vpop.f32.mrb[239].mxu0 }
 0x846   :  { %v4208_v5 = vpack.c.bf16 %v3829_v48, %v3825_v1  ;;  %v4210_v58 = vpack.c.bf16 %v3942_v10, %v3938_v2 }
 0x848   :  { %5717 = vmatprep.subr.bf16.mxu0 %v4208_v5  ;;  %5781 = vmatprep.subr.bf16.mxu1 %v4210_v58 }
 0x849   :  { %5718 = vmatpush3.bf16.msra.mxu0 %v4207_v57  ;;  %5782 = vmatpush3.bf16.msra.mxu1 %v4209_v51 }
 0x851   :  { %v3833_v32 = vpop.f32.mrb[192].mxu1  ;;  %v3946_v8 = vpop.f32.mrb[240].mxu0 }
 0x852   :  { %v3835_v22 = vpop.f32.mrb[193].mxu1  ;;  %v3948_v60 = vpop.f32.mrb[241].mxu0 }
 0x853   :  { %v3837_v27 = vpop.f32.mrb[194].mxu1  ;;  %v3950_v6 = vpop.f32.mrb[242].mxu0 }
 0x854   :  { %v4211_v15 = vpack.c.bf16 %v3837_v27, %v3833_v32  ;;  %v4213_v34 = vpack.c.bf16 %v3950_v6, %v3946_v8  ;;  %v3839_v4 = vpop.f32.mrb[195].mxu1  ;;  %v3952_v52 = vpop.f32.mrb[243].mxu0  ;;  %v7027_v27 = vld [vmem:[#allocation9 + $0x4] ss:$12 sps:$4 sm:$0xff]   ;;  %v7028_v6 = vld [vmem:[#allocation9 + $0x8] ss:$12 sps:$4 sm:$0xff]  }
 0x855   :  { %v4212_v29 = vpack.c.bf16 %v3839_v4, %v3835_v22  ;;  %v4214_v19 = vpack.c.bf16 %v3952_v52, %v3948_v60  ;;  %v7029_v4 = vld [vmem:[#allocation3] ss:$16 sps:$4 sm:$0xff]   ;;  %v7030_v52 = vld [vmem:[#allocation3 + $0x8] ss:$16 sps:$4 sm:$0xff]  }
 0x857   :  { %5719 = vmatprep.subr.bf16.mxu0 %v4212_v29  ;;  %5783 = vmatprep.subr.bf16.mxu1 %v4214_v19  ;;  %v7031_v19 = vld [vmem:[#allocation3 + $0x24] ss:$16 sps:$4 sm:$0xff]  }
 0x858   :  { %5720 = vmatpush3.bf16.msra.mxu0 %v4211_v15  ;;  %5784 = vmatpush3.bf16.msra.mxu1 %v4213_v34 }
 0x859   :  { %v3843_v49 = vpop.f32.mrb[196].mxu1  ;;  %v3956_v59 = vpop.f32.mrb[244].mxu0 }
 0x85a   :  { %v3845_v56 = vpop.f32.mrb[197].mxu1  ;;  %v3958_v36 = vpop.f32.mrb[245].mxu0 }
 0x85b   :  { %v3847_v50 = vpop.f32.mrb[198].mxu1  ;;  %v3960_v7 = vpop.f32.mrb[246].mxu0 }
 0x85c   :  { %v4215_v62 = vpack.c.bf16 %v3847_v50, %v3843_v49  ;;  %v4217_v0 = vpack.c.bf16 %v3960_v7, %v3956_v59  ;;  %v3849_v53 = vpop.f32.mrb[199].mxu1  ;;  %v3962_v28 = vpop.f32.mrb[247].mxu0  ;;  %v7032_v49 = vld [vmem:[#allocation3 + $0x2c] ss:$16 sps:$4 sm:$0xff]   ;;  %v7036_v7 = vld [vmem:[#allocation9 + $0x18] ss:$12 sps:$4 sm:$0xff]  }
 0x85d   :  { %v4216_v26 = vpack.c.bf16 %v3849_v53, %v3845_v56  ;;  %v4218_v35 = vpack.c.bf16 %v3962_v28, %v3958_v36  ;;  %v7033_v59 = vld [vmem:[#allocation9] ss:$12 sps:$4 sm:$0xff]   ;;  %v7034_v56 = vld [vmem:[#allocation9 + $0x1c] ss:$12 sps:$4 sm:$0xff]   ;;  %v7038_v53 = vld [vmem:[#allocation9 + $0x38] ss:$12 sps:$4 sm:$0xff]  }
 0x85e   :  { %v7035_v36 = vld [vmem:[#allocation9 + $0x20] ss:$12 sps:$4 sm:$0xff]  }
 0x85f   :  { %5721 = vmatprep.subr.bf16.mxu0 %v4216_v26  ;;  %5785 = vmatprep.subr.bf16.mxu1 %v4218_v35  ;;  %v7039_v26 = vld [vmem:[#allocation3 + $0x20] ss:$16 sps:$4 sm:$0xff]   ;;  %v7040_v35 = vld [vmem:[#allocation3 + $0x28] ss:$16 sps:$4 sm:$0xff]  }
 0x860   :  { %5722 = vmatpush3.bf16.msra.mxu0 %v4215_v62  ;;  %5786 = vmatpush3.bf16.msra.mxu1 %v4217_v0  ;;  %v7037_v0 = vld [vmem:[#allocation9 + $0x34] ss:$12 sps:$4 sm:$0xff]  }
 0x862   :  { %v3853_v16 = vpop.f32.mrb[200].mxu1  ;;  %v3966_v14 = vpop.f32.mrb[248].mxu0 }
 0x863   :  { %v3855_v11 = vpop.f32.mrb[201].mxu1  ;;  %v3968_v37 = vpop.f32.mrb[249].mxu0 }
 0x864   :  { %v3857_v9 = vpop.f32.mrb[202].mxu1  ;;  %v3970_v3 = vpop.f32.mrb[250].mxu0 }
 0x865   :  { %v4219_v41 = vpack.c.bf16 %v3857_v9, %v3853_v16  ;;  %v4221_v24 = vpack.c.bf16 %v3970_v3, %v3966_v14  ;;  %v3859_v17 = vpop.f32.mrb[203].mxu1  ;;  %v3972_v44 = vpop.f32.mrb[251].mxu0  ;;  %v7041_v14 = vld [vmem:[#allocation3 + $0x44] ss:$16 sps:$4 sm:$0xff]   ;;  %v7044_v9 = vld [vmem:[#allocation9 + $0x4c] ss:$12 sps:$4 sm:$0xff]  }
 0x866   :  { %v4220_v63 = vpack.c.bf16 %v3859_v17, %v3855_v11  ;;  %v4222_v1 = vpack.c.bf16 %v3972_v44, %v3968_v37  ;;  %v7042_v11 = vld [vmem:[#allocation3 + $0x4c] ss:$16 sps:$4 sm:$0xff]   ;;  %v7047_v44 = vld [vmem:[#allocation9 + $0x64] ss:$12 sps:$4 sm:$0xff]  }
 0x867   :  { %v7043_v37 = vld [vmem:[#allocation9 + $0x30] ss:$12 sps:$4 sm:$0xff]  }
 0x868   :  { %5723 = vmatprep.subr.bf16.mxu0 %v4220_v63  ;;  %5787 = vmatprep.subr.bf16.mxu1 %v4222_v1  ;;  %v7045_v3 = vld [vmem:[#allocation9 + $0x50] ss:$12 sps:$4 sm:$0xff]   ;;  %v7048_v63 = vld [vmem:[#allocation9 + $0x68] ss:$12 sps:$4 sm:$0xff]  }
 0x869   :  { %5724 = vmatpush3.bf16.msra.mxu0 %v4219_v41  ;;  %5788 = vmatpush3.bf16.msra.mxu1 %v4221_v24  ;;  %v7046_v24 = vld [vmem:[#allocation9 + $0x48] ss:$12 sps:$4 sm:$0xff]  }
 0x86b   :  { %v3863_v2 = vpop.f32.mrb[204].mxu1  ;;  %v3976_v23 = vpop.f32.mrb[252].mxu0 }
 0x86c   :  { %v3865_v33 = vpop.f32.mrb[205].mxu1  ;;  %v3978_v57 = vpop.f32.mrb[253].mxu0 }
 0x86d   :  { %v3867_v51 = vpop.f32.mrb[206].mxu1  ;;  %v3980_v48 = vpop.f32.mrb[254].mxu0 }
 0x86e   :  { %v4223_v10 = vpack.c.bf16 %v3867_v51, %v3863_v2  ;;  %v4225_v5 = vpack.c.bf16 %v3980_v48, %v3976_v23  ;;  %v3869_v58 = vpop.f32.mrb[207].mxu1  ;;  %v3982_v32 = vpop.f32.mrb[255].mxu0  ;;  %v7049_v2 = vld [vmem:[#allocation3 + $0x40] ss:$16 sps:$4 sm:$0xff]   ;;  %v7050_v23 = vld [vmem:[#allocation3 + $0x48] ss:$16 sps:$4 sm:$0xff]  }
 0x86f   :  { %v4224_v8 = vpack.c.bf16 %v3869_v58, %v3865_v33  ;;  %v4226_v22 = vpack.c.bf16 %v3982_v32, %v3978_v57  ;;  %v7051_v57 = vld [vmem:[#allocation3 + $0x64] ss:$16 sps:$4 sm:$0xff]   ;;  %v7052_v51 = vld [vmem:[#allocation3 + $0x6c] ss:$16 sps:$4 sm:$0xff]  }
 0x870   :  { %v7053_v48 = vld [vmem:[#allocation9 + $0x60] ss:$12 sps:$4 sm:$0xff]   ;;  %v7056_v32 = vld [vmem:[#allocation9 + $0x78] ss:$12 sps:$4 sm:$0xff]  }
 0x871   :  { %5725 = vmatprep.subr.bf16.mxu0 %v4224_v8  ;;  %5789 = vmatprep.subr.bf16.mxu1 %v4226_v22  ;;  %v7057_v22 = vld [vmem:[#allocation9 + $0x94] ss:$12 sps:$4 sm:$0xff]  }
 0x872   :  { %5726 = vmatpush3.bf16.msra.mxu0 %v4223_v10  ;;  %5790 = vmatpush3.bf16.msra.mxu1 %v4225_v5  ;;  %v7054_v10 = vld [vmem:[#allocation9 + $0x7c] ss:$12 sps:$4 sm:$0xff]   ;;  %v7055_v5 = vld [vmem:[#allocation9 + $0x80] ss:$12 sps:$4 sm:$0xff]  }
 0x873   :  { %v8282_v60 = vpop.f32.mrb[0].mxu0  ;;  %4493 = vmatprep.subr.bf16.mxu1 %v7027_v27  ;;  %6033 = vmatprep.subr.bf16.mxu0 %v7028_v6  ;;  %v7058_v27 = vld [vmem:[#allocation9 + $0x98] ss:$12 sps:$4 sm:$0xff]  }
 0x874   :  { %v8284_v15 = vpop.f32.mrb[1].mxu0 }
 0x875   :  { %v8286_v34 = vpop.f32.mrb[2].mxu0  ;;  %4324 = vmatmul.mubr.bf16.vlgmr.msra.gmra.mrb[16].mxu0 %v7029_v4  ;;  %4421 = vmatmul.mubr.bf16.vlgmr.msra.gmra.mrb[240].mxu1 %v7030_v52  ;;  %v7059_v4 = vld [vmem:[#allocation3 + $0x60] ss:$16 sps:$4 sm:$0xff]   ;;  %v7060_v52 = vld [vmem:[#allocation3 + $0x68] ss:$16 sps:$4 sm:$0xff]  }
 0x876   :  { %v8288_v29 = vpop.f32.mrb[3].mxu0  ;;  %4331 = vmatprep.mubr.bf16.mxu0 %v7031_v19  ;;  %4428 = vmatprep.mubr.bf16.mxu1 %v7032_v49  ;;  %v7061_v49 = vld [vmem:[#allocation3 + $0x84] ss:$16 sps:$4 sm:$0xff]  }
 0x877   :  { %4494 = vmatpush1.bf16.msra.mxu1 %v7033_v59  ;;  %6034 = vmatpush3.bf16.msra.mxu0 %v7028_v6  ;;  %v7062_v59 = vld [vmem:[#allocation3 + $0x8c] ss:$16 sps:$4 sm:$0xff]  }
 0x878   :  { %4495 = vmatprep.subr.bf16.mxu1 %v7034_v56  ;;  %6035 = vmatprep.subr.bf16.mxu0 %v7035_v36  ;;  %v7063_v56 = vld [vmem:[#allocation9 + $0x90] ss:$12 sps:$4 sm:$0xff]  }
 0x87b   :  { %v8290_v50 = vpop.f32.mrb[4].mxu0  ;;  %4496 = vmatpush1.bf16.msra.mxu1 %v7036_v7  ;;  %6036 = vmatpush3.bf16.msra.mxu0 %v7035_v36  ;;  %v7064_v36 = vld [vmem:[#allocation9 + $0xac] ss:$12 sps:$4 sm:$0xff]   ;;  %v7065_v7 = vld [vmem:[#allocation9 + $0xb0] ss:$12 sps:$4 sm:$0xff]  }
 0x87c   :  { %v8292_v62 = vpop.f32.mrb[5].mxu0  ;;  %4497 = vmatprep.subr.bf16.mxu1 %v7037_v0  ;;  %6037 = vmatprep.subr.bf16.mxu0 %v7038_v53  ;;  %v7066_v0 = vld [vmem:[#allocation9 + $0xa8] ss:$12 sps:$4 sm:$0xff]  }
 0x87d   :  { %v8294_v28 = vpop.f32.mrb[6].mxu0  ;;  %4332 = vmatmul.mubr.bf16.gmra.mrb[20].mxu0 %v7039_v26  ;;  %4429 = vmatmul.mubr.bf16.gmra.mrb[244].mxu1 %v7040_v35  ;;  %v7068_v26 = vld [vmem:[#allocation3 + $0x88] ss:$16 sps:$4 sm:$0xff]   ;;  %v7069_v35 = vld [vmem:[#allocation3 + $0xa4] ss:$16 sps:$4 sm:$0xff]  }
 0x87e   :  { %v8296_v16 = vpop.f32.mrb[7].mxu0  ;;  %4339 = vmatprep.mubr.bf16.mxu0 %v7041_v14  ;;  %4436 = vmatprep.mubr.bf16.mxu1 %v7042_v11  ;;  %v7070_v14 = vld [vmem:[#allocation3 + $0xac] ss:$16 sps:$4 sm:$0xff]   ;;  %v7071_v11 = vld [vmem:[#allocation3 + $0xa0] ss:$16 sps:$4 sm:$0xff]  }
 0x87f   :  { %4498 = vmatpush1.bf16.msra.mxu1 %v7043_v37  ;;  %6038 = vmatpush3.bf16.msra.mxu0 %v7038_v53  ;;  %v7067_v53 = vld [vmem:[#allocation3 + $0x80] ss:$16 sps:$4 sm:$0xff]   ;;  %v7072_v37 = vld [vmem:[#allocation3 + $0xa8] ss:$16 sps:$4 sm:$0xff]  }
 0x880   :  { %4499 = vmatprep.subr.bf16.mxu1 %v7044_v9  ;;  %6039 = vmatprep.subr.bf16.mxu0 %v7045_v3  ;;  %v7073_v9 = vld [vmem:[#allocation3 + $0xc4] ss:$16 sps:$4 sm:$0xff]  }
 0x883   :  { %v8298_v41 = vpop.f32.mrb[8].mxu0  ;;  %4500 = vmatpush1.bf16.msra.mxu1 %v7046_v24  ;;  %6040 = vmatpush3.bf16.msra.mxu0 %v7045_v3  ;;  %v7074_v3 = vld [vmem:[#allocation3 + $0xcc] ss:$16 sps:$4 sm:$0xff]   ;;  %v7075_v24 = vld [vmem:[#allocation3 + $0xc0] ss:$16 sps:$4 sm:$0xff]  }
 0x884   :  { %v8300_v17 = vpop.f32.mrb[9].mxu0  ;;  %4501 = vmatprep.subr.bf16.mxu1 %v7047_v44  ;;  %6041 = vmatprep.subr.bf16.mxu0 %v7048_v63  ;;  %v7076_v44 = vld [vmem:[#allocation3 + $0xc8] ss:$16 sps:$4 sm:$0xff]  }
 0x885   :  { %v8302_v1 = vpop.f32.mrb[10].mxu0  ;;  %4340 = vmatmul.mubr.bf16.gmra.mrb[24].mxu0 %v7049_v2  ;;  %4437 = vmatmul.mubr.bf16.gmra.mrb[248].mxu1 %v7050_v23  ;;  %v7078_v2 = vld [vmem:[#allocation3 + $0xec] ss:$16 sps:$4 sm:$0xff]   ;;  %v7079_v23 = vld [vmem:[#allocation3 + $0xe0] ss:$16 sps:$4 sm:$0xff]  }
 0x886   :  { %v8304_v33 = vpop.f32.mrb[11].mxu0  ;;  %4347 = vmatprep.mubr.bf16.mxu0 %v7051_v57  ;;  %4444 = vmatprep.mubr.bf16.mxu1 %v7052_v51  ;;  %v7080_v57 = vld [vmem:[#allocation3 + $0xe8] ss:$16 sps:$4 sm:$0xff]  }
 0x887   :  { %4502 = vmatpush1.bf16.msra.mxu1 %v7053_v48  ;;  %6042 = vmatpush3.bf16.msra.mxu0 %v7048_v63  ;;  %v7077_v63 = vld [vmem:[#allocation3 + $0xe4] ss:$16 sps:$4 sm:$0xff]  }
 0x888   :  { %4503 = vmatprep.subr.bf16.mxu1 %v7054_v10  ;;  %6043 = vmatprep.subr.bf16.mxu0 %v7055_v5 }
 0x88b   :  { %v8306_v58 = vpop.f32.mrb[12].mxu0  ;;  %4504 = vmatpush1.bf16.msra.mxu1 %v7056_v32  ;;  %6044 = vmatpush3.bf16.msra.mxu0 %v7055_v5 }
 0x88c   :  { %v8308_v8 = vpop.f32.mrb[13].mxu0  ;;  %4505 = vmatprep.subr.bf16.mxu1 %v7057_v22  ;;  %6045 = vmatprep.subr.bf16.mxu0 %v7058_v27 }
 0x88d   :  { %v8310_v6 = vpop.f32.mrb[14].mxu0  ;;  %4348 = vmatmul.mubr.bf16.gmra.mrb[28].mxu0 %v7059_v4  ;;  %4445 = vmatmul.mubr.bf16.gmra.mrb[252].mxu1 %v7060_v52 }
 0x88e   :  { %v8312_v19 = vpop.f32.mrb[15].mxu0  ;;  %4355 = vmatprep.mubr.bf16.mxu0 %v7061_v49  ;;  %4452 = vmatprep.mubr.bf16.mxu1 %v7062_v59  ;;  %v7081_v59 = vld [vmem:[#allocation8] sm:$0xff] }
 0x88f   :  { %4506 = vmatpush1.bf16.msra.mxu1 %v7063_v56  ;;  %6046 = vmatpush3.bf16.msra.mxu0 %v7058_v27 }
 0x890   :  { %4507 = vmatprep.subr.bf16.mxu1 %v7064_v36  ;;  %6047 = vmatprep.subr.bf16.mxu0 %v7065_v7 }
 0x893   :  { %4508 = vmatpush1.bf16.msra.mxu1 %v7066_v0  ;;  %6048 = vmatpush3.bf16.msra.mxu0 %v7065_v7  ;;  %v7082_v0 = vld [vmem:[#allocation8 + $0x8] sm:$0xff] }
 0x895   :  { %4356 = vmatmul.mubr.bf16.gmra.mrb[32].mxu0 %v7067_v53  ;;  %4453 = vmatmul.mubr.bf16.gmra.mrb[0].mxu1 %v7068_v26 }
 0x896   :  { %4363 = vmatprep.mubr.bf16.mxu0 %v7069_v35  ;;  %4460 = vmatprep.mubr.bf16.mxu1 %v7070_v14 }
 0x89d   :  { %4364 = vmatmul.mubr.bf16.gmra.mrb[36].mxu0 %v7071_v11  ;;  %4461 = vmatmul.mubr.bf16.gmra.mrb[4].mxu1 %v7072_v37 }
 0x89e   :  { %4371 = vmatprep.mubr.bf16.mxu0 %v7073_v9  ;;  %4468 = vmatprep.mubr.bf16.mxu1 %v7074_v3 }
 0x8a5   :  { %4372 = vmatmul.mubr.bf16.gmra.mrb[40].mxu0 %v7075_v24  ;;  %4469 = vmatmul.mubr.bf16.gmra.mrb[8].mxu1 %v7076_v44 }
 0x8a6   :  { %4379 = vmatprep.mubr.bf16.mxu0 %v7077_v63  ;;  %4476 = vmatprep.mubr.bf16.mxu1 %v7078_v2 }
 0x8ad   :  { %4380 = vmatmul.mubr.bf16.gmra.mrb[44].mxu0 %v7079_v23  ;;  %4477 = vmatmul.mubr.bf16.gmra.mrb[12].mxu1 %v7080_v57 }
 0x8ae   :  { %4525 = vmatprep.mubr.bf16.mxu1 %v8550_v61 }
 0x948   :  { %v5727_v51 = vpop.f32.mrb[16].mxu0  ;;  %v5791_v48 = vpop.f32.mrb[240].mxu1 }
 0x949   :  { %v5728_v10 = vpop.f32.mrb[17].mxu0  ;;  %v5792_v5 = vpop.f32.mrb[241].mxu1 }
 0x94a   :  { %v5729_v32 = vadd.f32 %v5728_v10, %v5727_v51  ;;  %v5730_v22 = vpop.f32.mrb[18].mxu0  ;;  %v5793_v27 = vadd.f32 %v5792_v5, %v5791_v48  ;;  %v5794_v4 = vpop.f32.mrb[242].mxu1  ;;  %v7083_v51 = vld [vmem:[#allocation8 + $0x10] sm:$0xff] }
 0x94b   :  { %v5731_v52 = vpop.f32.mrb[19].mxu0  ;;  %v5795_v49 = vpop.f32.mrb[243].mxu1 }
 0x94c   :  { %v4326_v56 = vadd.f32 %v7081_v59, %v5729_v32  ;;  %v5732_v36 = vadd.f32 %v5731_v52, %v5730_v22  ;;  %v5796_v7 = vadd.f32 %v5795_v49, %v5794_v4  ;;  %v7084_v32 = vld [vmem:[#allocation8 + $0x18] sm:$0xff] }
 0x94e   :  { %v4329_v53 = vadd.f32 %v7082_v0, %v5732_v36  ;;  %v4423_v26 = vadd.f32 %v5793_v27, %v4326_v56 }
 0x950   :  { %v4426_v35 = vadd.f32 %v5796_v7, %v4329_v53  ;;  %v5733_v14 = vpop.f32.mrb[20].mxu0  ;;  %v5797_v11 = vpop.f32.mrb[244].mxu1 }
 0x951   :  { %v5734_v37 = vpop.f32.mrb[21].mxu0  ;;  %v5798_v9 = vpop.f32.mrb[245].mxu1 }
 0x952   :  { %v4485_v3 = vpack.c.bf16 %v4426_v35, %v4423_v26  ;;  %v5735_v24 = vadd.f32 %v5734_v37, %v5733_v14  ;;  %v5736_v44 = vpop.f32.mrb[22].mxu0  ;;  %v5799_v63 = vadd.f32 %v5798_v9, %v5797_v11  ;;  %v5800_v2 = vpop.f32.mrb[246].mxu1  ;;  %v7085_v11 = vld [vmem:[#allocation8 + $0x20] sm:$0xff] }
 0x953   :  { %v5737_v23 = vpop.f32.mrb[23].mxu0  ;;  %v5801_v57 = vpop.f32.mrb[247].mxu1 }
 0x954   :  { %v4334_v48 = vadd.f32 %v7083_v51, %v5735_v24  ;;  %v5738_v10 = vadd.f32 %v5737_v23, %v5736_v44  ;;  %4526 = vmatmul.mubr.bf16.vlgmr.msra.gmra.mrb[208].mxu1 %v4485_v3  ;;  %v5802_v5 = vadd.f32 %v5801_v57, %v5800_v2  ;;  %6049 = vmatprep.mubr.bf16.mxu0 %v4485_v3  ;;  %v7086_v24 = vld [vmem:[#allocation8 + $0x28] sm:$0xff] }
 0x955   :  { %4535 = vmatprep.mubr.bf16.mxu1 %v8550_v61 }
 0x956   :  { %v4337_v22 = vadd.f32 %v7084_v32, %v5738_v10  ;;  %v4431_v27 = vadd.f32 %v5799_v63, %v4334_v48 }
 0x958   :  { %v4434_v4 = vadd.f32 %v5802_v5, %v4337_v22  ;;  %v5739_v52 = vpop.f32.mrb[24].mxu0  ;;  %v5803_v49 = vpop.f32.mrb[248].mxu1 }
 0x959   :  { %v5740_v59 = vpop.f32.mrb[25].mxu0  ;;  %v5804_v56 = vpop.f32.mrb[249].mxu1 }
 0x95a   :  { %v5741_v36 = vadd.f32 %v5740_v59, %v5739_v52  ;;  %v5742_v7 = vpop.f32.mrb[26].mxu0  ;;  %v5805_v0 = vadd.f32 %v5804_v56, %v5803_v49  ;;  %v5806_v53 = vpop.f32.mrb[250].mxu1  ;;  %v4486_v26 = vpack.c.bf16 %v4434_v4, %v4431_v27  ;;  %v7087_v49 = vld [vmem:[#allocation8 + $0x30] sm:$0xff] }
 0x95b   :  { %v5743_v35 = vpop.f32.mrb[27].mxu0  ;;  %v5807_v14 = vpop.f32.mrb[251].mxu1 }
 0x95c   :  { %v4342_v37 = vadd.f32 %v7085_v11, %v5741_v36  ;;  %v5744_v9 = vadd.f32 %v5743_v35, %v5742_v7  ;;  %4536 = vmatmul.mubr.bf16.gmra.mrb[212].mxu1 %v4486_v26  ;;  %6050 = vmatmul.mubr.bf16.vlgmr.msra.gmra.mrb[48].mxu0 %v4486_v26  ;;  %v5808_v3 = vadd.f32 %v5807_v14, %v5806_v53  ;;  %v7088_v7 = vld [vmem:[#allocation8 + $0x38] sm:$0xff] }
 0x95d   :  { %4545 = vmatprep.mubr.bf16.mxu1 %v8550_v61 }
 0x95e   :  { %v4345_v44 = vadd.f32 %v7086_v24, %v5744_v9  ;;  %v4439_v63 = vadd.f32 %v5805_v0, %v4342_v37 }
 0x960   :  { %v4442_v2 = vadd.f32 %v5808_v3, %v4345_v44  ;;  %v5745_v23 = vpop.f32.mrb[28].mxu0  ;;  %v5809_v57 = vpop.f32.mrb[252].mxu1 }
 0x961   :  { %v5746_v51 = vpop.f32.mrb[29].mxu0  ;;  %v5810_v48 = vpop.f32.mrb[253].mxu1 }
 0x962   :  { %v5747_v10 = vadd.f32 %v5746_v51, %v5745_v23  ;;  %v5748_v5 = vpop.f32.mrb[30].mxu0  ;;  %v5811_v32 = vadd.f32 %v5810_v48, %v5809_v57  ;;  %v5812_v22 = vpop.f32.mrb[254].mxu1  ;;  %v4487_v27 = vpack.c.bf16 %v4442_v2, %v4439_v63  ;;  %v7089_v57 = vld [vmem:[#allocation8 + $0x40] sm:$0xff] }
 0x963   :  { %v5749_v4 = vpop.f32.mrb[31].mxu0  ;;  %v5813_v52 = vpop.f32.mrb[255].mxu1 }
 0x964   :  { %v4350_v59 = vadd.f32 %v7087_v49, %v5747_v10  ;;  %v5750_v56 = vadd.f32 %v5749_v4, %v5748_v5  ;;  %4546 = vmatmul.mubr.bf16.gmra.mrb[216].mxu1 %v4487_v27  ;;  %v5814_v36 = vadd.f32 %v5813_v52, %v5812_v22  ;;  %6053 = vmatprep.mubr.bf16.mxu0 %v4487_v27  ;;  %v7090_v5 = vld [vmem:[#allocation8 + $0x48] sm:$0xff] }
 0x965   :  { %4555 = vmatprep.mubr.bf16.mxu1 %v8550_v61 }
 0x966   :  { %v4353_v0 = vadd.f32 %v7088_v7, %v5750_v56  ;;  %v4447_v53 = vadd.f32 %v5811_v32, %v4350_v59 }
 0x968   :  { %v4450_v26 = vadd.f32 %v5814_v36, %v4353_v0  ;;  %v5751_v35 = vpop.f32.mrb[32].mxu0  ;;  %v5815_v14 = vpop.f32.mrb[0].mxu1 }
 0x969   :  { %v5752_v11 = vpop.f32.mrb[33].mxu0  ;;  %v5816_v37 = vpop.f32.mrb[1].mxu1 }
 0x96a   :  { %v5753_v9 = vadd.f32 %v5752_v11, %v5751_v35  ;;  %v5754_v3 = vpop.f32.mrb[34].mxu0  ;;  %v5817_v24 = vadd.f32 %v5816_v37, %v5815_v14  ;;  %v5818_v44 = vpop.f32.mrb[2].mxu1  ;;  %v4488_v63 = vpack.c.bf16 %v4450_v26, %v4447_v53  ;;  %v7091_v14 = vld [vmem:[#allocation8 + $0x50] sm:$0xff] }
 0x96b   :  { %v5755_v2 = vpop.f32.mrb[35].mxu0  ;;  %v5819_v23 = vpop.f32.mrb[3].mxu1 }
 0x96c   :  { %v4358_v51 = vadd.f32 %v7089_v57, %v5753_v9  ;;  %v5756_v48 = vadd.f32 %v5755_v2, %v5754_v3  ;;  %4556 = vmatmul.mubr.bf16.gmra.mrb[220].mxu1 %v4488_v63  ;;  %6054 = vmatmul.mubr.bf16.gmra.mrb[52].mxu0 %v4488_v63  ;;  %v5820_v10 = vadd.f32 %v5819_v23, %v5818_v44  ;;  %v7092_v3 = vld [vmem:[#allocation8 + $0x58] sm:$0xff] }
 0x96d   :  { %4565 = vmatprep.mubr.bf16.mxu1 %v8550_v61 }
 0x96e   :  { %v4361_v32 = vadd.f32 %v7090_v5, %v5756_v48  ;;  %v4455_v22 = vadd.f32 %v5817_v24, %v4358_v51 }
 0x970   :  { %v4458_v27 = vadd.f32 %v5820_v10, %v4361_v32  ;;  %v5757_v4 = vpop.f32.mrb[36].mxu0  ;;  %v5821_v52 = vpop.f32.mrb[4].mxu1 }
 0x971   :  { %v5758_v49 = vpop.f32.mrb[37].mxu0  ;;  %v5822_v59 = vpop.f32.mrb[5].mxu1 }
 0x972   :  { %v5759_v56 = vadd.f32 %v5758_v49, %v5757_v4  ;;  %v5760_v36 = vpop.f32.mrb[38].mxu0  ;;  %v5823_v7 = vadd.f32 %v5822_v59, %v5821_v52  ;;  %v5824_v0 = vpop.f32.mrb[6].mxu1  ;;  %v4489_v53 = vpack.c.bf16 %v4458_v27, %v4455_v22  ;;  %v7093_v52 = vld [vmem:[#allocation8 + $0x60] sm:$0xff] }
 0x973   :  { %v5761_v26 = vpop.f32.mrb[39].mxu0  ;;  %v5825_v35 = vpop.f32.mrb[7].mxu1 }
 0x974   :  { %v4366_v11 = vadd.f32 %v7091_v14, %v5759_v56  ;;  %v5762_v37 = vadd.f32 %v5761_v26, %v5760_v36  ;;  %4566 = vmatmul.mubr.bf16.gmra.mrb[224].mxu1 %v4489_v53  ;;  %v5826_v9 = vadd.f32 %v5825_v35, %v5824_v0  ;;  %6057 = vmatprep.mubr.bf16.mxu0 %v4489_v53  ;;  %v7094_v36 = vld [vmem:[#allocation8 + $0x68] sm:$0xff] }
 0x975   :  { %4575 = vmatprep.mubr.bf16.mxu1 %v8550_v61 }
 0x976   :  { %v4369_v24 = vadd.f32 %v7092_v3, %v5762_v37  ;;  %v4463_v44 = vadd.f32 %v5823_v7, %v4366_v11 }
 0x978   :  { %v4466_v63 = vadd.f32 %v5826_v9, %v4369_v24  ;;  %v5763_v2 = vpop.f32.mrb[40].mxu0  ;;  %v5827_v23 = vpop.f32.mrb[8].mxu1 }
 0x979   :  { %v5764_v57 = vpop.f32.mrb[41].mxu0  ;;  %v5828_v51 = vpop.f32.mrb[9].mxu1 }
 0x97a   :  { %v5765_v48 = vadd.f32 %v5764_v57, %v5763_v2  ;;  %v5766_v10 = vpop.f32.mrb[42].mxu0  ;;  %v5829_v5 = vadd.f32 %v5828_v51, %v5827_v23  ;;  %v5830_v32 = vpop.f32.mrb[10].mxu1  ;;  %v4490_v22 = vpack.c.bf16 %v4466_v63, %v4463_v44  ;;  %v7095_v23 = vld [vmem:[#allocation8 + $0x70] sm:$0xff] }
 0x97b   :  { %v5767_v27 = vpop.f32.mrb[43].mxu0  ;;  %v5831_v4 = vpop.f32.mrb[11].mxu1 }
 0x97c   :  { %v4374_v49 = vadd.f32 %v7093_v52, %v5765_v48  ;;  %v5768_v59 = vadd.f32 %v5767_v27, %v5766_v10  ;;  %4576 = vmatmul.mubr.bf16.gmra.mrb[228].mxu1 %v4490_v22  ;;  %6058 = vmatmul.mubr.bf16.gmra.mrb[56].mxu0 %v4490_v22  ;;  %v5832_v56 = vadd.f32 %v5831_v4, %v5830_v32  ;;  %v7096_v10 = vld [vmem:[#allocation8 + $0x78] sm:$0xff] }
 0x97d   :  { %4585 = vmatprep.mubr.bf16.mxu1 %v8550_v61 }
 0x97e   :  { %v4377_v7 = vadd.f32 %v7094_v36, %v5768_v59  ;;  %v4471_v0 = vadd.f32 %v5829_v5, %v4374_v49 }
 0x980   :  { %v4474_v53 = vadd.f32 %v5832_v56, %v4377_v7  ;;  %v5769_v26 = vpop.f32.mrb[44].mxu0  ;;  %v5833_v35 = vpop.f32.mrb[12].mxu1 }
 0x981   :  { %v5770_v14 = vpop.f32.mrb[45].mxu0  ;;  %v5834_v11 = vpop.f32.mrb[13].mxu1 }
 0x982   :  { %v5771_v37 = vadd.f32 %v5770_v14, %v5769_v26  ;;  %v5772_v9 = vpop.f32.mrb[46].mxu0  ;;  %v5835_v3 = vadd.f32 %v5834_v11, %v5833_v35  ;;  %v5836_v24 = vpop.f32.mrb[14].mxu1  ;;  %v4491_v44 = vpack.c.bf16 %v4474_v53, %v4471_v0 }
 0x983   :  { %v5773_v63 = vpop.f32.mrb[47].mxu0  ;;  %v5837_v2 = vpop.f32.mrb[15].mxu1 }
 0x984   :  { %v4382_v57 = vadd.f32 %v7095_v23, %v5771_v37  ;;  %v5774_v51 = vadd.f32 %v5773_v63, %v5772_v9  ;;  %4586 = vmatmul.mubr.bf16.gmra.mrb[232].mxu1 %v4491_v44  ;;  %v5838_v48 = vadd.f32 %v5837_v2, %v5836_v24  ;;  %6061 = vmatprep.mubr.bf16.mxu0 %v4491_v44 }
 0x985   :  { %4595 = vmatprep.mubr.bf16.mxu1 %v8550_v61 }
 0x986   :  { %v4385_v5 = vadd.f32 %v7096_v10, %v5774_v51  ;;  %v4479_v32 = vadd.f32 %v5835_v3, %v4382_v57 }
 0x988   :  { %v4482_v22 = vadd.f32 %v5838_v48, %v4385_v5 }
 0x98a   :  { %v4492_v27 = vpack.c.bf16 %v4482_v22, %v4479_v32 }
 0x98c   :  { %4596 = vmatmul.mubr.bf16.gmra.mrb[236].mxu1 %v4492_v27  ;;  %6062 = vmatmul.mubr.bf16.gmra.mrb[60].mxu0 %v4492_v27 }
 0xa27   :  { %v4527_v4 = vpop.f32.mrb[208].mxu1 }
 0xa28   :  { %v4735_v52 = vadd.f32 %v4527_v4, %v7633_v55  ;;  %v4529_v49 = vpop.f32.mrb[209].mxu1 }
 0xa29   :  { %v4736_v59 = vadd.f32 %v4529_v49, %v7635_v20  ;;  %v4531_v56 = vpop.f32.mrb[210].mxu1 }
 0xa2a   :  { %v5334_v36 = vmul.f32 -1.442695, %v4735_v52  ;;  %v4737_v7 = vadd.f32 %v4531_v56, %v7633_v55  ;;  %v4533_v0 = vpop.f32.mrb[211].mxu1 }
 0xa2b   :  { %v5335_v53 = vmul.f32 -1.442695, %v4736_v59  ;;  %v4738_v61 = vadd.f32 %v4533_v0, %v7635_v20 }
 0xa2c   :  { %6680 = vpow2.f32 %v5334_v36  ;;  %v5336_v26 = vmul.f32 -1.442695, %v4737_v7 }
 0xa2d   :  { %6682 = vpow2.f32 %v5335_v53  ;;  %v5337_v35 = vmul.f32 -1.442695, %v4738_v61 }
 0xa2e   :  { %6684 = vpow2.f32 %v5336_v26 }
 0xa2f   :  { %v4537_v14 = vpop.f32.mrb[212].mxu1  ;;  %v8326_v11 = vpop.f32.mrb[48].mxu0  ;;  %6686 = vpow2.f32 %v5337_v35 }
 0xa30   :  { %v4739_v37 = vadd.f32 %v4537_v14, %v7633_v55  ;;  %v4539_v9 = vpop.f32.mrb[213].mxu1  ;;  %v8329_v3 = vpop.f32.mrb[49].mxu0 }
 0xa31   :  { %v4740_v24 = vadd.f32 %v4539_v9, %v7635_v20  ;;  %v4541_v44 = vpop.f32.mrb[214].mxu1  ;;  %v8332_v63 = vpop.f32.mrb[50].mxu0 }
 0xa32   :  { %v5338_v2 = vmul.f32 -1.442695, %v4739_v37  ;;  %v4741_v23 = vadd.f32 %v4541_v44, %v7633_v55  ;;  %v4543_v57 = vpop.f32.mrb[215].mxu1  ;;  %v8335_v51 = vpop.f32.mrb[51].mxu0 }
 0xa33   :  { %v4742_v48 = vadd.f32 %v4543_v57, %v7635_v20  ;;  %v5339_v10 = vmul.f32 -1.442695, %v4740_v24 }
 0xa34   :  { %6688 = vpow2.f32 %v5338_v2  ;;  %v5340_v5 = vmul.f32 -1.442695, %v4741_v23 }
 0xa35   :  { %v5341_v22 = vmul.f32 -1.442695, %v4742_v48 }
 0xa36   :  { %v6681_v32 = vpop.eup %6680  ;;  %6690 = vpow2.f32 %v5340_v5 }
 0xa37   :  { %v6683_v27 = vpop.eup %6682  ;;  %v4863_v4 = vadd.f32 1.0, %v6681_v32  ;;  %v4547_v52 = vpop.f32.mrb[216].mxu1  ;;  %6692 = vpow2.f32 %v5339_v10 }
 0xa38   :  { %v6685_v49 = vpop.eup %6684  ;;  %v4743_v59 = vadd.f32 %v4547_v52, %v7633_v55  ;;  %v4549_v56 = vpop.f32.mrb[217].mxu1  ;;  %v4864_v53 = vadd.f32 1.0, %v6683_v27 }
 0xa39   :  { %6694 = vrcp.f32 %v4863_v4  ;;  %v4865_v36 = vadd.f32 1.0, %v6685_v49  ;;  %v4744_v7 = vadd.f32 %v4549_v56, %v7635_v20  ;;  %v4551_v0 = vpop.f32.mrb[218].mxu1  ;;  %v6687_v24 = vpop.eup %6686 }
 0xa3a   :  { %6696 = vpow2.f32 %v5341_v22  ;;  %v5342_v61 = vmul.f32 -1.442695, %v4743_v59  ;;  %v4745_v26 = vadd.f32 %v4551_v0, %v7633_v55  ;;  %v4553_v35 = vpop.f32.mrb[219].mxu1  ;;  %v4866_v5 = vadd.f32 1.0, %v6687_v24  ;;  %v8365_v24 = vld [vmem:[%s8508_s8] ss:$0 sm:$0xff] }
 0xa3b   :  { %6698 = vrcp.f32 %v4865_v36  ;;  %v4746_v14 = vadd.f32 %v4553_v35, %v7635_v20  ;;  %v5343_v37 = vmul.f32 -1.442695, %v4744_v7  ;;  %v8353_v36 = vld [vmem:[%s8509_s9] ss:$0 sm:$0xff]  ;;  %s7230_s8 = smov [#allocation11]  }
 0xa3c   :  { %v5344_v9 = vmul.f32 -1.442695, %v4745_v26  ;;  %6700 = vpow2.f32 %v5342_v61  ;;  %v4975_v7 = vadd.f32 %v8353_v36, %v8284_v15  ;;  %v4959_v15 = vadd.f32 %v8365_v24, %v8329_v3  ;;  %s5124_s12 = sshll.u32 %s7230_s8, 4  ;;  %s5125_s12 = int_to_ptr.vmem [resolvable:$true] %s5124_s12 }
 0xa3d   :  { %6702 = vrcp.f32 %v4864_v53  ;;  %v5345_v2 = vmul.f32 -1.442695, %v4746_v14  ;;  %v4976_v14 = vadd.f32 %v8353_v36, %v8288_v29  ;;  %s7187_s1 = scalar_lea.vmem %s5125_s12, 2048  ;;  %p7192_p5 = scmp.lt.s32.totalorder %s5125_s12, %s5125_s12 }
 0xa3e   :  { %v6689_v44 = vpop.eup %6688  ;;  %6704 = vpow2.f32 %v5344_v9  ;;  %p7188_p4 = scmp.ne.s32.totalorder %s5125_s12, %s7187_s1  ;;  %p7193_p6 = scmp.lt.s32.totalorder %s7187_s1, %s7187_s1 }
 0xa3f   :  { %v4867_v23 = vadd.f32 1.0, %v6689_v44  ;;  %v4557_v57 = vpop.f32.mrb[220].mxu1  ;;  %v8342_v48 = vpop.f32.mrb[52].mxu0  ;;  %6706 = vpow2.f32 %v5343_v37 }
 0xa40   :  { %v6691_v10 = vpop.eup %6690  ;;  %v4747_v32 = vadd.f32 %v4557_v57, %v7633_v55  ;;  %v4559_v22 = vpop.f32.mrb[221].mxu1  ;;  %p7194_p7 = por %p7193_p6, %p7192_p5 }
 0xa41   :  { %v8345_v27 = vpop.f32.mrb[53].mxu0  ;;  %6708 = vrcp.f32 %v4867_v23  ;;  %v4869_v4 = vadd.f32 1.0, %v6691_v10  ;;  %v4748_v52 = vadd.f32 %v4559_v22, %v7635_v20  ;;  %v4561_v49 = vpop.f32.mrb[222].mxu1  ;;  %v4960_v10 = vadd.f32 %v8365_v24, %v8335_v51 }
 0xa42   :  { %v8348_v59 = vpop.f32.mrb[54].mxu0  ;;  %v6693_v56 = vpop.eup %6692  ;;  %6710 = vpow2.f32 %v5345_v2  ;;  %v5346_v0 = vmul.f32 -1.442695, %v4747_v32  ;;  %v4749_v53 = vadd.f32 %v4561_v49, %v7633_v55  ;;  %p7195_p8 = pnand %p7194_p7, %p7188_p4 }
 0xa43   :  { %v4563_v61 = vpop.f32.mrb[223].mxu1  ;;  %v8358_v26 = vpop.f32.mrb[55].mxu0  ;;  %6712 = vrcp.f32 %v4869_v4  ;;  %v5347_v37 = vmul.f32 -1.442695, %v4748_v52  ;;  %v4868_v57 = vadd.f32 1.0, %v6693_v56 }
 0xa44   :  { %v6695_v35 = vpop.eup %6694  ;;  %6714 = vrcp.f32 %v4866_v5  ;;  %v5348_v2 = vmul.f32 -1.442695, %v4749_v53  ;;  %v4750_v5 = vadd.f32 %v4563_v61, %v7635_v20 }
 0xa45   :  { %v6697_v9 = vpop.eup %6696  ;;  %v4991_v44 = vmul.f32 %v6695_v35, %v4975_v7  ;;  %6716 = vpow2.f32 %v5346_v0 }
 0xa46   :  { %v6699_v23 = vpop.eup %6698  ;;  %6718 = vpow2.f32 %v5347_v37  ;;  %v4870_v4 = vadd.f32 1.0, %v6697_v9  ;;  %v5349_v37 = vmul.f32 -1.442695, %v4750_v5 }
 0xa47   :  { %v5007_v29 = vadd.f32 %v4991_v44, %v4959_v15  ;;  %v4992_v32 = vmul.f32 %v6699_v23, %v4976_v14  ;;  %v6701_v22 = vpop.eup %6700  ;;  %6720 = vpow2.f32 %v5348_v2  ;;  %v4567_v52 = vpop.f32.mrb[224].mxu1  ;;  %v4977_v14 = vadd.f32 %v8353_v36, %v8282_v60 }
 0xa48   :  { %v6703_v49 = vpop.eup %6702  ;;  %v4871_v7 = vadd.f32 1.0, %v6701_v22  ;;  %v4751_v53 = vadd.f32 %v4567_v52, %v7633_v55  ;;  %v4569_v56 = vpop.f32.mrb[225].mxu1  ;;  %v4978_v23 = vadd.f32 %v8353_v36, %v8286_v34  ;;  %v4962_v60 = vadd.f32 %v8365_v24, %v8332_v63 }
 0xa49   :  { %6722 = vtanh.f32 %v5007_v29  ;;  %v5008_v3 = vadd.f32 %v4992_v32, %v4960_v10  ;;  %v6705_v35 = vpop.eup %6704  ;;  %v4571_v51 = vpop.f32.mrb[226].mxu1  ;;  %v4961_v10 = vadd.f32 %v8365_v24, %v8326_v11  ;;  %v8384_v34 = vadd.f32 %v8353_v36, %v8290_v50 }
 0xa4a   :  { %6724 = vrcp.f32 %v4868_v57  ;;  %v6707_v0 = vpop.eup %6706  ;;  %v4873_v61 = vadd.f32 1.0, %v6705_v35  ;;  %v4573_v9 = vpop.f32.mrb[227].mxu1  ;;  %v5350_v44 = vmul.f32 -1.442695, %v4751_v53  ;;  %v4979_v11 = vadd.f32 %v8353_v36, %v8292_v62 }
 0xa4b   :  { %6726 = vtanh.f32 %v5008_v3  ;;  %v6709_v15 = vpop.eup %6708  ;;  %v4872_v32 = vadd.f32 1.0, %v6707_v0  ;;  %v4752_v3 = vadd.f32 %v4569_v56, %v7635_v20  ;;  %v5039_v50 = vsub.f32 1.0, %v6703_v49 }
 0xa4c   :  { %6728 = vrcp.f32 %v4871_v7  ;;  %v6711_v2 = vpop.eup %6710  ;;  %v4993_v57 = vmul.f32 %v6709_v15, %v4977_v14 }
 0xa4d   :  { %6730 = vrcp.f32 %v4870_v4  ;;  %v6713_v29 = vpop.eup %6712  ;;  %v4753_v4 = vadd.f32 %v4571_v51, %v7633_v55  ;;  %v4874_v14 = vadd.f32 1.0, %v6711_v2 }
 0xa4e   :  { %6732 = vrcp.f32 %v4873_v61  ;;  %v6715_v5 = vpop.eup %6714  ;;  %v5009_v22 = vadd.f32 %v4993_v57, %v4961_v10  ;;  %v4994_v52 = vmul.f32 %v6713_v29, %v4978_v23  ;;  %v5071_v23 = vmul.f32 %v6703_v49, %v8082_v25 }
 0xa4f   :  { %6734 = vpow2.f32 %v5349_v37  ;;  %v6717_v7 = vpop.eup %6716  ;;  %v4577_v63 = vpop.f32.mrb[228].mxu1  ;;  %v5040_v57 = vsub.f32 1.0, %v6715_v5  ;;  %v5352_v47 = vmul.f32 -1.442695, %v4753_v4  ;;  %v4754_v25 = vadd.f32 %v4573_v9, %v7635_v20 }
 0xa50   :  { %6736 = vpow2.f32 %v5350_v44  ;;  %v8389_v53 = vpop.f32.mrb[56].mxu0  ;;  %v6719_v35 = vpop.eup %6718  ;;  %v5010_v0 = vadd.f32 %v4994_v52, %v4962_v60  ;;  %v4875_v61 = vadd.f32 1.0, %v6717_v7  ;;  %v4755_v62 = vadd.f32 %v4577_v63, %v7633_v55 }
 0xa51   :  { %6738 = vtanh.f32 %v5009_v22  ;;  %v4579_v56 = vpop.f32.mrb[229].mxu1  ;;  %v8391_v37 = vpop.f32.mrb[57].mxu0  ;;  %v5351_v60 = vmul.f32 -1.442695, %v4752_v3  ;;  %v5072_v63 = vmul.f32 %v6715_v5, %v8085_v12  ;;  %v4876_v30 = vadd.f32 1.0, %v6719_v35 }
 0xa52   :  { %v6721_v15 = vpop.eup %6720  ;;  %6740 = vrcp.f32 %v4872_v32  ;;  %v4581_v44 = vpop.f32.mrb[230].mxu1  ;;  %v4980_v32 = vadd.f32 %v8353_v36, %v8296_v16  ;;  %v5354_v40 = vmul.f32 -1.442695, %v4755_v62  ;;  %v4756_v9 = vadd.f32 %v4579_v56, %v7635_v20 }
 0xa53   :  { %v8395_v51 = vpop.f32.mrb[58].mxu0  ;;  %v6723_v10 = vpop.eup %6722  ;;  %6742 = vtanh.f32 %v5010_v0  ;;  %v4877_v29 = vadd.f32 1.0, %v6721_v15  ;;  %v5353_v12 = vmul.f32 -1.442695, %v4754_v25  ;;  %v4757_v5 = vadd.f32 %v4581_v44, %v7633_v55 }
 0xa54   :  { %v4583_v2 = vpop.f32.mrb[231].mxu1  ;;  %v8397_v22 = vpop.f32.mrb[59].mxu0  ;;  %v5055_v7 = vmul.f32 %v6723_v10, %v5039_v50  ;;  %6744 = vrcp.f32 %v4875_v61  ;;  %v4963_v61 = vadd.f32 %v8365_v24, %v8345_v27  ;;  %v4964_v62 = vadd.f32 %v8365_v24, %v8358_v26 }
 0xa55   :  { %v6725_v52 = vpop.eup %6724  ;;  %6746 = vrcp.f32 %v4874_v14 }
 0xa56   :  { %v6727_v49 = vpop.eup %6726  ;;  %v5087_v15 = vadd.f32 %v5071_v23, %v5055_v7  ;;  %6748 = vrcp.f32 %v4877_v29  ;;  %v5073_v56 = vmul.f32 %v6725_v52, %v8113_v45 }
 0xa57   :  { %v6729_v0 = vpop.eup %6728  ;;  %v5056_v3 = vmul.f32 %v6727_v49, %v5040_v57  ;;  %6750 = vpow2.f32 %v5351_v60  ;;  %v4587_v35 = vpop.f32.mrb[232].mxu1  ;;  %v5041_v57 = vsub.f32 1.0, %v6725_v52 }
 0xa58   :  { %v6731_v38 = vpop.eup %6730  ;;  %v4995_v4 = vmul.f32 %v6729_v0, %v4979_v11  ;;  %5103 = vst [vmem:[#allocation11] sm:$0xff] %v5087_v15  ;;  %6752 = vpow2.f32 %v5352_v47  ;;  %v4589_v27 = vpop.f32.mrb[233].mxu1  ;;  %v4759_v47 = vadd.f32 %v4587_v35, %v7633_v55 }
 0xa59   :  { %v6733_v50 = vpop.eup %6732  ;;  %v5088_v16 = vadd.f32 %v5072_v63, %v5056_v3  ;;  %6754 = vrcp.f32 %v4876_v30  ;;  %v4591_v29 = vpop.f32.mrb[234].mxu1  ;;  %v5355_v30 = vmul.f32 -1.442695, %v4756_v9  ;;  %v5356_v63 = vmul.f32 -1.442695, %v4757_v5 }
 0xa5a   :  { %v6735_v14 = vpop.eup %6734  ;;  %v5011_v23 = vadd.f32 %v4995_v4, %v4963_v61  ;;  %v4996_v10 = vmul.f32 %v6733_v50, %v4980_v32  ;;  %6756 = vpow2.f32 %v5354_v40  ;;  %v8411_v25 = vpop.f32.mrb[235].mxu1  ;;  %v5042_v32 = vsub.f32 1.0, %v6731_v38 }
 0xa5b   :  { %v6737_v11 = vpop.eup %6736  ;;  %5104 = vst [vmem:[#allocation11 + $0x8] sm:$0xff] %v5088_v16  ;;  %v5074_v45 = vmul.f32 %v6731_v38, %v8117_v39  ;;  %v4878_v52 = vadd.f32 1.0, %v6735_v14  ;;  %v4758_v40 = vadd.f32 %v4583_v2, %v7635_v20  ;;  %v5358_v4 = vmul.f32 -1.442695, %v4759_v47 }
 0xa5c   :  { %v6739_v60 = vpop.eup %6738  ;;  %6758 = vtanh.f32 %v5011_v23  ;;  %v5012_v44 = vadd.f32 %v4996_v10, %v4964_v62  ;;  %v4879_v7 = vadd.f32 1.0, %v6737_v11  ;;  %v4982_v50 = vadd.f32 %v8353_v36, %v8294_v28 }
 0xa5d   :  { %v6741_v49 = vpop.eup %6740  ;;  %v5057_v26 = vmul.f32 %v6739_v60, %v5041_v57  ;;  %6760 = vpow2.f32 %v5353_v12  ;;  %v4965_v16 = vadd.f32 %v8365_v24, %v8342_v48  ;;  %v4966_v23 = vadd.f32 %v8365_v24, %v8348_v59 }
 0xa5e   :  { %v6743_v0 = vpop.eup %6742  ;;  %6762 = vtanh.f32 %v5012_v44  ;;  %v4761_v11 = vadd.f32 %v4591_v29, %v7633_v55  ;;  %v4760_v59 = vadd.f32 %v4589_v27, %v7635_v20  ;;  %v5075_v29 = vmul.f32 %v6741_v49, %v8160_v21 }
 0xa5f   :  { %v6745_v15 = vpop.eup %6744  ;;  %v5089_v3 = vadd.f32 %v5073_v56, %v5057_v26  ;;  %v5058_v61 = vmul.f32 %v6743_v0, %v5042_v32  ;;  %6764 = vrcp.f32 %v4879_v7  ;;  %v4597_v2 = vpop.f32.mrb[236].mxu1  ;;  %v5043_v32 = vsub.f32 1.0, %v6741_v49 }
 0xa60   :  { %v6747_v9 = vpop.eup %6746  ;;  %v4997_v12 = vmul.f32 %v6745_v15, %v8384_v34  ;;  %6766 = vpow2.f32 %v5355_v30  ;;  %v8420_v5 = vpop.f32.mrb[60].mxu0  ;;  %v5357_v34 = vmul.f32 -1.442695, %v4758_v40 }
 0xa61   :  { %v6749_v39 = vpop.eup %6748  ;;  %5105 = vst [vmem:[#allocation11 + $0x10] sm:$0xff] %v5089_v3  ;;  %v5090_v38 = vadd.f32 %v5074_v45, %v5058_v61  ;;  %6768 = vpow2.f32 %v5356_v63  ;;  %v4599_v28 = vpop.f32.mrb[237].mxu1  ;;  %v4763_v63 = vadd.f32 %v4597_v2, %v7633_v55  ;;  %v5044_v15 = vsub.f32 1.0, %v6747_v9 }
 0xa62   :  { %v6751_v35 = vpop.eup %6750  ;;  %v5013_v14 = vadd.f32 %v4997_v12, %v4965_v16  ;;  %v4998_v62 = vmul.f32 %v6749_v39, %v4982_v50  ;;  %6770 = vrcp.f32 %v4878_v52  ;;  %v8424_v10 = vpop.f32.mrb[61].mxu0  ;;  %v5360_v61 = vmul.f32 -1.442695, %v4761_v11 }
 0xa63   :  { %v6753_v48 = vpop.eup %6752  ;;  %5106 = vst [vmem:[#allocation11 + $0x18] sm:$0xff] %v5090_v38  ;;  %6772 = vpow2.f32 %v5358_v4  ;;  %v4601_v57 = vpop.f32.mrb[238].mxu1  ;;  %v4880_v45 = vadd.f32 1.0, %v6751_v35  ;;  %v4983_v4 = vadd.f32 %v8353_v36, %v8300_v17  ;;  %v5076_v50 = vmul.f32 %v6747_v9, %v8164_v31 }
 0xa64   :  { %v8427_v56 = vpop.f32.mrb[62].mxu0  ;;  %v6755_v47 = vpop.eup %6754  ;;  %6774 = vtanh.f32 %v5013_v14  ;;  %v5014_v60 = vadd.f32 %v4998_v62, %v4966_v23  ;;  %v4881_v44 = vadd.f32 1.0, %v6753_v48  ;;  %v5359_v16 = vmul.f32 -1.442695, %v4760_v59 }
 0xa65   :  { %v8430_v7 = vpop.f32.mrb[239].mxu1  ;;  %v8432_v30 = vpop.f32.mrb[63].mxu0  ;;  %v5362_v21 = vmul.f32 -1.442695, %v4763_v63  ;;  %v4967_v2 = vadd.f32 %v8365_v24, %v8391_v37  ;;  %v4762_v14 = vadd.f32 %v8411_v25, %v7635_v20  ;;  %v4764_v37 = vadd.f32 %v4599_v28, %v7635_v20 }
 0xa66   :  { %v6757_v26 = vpop.eup %6756  ;;  %6776 = vtanh.f32 %v5014_v60  ;;  %v5045_v60 = vsub.f32 1.0, %v6755_v47  ;;  %v5077_v63 = vmul.f32 %v6755_v47, %v8180_v54  ;;  %v4968_v54 = vadd.f32 %v8365_v24, %v8397_v22 }
 0xa67   :  { %v6759_v0 = vpop.eup %6758  ;;  %v4883_v52 = vadd.f32 1.0, %v6757_v26  ;;  %6778 = vrcp.f32 %v4881_v44  ;;  %v5361_v26 = vmul.f32 -1.442695, %v4762_v14 }
 0xa68   :  { %v6761_v40 = vpop.eup %6760  ;;  %v5059_v3 = vmul.f32 %v6759_v0, %v5043_v32  ;;  %6780 = vpow2.f32 %v5357_v34  ;;  %v4765_v34 = vadd.f32 %v4601_v57, %v7633_v55  ;;  %v4984_v55 = vadd.f32 %v8353_v36, %v8304_v33 }
 0xa69   :  { %v6763_v27 = vpop.eup %6762  ;;  %6782 = vrcp.f32 %v4883_v52  ;;  %v4882_v31 = vadd.f32 1.0, %v6761_v40 }
 0xa6a   :  { %v6765_v12 = vpop.eup %6764  ;;  %v5091_v39 = vadd.f32 %v5075_v29, %v5059_v3  ;;  %v5060_v38 = vmul.f32 %v6763_v27, %v5044_v15  ;;  %6784 = vrcp.f32 %v4880_v45  ;;  %v5364_v45 = vmul.f32 -1.442695, %v4765_v34 }
 0xa6b   :  { %v6767_v49 = vpop.eup %6766  ;;  %v4999_v35 = vmul.f32 %v6765_v12, %v4983_v4  ;;  %6786 = vpow2.f32 %v5360_v61  ;;  %v5363_v15 = vmul.f32 -1.442695, %v4764_v37  ;;  %v4985_v61 = vadd.f32 %v8353_v36, %v8298_v41 }
 0xa6c   :  { %v6769_v23 = vpop.eup %6768  ;;  %5107 = vst [vmem:[#allocation11 + $0x20] sm:$0xff] %v5091_v39  ;;  %v5092_v17 = vadd.f32 %v5076_v50, %v5060_v38  ;;  %6788 = vpow2.f32 %v5359_v16  ;;  %v4884_v59 = vadd.f32 1.0, %v6767_v49  ;;  %v4766_v12 = vadd.f32 %v8430_v7, %v7635_v20 }
 0xa6d   :  { %v6771_v9 = vpop.eup %6770  ;;  %v5015_v62 = vadd.f32 %v4999_v35, %v4967_v2  ;;  %v4885_v48 = vadd.f32 1.0, %v6769_v23  ;;  %6790 = vpow2.f32 %v5362_v21 }
 0xa6e   :  { %v6773_v11 = vpop.eup %6772  ;;  %5108 = vst [vmem:[#allocation11 + $0x28] sm:$0xff] %v5092_v17  ;;  %v5046_v0 = vsub.f32 1.0, %v6771_v9  ;;  %v5078_v57 = vmul.f32 %v6771_v9, %v8190_v43  ;;  %v4969_v43 = vadd.f32 %v8365_v24, %v8389_v53  ;;  %v4986_v53 = vadd.f32 %v8353_v36, %v8302_v1 }
 0xa6f   :  { %v6775_v44 = vpop.eup %6774  ;;  %6792 = vtanh.f32 %v5015_v62  ;;  %v4887_v25 = vadd.f32 1.0, %v6773_v11  ;;  %v5365_v23 = vmul.f32 -1.442695, %v4766_v12  ;;  %v4987_v62 = vadd.f32 %v8353_v36, %v8308_v8 }
 0xa70   :  { %v5061_v32 = vmul.f32 %v6775_v44, %v5045_v60  ;;  %6794 = vrcp.f32 %v4885_v48  ;;  %v6777_v29 = vpop.eup %6776  ;;  %v4970_v48 = vadd.f32 %v8365_v24, %v8395_v51 }
 0xa71   :  { %6796 = vrcp.f32 %v4882_v31  ;;  %v6779_v52 = vpop.eup %6778  ;;  %v5062_v40 = vmul.f32 %v6777_v29, %v5046_v0 }
 0xa72   :  { %v5093_v28 = vadd.f32 %v5077_v63, %v5061_v32  ;;  %6798 = vrcp.f32 %v4887_v25  ;;  %v6781_v3 = vpop.eup %6780  ;;  %v5000_v47 = vmul.f32 %v6779_v52, %v4984_v55 }
 0xa73   :  { %6800 = vrcp.f32 %v4884_v59  ;;  %v6783_v27 = vpop.eup %6782  ;;  %v5094_v33 = vadd.f32 %v5078_v57, %v5062_v40  ;;  %v4886_v38 = vadd.f32 1.0, %v6781_v3 }
 0xa74   :  { %5109 = vst [vmem:[#allocation11 + $0x30] sm:$0xff] %v5093_v28  ;;  %6802 = vpow2.f32 %v5361_v26  ;;  %v6785_v4 = vpop.eup %6784  ;;  %v5001_v50 = vmul.f32 %v6783_v27, %v4985_v61  ;;  %v5016_v16 = vadd.f32 %v5000_v47, %v4968_v54  ;;  %v4989_v54 = vadd.f32 %v8353_v36, %v8306_v58 }
 0xa75   :  { %6804 = vpow2.f32 %v5364_v45  ;;  %v6787_v41 = vpop.eup %6786  ;;  %5110 = vst [vmem:[#allocation11 + $0x38] sm:$0xff] %v5094_v33  ;;  %v5047_v2 = vsub.f32 1.0, %v6785_v4  ;;  %v5079_v20 = vmul.f32 %v6785_v4, %v8209_v46  ;;  %v4971_v46 = vadd.f32 %v8365_v24, %v8424_v10 }
 0xa76   :  { %6806 = vpow2.f32 %v5363_v15  ;;  %v6789_v39 = vpop.eup %6788  ;;  %v5017_v22 = vadd.f32 %v5001_v50, %v4969_v43  ;;  %v4889_v21 = vadd.f32 1.0, %v6787_v41  ;;  %v4988_v10 = vadd.f32 %v8353_v36, %v8312_v19 }
 0xa77   :  { %6808 = vtanh.f32 %v5016_v16  ;;  %v6791_v49 = vpop.eup %6790  ;;  %v4888_v31 = vadd.f32 1.0, %v6789_v39  ;;  %v4973_v43 = vadd.f32 %v8365_v24, %v8420_v5 }
 0xa78   :  { %6810 = vtanh.f32 %v5017_v22  ;;  %v4891_v14 = vadd.f32 1.0, %v6791_v49 }
 0xa79   :  { %v6793_v35 = vpop.eup %6792  ;;  %6812 = vrcp.f32 %v4889_v21  ;;  %v4990_v21 = vadd.f32 %v8353_v36, %v8310_v6  ;;  %v8591_v6 = vld [vmem:[#allocation21_spill] sm:$0xff] }
 0xa7a   :  { %v6795_v17 = vpop.eup %6794  ;;  %v5063_v7 = vmul.f32 %v6793_v35, %v5047_v2  ;;  %6814 = vrcp.f32 %v4886_v38  ;;  %v8590_v2 = vld [vmem:[#allocation20_spill] sm:$0xff] }
 0xa7b   :  { %v6797_v9 = vpop.eup %6796  ;;  %v5002_v34 = vmul.f32 %v6795_v17, %v4986_v53  ;;  %6816 = vrcp.f32 %v4891_v14  ;;  %v4974_v14 = vadd.f32 %v8365_v24, %v8427_v56 }
 0xa7c   :  { %v6799_v11 = vpop.eup %6798  ;;  %v5095_v1 = vadd.f32 %v5079_v20, %v5063_v7  ;;  %6818 = vpow2.f32 %v5365_v23  ;;  %v5048_v51 = vsub.f32 1.0, %v6797_v9  ;;  %v5080_v29 = vmul.f32 %v6797_v9, %v8216_v42 }
 0xa7d   :  { %v6801_v60 = vpop.eup %6800  ;;  %v5018_v37 = vadd.f32 %v5002_v34, %v4970_v48  ;;  %v5003_v44 = vmul.f32 %v6799_v11, %v4987_v62  ;;  %6820 = vrcp.f32 %v4888_v31  ;;  %v4972_v42 = vadd.f32 %v8365_v24, %v8432_v30 }
 0xa7e   :  { %v6803_v59 = vpop.eup %6802  ;;  %5111 = vst [vmem:[#allocation11 + $0x40] sm:$0xff] %v5095_v1  ;;  %v5049_v55 = vsub.f32 1.0, %v6801_v60  ;;  %v5081_v15 = vmul.f32 %v6801_v60, %v8227_v13  ;;  %v8592_v1 = vld [vmem:[#allocation19_spill] sm:$0xff] }
 0xa7f   :  { %v6805_v25 = vpop.eup %6804  ;;  %6822 = vtanh.f32 %v5018_v37  ;;  %v5019_v8 = vadd.f32 %v5003_v44, %v4971_v46  ;;  %v4890_v0 = vadd.f32 1.0, %v6803_v59 }
 0xa80   :  { %v6807_v26 = vpop.eup %6806  ;;  %v4893_v32 = vadd.f32 1.0, %v6805_v25  ;;  %v8593_v25 = vld [vmem:[#allocation16_spill] sm:$0xff] }
 0xa81   :  { %v6809_v63 = vpop.eup %6808  ;;  %6824 = vtanh.f32 %v5019_v8  ;;  %v4892_v52 = vadd.f32 1.0, %v6807_v26 }
 0xa82   :  { %v5064_v57 = vmul.f32 %v6809_v63, %v5048_v51  ;;  %v6811_v45 = vpop.eup %6810  ;;  %6826 = vrcp.f32 %v4893_v32 }
 0xa83   :  { %v6813_v28 = vpop.eup %6812  ;;  %v5065_v40 = vmul.f32 %v6811_v45, %v5049_v55  ;;  %6828 = vrcp.f32 %v4890_v0 }
 0xa84   :  { %v5096_v3 = vadd.f32 %v5080_v29, %v5064_v57  ;;  %v6815_v61 = vpop.eup %6814  ;;  %v5004_v47 = vmul.f32 %v6813_v28, %v4988_v10  ;;  %6830 = vrcp.f32 %v4892_v52 }
 0xa85   :  { %v6817_v27 = vpop.eup %6816  ;;  %v5097_v33 = vadd.f32 %v5081_v15, %v5065_v40  ;;  %v5050_v16 = vsub.f32 1.0, %v6815_v61  ;;  %v5082_v30 = vmul.f32 %v6815_v61, %v8238_v18 }
 0xa86   :  { %5112 = vst [vmem:[#allocation11 + $0x48] sm:$0xff] %v5096_v3  ;;  %v6819_v19 = vpop.eup %6818  ;;  %v5005_v4 = vmul.f32 %v6817_v27, %v4989_v54  ;;  %v5020_v13 = vadd.f32 %v5004_v47, %v4972_v42 }
 0xa87   :  { %v6821_v50 = vpop.eup %6820  ;;  %5113 = vst [vmem:[#allocation11 + $0x50] sm:$0xff] %v5097_v33  ;;  %v4894_v39 = vadd.f32 1.0, %v6819_v19 }
 0xa88   :  { %v5021_v58 = vadd.f32 %v5005_v4, %v4973_v43  ;;  %6832 = vtanh.f32 %v5020_v13  ;;  %v5051_v22 = vsub.f32 1.0, %v6821_v50  ;;  %v5083_v35 = vmul.f32 %v6821_v50, %v8590_v2 }
 0xa89   :  { %v6823_v12 = vpop.eup %6822 }
 0xa8a   :  { %v5066_v41 = vmul.f32 %v6823_v12, %v5050_v16  ;;  %6834 = vtanh.f32 %v5021_v58 }
 0xa8b   :  { %v6825_v38 = vpop.eup %6824  ;;  %6836 = vrcp.f32 %v4894_v39 }
 0xa8c   :  { %v5098_v5 = vadd.f32 %v5082_v30, %v5066_v41  ;;  %v6827_v49 = vpop.eup %6826  ;;  %v5067_v53 = vmul.f32 %v6825_v38, %v5051_v22 }
 0xa8d   :  { %v5006_v23 = vmul.f32 %v6827_v49, %v4990_v21  ;;  %v6829_v17 = vpop.eup %6828 }
 0xa8e   :  { %5114 = vst [vmem:[#allocation11 + $0x58] sm:$0xff] %v5098_v5  ;;  %v5099_v18 = vadd.f32 %v5083_v35, %v5067_v53  ;;  %v6831_v7 = vpop.eup %6830  ;;  %v5052_v31 = vsub.f32 1.0, %v6829_v17  ;;  %v5084_v36 = vmul.f32 %v6829_v17, %v8591_v6 }
 0xa8f   :  { %v5022_v20 = vadd.f32 %v5006_v23, %v4974_v14  ;;  %v5053_v62 = vsub.f32 1.0, %v6831_v7  ;;  %v5085_v60 = vmul.f32 %v6831_v7, %v8592_v1 }
 0xa90   :  { %5115 = vst [vmem:[#allocation11 + $0x60] sm:$0xff] %v5099_v18 }
 0xa91   :  { %6838 = vtanh.f32 %v5022_v20 }
 0xa92   :  { %v6833_v9 = vpop.eup %6832 }
 0xa93   :  { %v5068_v48 = vmul.f32 %v6833_v9, %v5052_v31 }
 0xa94   :  { %v6835_v34 = vpop.eup %6834 }
 0xa95   :  { %v5069_v11 = vmul.f32 %v6835_v34, %v5053_v62  ;;  %v5100_v37 = vadd.f32 %v5084_v36, %v5068_v48  ;;  %v6837_v24 = vpop.eup %6836 }
 0xa96   :  { %v5054_v46 = vsub.f32 1.0, %v6837_v24  ;;  %v5086_v8 = vmul.f32 %v6837_v24, %v8593_v25 }
 0xa97   :  { %v5101_v56 = vadd.f32 %v5085_v60, %v5069_v11  ;;  %5116 = vst [vmem:[#allocation11 + $0x68] sm:$0xff] %v5100_v37 }
 0xa99   :  { %5117 = vst [vmem:[#allocation11 + $0x70] sm:$0xff] %v5101_v56 }
 0xa9b   :  { %v6839_v44 = vpop.eup %6838 }
 0xa9c   :  { %v5070_v59 = vmul.f32 %v6839_v44, %v5054_v46 }
 0xa9e   :  { %v5102_v26 = vadd.f32 %v5086_v8, %v5070_v59 }
 0xaa0   :  { %5118 = vst [vmem:[#allocation11 + $0x78] sm:$0xff] %v5102_v26 }
 0xaa1   :  { %7198 = shalt.err (!%p7195_p8)
}
 0xaa2   :  { %s7199_s16 = scalar_lea.hbm %s8510_s10, 2048 }
 0xaa3   :  { %p7200_p9 = scmp.ne.s32.totalorder %s8510_s10, %s7199_s16  ;;  %p7203_p10 = scmp.lt.u32.totalorder %s7199_s16, %s8510_s10 }
 0xaa5   :  { %p7205_p11 = pnand %p7203_p10, %p7200_p9 }
 0xaa7   :  { %7208 = shalt.err (!%p7205_p11)
}
 0xaa8   :  { %5130 = dma.vmem_to_hbm [thread:$0]  %s5125_s12, 2048, %s8510_s10, [#allocation5], %s7224_s3, %s7224_s3, %s7225_s28  }
 0xaa9   :  { %7215 = dma.done.wait [#allocation5], 2048  }
 0xaaa   :  { %7216 = vsyncadd [#allocation5], 4294965248 }
 0xaab   :  { %5134 = vsyncpa [#allocation4], 1 }
 0xaac   :  { %5135 = vsyncpa [#allocation7], 1 }
 0xaad   :  { %5136 = vsyncpa [#allocation10], 1 }
 0xaae   :  { %5137 = vsyncpa [#allocation5], 1 }

</bundles_post_ra>
